<compile_context>
chip_gen: v6e
topology: v6e:2x2x1
jax: 0.10.0
libtpu: 0.0.40
codegen_flags: <defaults>
</compile_context>

<pallas_src>
import functools
import numpy as np
import jax
import jax.numpy as jnp
from jax.experimental import pallas as pl
from jax.experimental.pallas import tpu as pltpu


def _round_up(n, m):
    return ((n + m - 1) // m) * m


def lstm_classifier_kernel(*refs, num_layers, seq_len, batch, hidden_pad):
    """Whole forward pass in one kernel: stacked LSTM over time + FC on last hidden.

    refs = (x_flat,                                    # (T*B, D)   time-major rows
            [wihT_0, whhT_0, b_0, ...,                 # (Din_pad, 4*Hp), (Hp, 4*Hp), (1, 4*Hp)
             wihT_{L-1}, whhT_{L-1}, b_{L-1}],
            fcwT, fcb,                                 # (Hp, Opad), (1, Opad)
            out)                                       # (B, Opad)
    """
    x_ref = refs[0]
    layer_refs = refs[1:1 + 3 * num_layers]
    fcw_ref = refs[1 + 3 * num_layers]
    fcb_ref = refs[2 + 3 * num_layers]
    out_ref = refs[3 + 3 * num_layers]

    T, B, Hp = seq_len, batch, hidden_pad

    # Layer-outer / time-inner.  seq_flat holds the current layer's input sequence,
    # time-major: row t*B + b  <->  (timestep t, batch b).
    seq_flat = x_ref[...].astype(jnp.float32)                      # (T*B, D_in)

    h = None
    for l in range(num_layers):
        wihT = layer_refs[3 * l][...]                              # (D_in_pad, 4*Hp)
        whhT = layer_refs[3 * l + 1][...]                          # (Hp, 4*Hp)
        bias = layer_refs[3 * l + 2][...]                          # (1, 4*Hp)

        # ONE batched input projection for the whole sequence; bias broadcast hoisted
        # out of the time loop (added here once per layer).
        gates_pre = (jnp.dot(seq_flat, wihT, preferred_element_type=jnp.float32)
                     + bias)                                       # (T*B, 4*Hp)
        gates_pre = gates_pre.reshape(T, B, 4 * Hp)                # index per step below

        h = jnp.zeros((B, Hp), jnp.float32)
        c = jnp.zeros((B, Hp), jnp.float32)
        outs = []
        # T is small (8): static unroll is fine.  Switch to lax.fori_loop (+ scratch for
        # the output sequence) if T grows, to bound vreg live ranges.
        for t in range(T):
            gates = gates_pre[t] + jnp.dot(h, whhT,
                                           preferred_element_type=jnp.float32)  # (B, 4*Hp)
            # Each slice is a full 128-lane-aligned block -> no sub-lane extracts.
            i_g = jax.nn.sigmoid(gates[:, 0 * Hp:1 * Hp])
            f_g = jax.nn.sigmoid(gates[:, 1 * Hp:2 * Hp])
            g_g = jnp.tanh(gates[:, 2 * Hp:3 * Hp])
            o_g = jax.nn.sigmoid(gates[:, 3 * Hp:4 * Hp])
            c = f_g * c + i_g * g_g
            h = o_g * jnp.tanh(c)
            outs.append(h)

        # Output sequence of this layer feeds the next layer (time-major rows).
        seq_flat = jnp.concatenate(outs, axis=0)                   # (T*B, Hp)

    # fc(out[:, -1, :]) == Linear on the last-timestep hidden of the top layer.
    logits = (jnp.dot(h, fcw_ref[...], preferred_element_type=jnp.float32)
              + fcb_ref[...])                                      # (B, Opad) lane-dense
    out_ref[...] = logits.astype(out_ref.dtype)


def lstm_classifier_forward(x, packed, *, num_layers, hidden_dim, output_dim):
    B, T, D = x.shape
    Hp = _round_up(hidden_dim, 128)
    Op = _round_up(output_dim, 128)

    # Time-major, flattened: row t*B + b.
    x_flat = jnp.transpose(x, (1, 0, 2)).reshape(T * B, D)

    args = [x_flat]
    for l in range(num_layers):
        args += [packed[f"wihT_{l}"], packed[f"whhT_{l}"], packed[f"b_{l}"]]
    args += [packed["fcwT"], packed["fcb"]]

    kernel = functools.partial(
        lstm_classifier_kernel,
        num_layers=num_layers, seq_len=T, batch=B, hidden_pad=Hp,
    )
    out = pl.pallas_call(
        kernel,
        out_shape=jax.ShapeDtypeStruct((B, Op), jnp.float32),
        in_specs=[pl.BlockSpec(memory_space=pltpu.MemorySpace.VMEM)] * len(args),
        out_specs=pl.BlockSpec(memory_space=pltpu.MemorySpace.VMEM),
    )(*args)
    return out[:, :output_dim]


# ----------------------------------------------------------------------------- params


def init_raw_params(key, input_dim, hidden_dim, num_layers, output_dim):
    """PyTorch-shaped params: w_ih (4H, d_in), w_hh (4H, H), b_ih/b_hh (4H,), fc (O, H)."""
    k = 1.0 / np.sqrt(hidden_dim)
    raw = {}
    for l in range(num_layers):
        d_in = input_dim if l == 0 else hidden_dim
        key, k1, k2, k3, k4 = jax.random.split(key, 5)
        raw[f"w_ih_{l}"] = jax.random.uniform(k1, (4 * hidden_dim, d_in), jnp.float32, -k, k)
        raw[f"w_hh_{l}"] = jax.random.uniform(k2, (4 * hidden_dim, hidden_dim), jnp.float32, -k, k)
        raw[f"b_ih_{l}"] = jax.random.uniform(k3, (4 * hidden_dim,), jnp.float32, -k, k)
        raw[f"b_hh_{l}"] = jax.random.uniform(k4, (4 * hidden_dim,), jnp.float32, -k, k)
    key, k5, k6 = jax.random.split(key, 3)
    raw["fc_w"] = jax.random.uniform(k5, (output_dim, hidden_dim), jnp.float32, -k, k)
    raw["fc_b"] = jax.random.uniform(k6, (output_dim,), jnp.float32, -k, k)
    return raw


def pack_params(raw, input_dim, hidden_dim, num_layers, output_dim):
    """Transpose + zero-pad to lane-aligned kernel layout (H -> Hp=128 per gate, O -> 128)."""
    H = hidden_dim
    Hp = _round_up(H, 128)
    Op = _round_up(output_dim, 128)

    def pad_gates_T(w, d_in, d_in_pad):
        # w: (4H, d_in) -> (d_in_pad, 4*Hp), gate blocks of width Hp, zero-padded cols/rows.
        wT = w.T                                                     # (d_in, 4H)
        out = jnp.zeros((d_in_pad, 4 * Hp), jnp.float32)
        for g in range(4):
            out = out.at[:d_in, g * Hp:g * Hp + H].set(wT[:, g * H:(g + 1) * H])
        return out

    def pad_bias(b):
        out = jnp.zeros((1, 4 * Hp), jnp.float32)
        for g in range(4):
            out = out.at[0, g * Hp:g * Hp + H].set(b[g * H:(g + 1) * H])
        return out

    packed = {}
    for l in range(num_layers):
        d_in = input_dim if l == 0 else H
        d_in_pad = input_dim if l == 0 else Hp
        packed[f"wihT_{l}"] = pad_gates_T(raw[f"w_ih_{l}"], d_in, d_in_pad)
        packed[f"whhT_{l}"] = pad_gates_T(raw[f"w_hh_{l}"], H, Hp)
        packed[f"b_{l}"] = pad_bias(raw[f"b_ih_{l}"] + raw[f"b_hh_{l}"])

    fcwT = jnp.zeros((Hp, Op), jnp.float32).at[:H, :output_dim].set(raw["fc_w"].T)
    fcb = jnp.zeros((1, Op), jnp.float32).at[0, :output_dim].set(raw["fc_b"])
    packed["fcwT"] = fcwT
    packed["fcb"] = fcb
    return packed


def reference_forward(x, raw, *, num_layers, hidden_dim):
    """Pure-JAX reference (unpadded, same math as PyTorch nn.LSTM + Linear)."""
    B, T, _ = x.shape
    H = hidden_dim
    hs = [jnp.zeros((B, H), jnp.float32) for _ in range(num_layers)]
    cs = [jnp.zeros((B, H), jnp.float32) for _ in range(num_layers)]
    for t in range(T):
        inp = x[:, t, :]
        for l in range(num_layers):
            gates = (inp @ raw[f"w_ih_{l}"].T + hs[l] @ raw[f"w_hh_{l}"].T
                     + raw[f"b_ih_{l}"] + raw[f"b_hh_{l}"])
            i_g = jax.nn.sigmoid(gates[:, 0 * H:1 * H])
            f_g = jax.nn.sigmoid(gates[:, 1 * H:2 * H])
            g_g = jnp.tanh(gates[:, 2 * H:3 * H])
            o_g = jax.nn.sigmoid(gates[:, 3 * H:4 * H])
            cs[l] = f_g * cs[l] + i_g * g_g
            hs[l] = o_g * jnp.tanh(cs[l])
            inp = hs[l]
    return hs[-1] @ raw["fc_w"].T + raw["fc_b"]


if __name__ == "__main__":
    # Small shapes consistent with the module: batch=2, seq=8, input_dim=16,
    # hidden_dim=32, layer_dim=2, output_dim=4.
    B, T, D, H, L, O = 2, 8, 16, 32, 2, 4

    key = jax.random.PRNGKey(0)
    key, xk = jax.random.split(key)
    x = jax.random.normal(xk, (B, T, D), jnp.float32)

    raw = init_raw_params(key, input_dim=D, hidden_dim=H, num_layers=L, output_dim=O)
    packed = pack_params(raw, input_dim=D, hidden_dim=H, num_layers=L, output_dim=O)

    out = lstm_classifier_forward(x, packed, num_layers=L, hidden_dim=H, output_dim=O)
    out = jax.block_until_ready(out)

    ref = reference_forward(x, raw, num_layers=L, hidden_dim=H)
    np.testing.assert_allclose(np.asarray(out), np.asarray(ref), rtol=1e-4, atol=1e-4)

    print("KERNEL_OK")
</pallas_src>

<mosaic_0001>
module attributes {stable_mosaic.version = 11 : i64} {
  func.func @lstm_classifier_kernel(%arg0: memref<16x16xf32, #tpu.memory_space<vmem>>, %arg1: memref<16x512xf32, #tpu.memory_space<vmem>>, %arg2: memref<128x512xf32, #tpu.memory_space<vmem>>, %arg3: memref<1x512xf32, #tpu.memory_space<vmem>>, %arg4: memref<128x512xf32, #tpu.memory_space<vmem>>, %arg5: memref<128x512xf32, #tpu.memory_space<vmem>>, %arg6: memref<1x512xf32, #tpu.memory_space<vmem>>, %arg7: memref<128x128xf32, #tpu.memory_space<vmem>>, %arg8: memref<1x128xf32, #tpu.memory_space<vmem>>, %arg9: memref<2x128xf32, #tpu.memory_space<vmem>>) attributes {dimension_semantics = [], scalar_prefetch = 0 : i64, scratch_operands = 0 : i64, tpu.core_type = #tpu.core_type<tc>} {
    %c0 = arith.constant 0 : index
    %c0_0 = arith.constant 0 : index
    %0 = vector.load %arg0[%c0, %c0_0] : memref<16x16xf32, #tpu.memory_space<vmem>>, vector<16x16xf32>
    %c0_1 = arith.constant 0 : index
    %c0_2 = arith.constant 0 : index
    %1 = vector.load %arg1[%c0_1, %c0_2] : memref<16x512xf32, #tpu.memory_space<vmem>>, vector<16x512xf32>
    %c0_3 = arith.constant 0 : index
    %c0_4 = arith.constant 0 : index
    %2 = vector.load %arg2[%c0_3, %c0_4] : memref<128x512xf32, #tpu.memory_space<vmem>>, vector<128x512xf32>
    %c0_5 = arith.constant 0 : index
    %c0_6 = arith.constant 0 : index
    %3 = vector.load %arg3[%c0_5, %c0_6] : memref<1x512xf32, #tpu.memory_space<vmem>>, vector<1x512xf32>
    %cst = arith.constant dense<0.000000e+00> : vector<16x512xf32>
    %4 = tpu.matmul %0, %1, %cst {dimension_numbers = #tpu.dot_dimension_numbers<[1], [0], [0], [1], [0, 0, 1, 1], [], []>} : vector<16x16xf32>, vector<16x512xf32>, vector<16x512xf32> -> vector<16x512xf32>
    %5 = vector.broadcast %3 : vector<1x512xf32> to vector<16x512xf32>
    %6 = arith.addf %4, %5 : vector<16x512xf32>
    %7 = vector.shape_cast %6 : vector<16x512xf32> to vector<8x2x512xf32>
    %cst_7 = arith.constant 0.000000e+00 : f32
    %8 = vector.broadcast %cst_7 : f32 to vector<2x128xf32>
    %cst_8 = arith.constant 0.000000e+00 : f32
    %9 = vector.broadcast %cst_8 : f32 to vector<2x128xf32>
    %10 = vector.extract_strided_slice %7 {offsets = [0, 0, 0], sizes = [1, 2, 512], strides = [1, 1, 1]} : vector<8x2x512xf32> to vector<1x2x512xf32>
    %11 = vector.shape_cast %10 : vector<1x2x512xf32> to vector<2x512xf32>
    %cst_9 = arith.constant dense<0.000000e+00> : vector<2x512xf32>
    %12 = tpu.matmul %8, %2, %cst_9 {dimension_numbers = #tpu.dot_dimension_numbers<[1], [0], [0], [1], [0, 0, 1, 1], [], []>} : vector<2x128xf32>, vector<128x512xf32>, vector<2x512xf32> -> vector<2x512xf32>
    %13 = arith.addf %11, %12 : vector<2x512xf32>
    %14 = vector.extract_strided_slice %13 {offsets = [0, 0], sizes = [2, 128], strides = [1, 1]} : vector<2x512xf32> to vector<2x128xf32>
    %15 = arith.negf %14 : vector<2x128xf32>
    %16 = math.exp %15 : vector<2x128xf32>
    %cst_10 = arith.constant 1.000000e+00 : f32
    %17 = vector.broadcast %cst_10 : f32 to vector<2x128xf32>
    %18 = arith.addf %17, %16 : vector<2x128xf32>
    %19 = arith.divf %17, %18 : vector<2x128xf32>
    %20 = vector.extract_strided_slice %13 {offsets = [0, 128], sizes = [2, 128], strides = [1, 1]} : vector<2x512xf32> to vector<2x128xf32>
    %21 = arith.negf %20 : vector<2x128xf32>
    %22 = math.exp %21 : vector<2x128xf32>
    %cst_11 = arith.constant 1.000000e+00 : f32
    %23 = vector.broadcast %cst_11 : f32 to vector<2x128xf32>
    %24 = arith.addf %23, %22 : vector<2x128xf32>
    %25 = arith.divf %23, %24 : vector<2x128xf32>
    %26 = vector.extract_strided_slice %13 {offsets = [0, 256], sizes = [2, 128], strides = [1, 1]} : vector<2x512xf32> to vector<2x128xf32>
    %27 = math.tanh %26 : vector<2x128xf32>
    %28 = vector.extract_strided_slice %13 {offsets = [0, 384], sizes = [2, 128], strides = [1, 1]} : vector<2x512xf32> to vector<2x128xf32>
    %29 = arith.negf %28 : vector<2x128xf32>
    %30 = math.exp %29 : vector<2x128xf32>
    %cst_12 = arith.constant 1.000000e+00 : f32
    %31 = vector.broadcast %cst_12 : f32 to vector<2x128xf32>
    %32 = arith.addf %31, %30 : vector<2x128xf32>
    %33 = arith.divf %31, %32 : vector<2x128xf32>
    %34 = arith.mulf %25, %9 : vector<2x128xf32>
    %35 = arith.mulf %19, %27 : vector<2x128xf32>
    %36 = arith.addf %34, %35 : vector<2x128xf32>
    %37 = math.tanh %36 : vector<2x128xf32>
    %38 = arith.mulf %33, %37 : vector<2x128xf32>
    %39 = vector.extract_strided_slice %7 {offsets = [1, 0, 0], sizes = [1, 2, 512], strides = [1, 1, 1]} : vector<8x2x512xf32> to vector<1x2x512xf32>
    %40 = vector.shape_cast %39 : vector<1x2x512xf32> to vector<2x512xf32>
    %cst_13 = arith.constant dense<0.000000e+00> : vector<2x512xf32>
    %41 = tpu.matmul %38, %2, %cst_13 {dimension_numbers = #tpu.dot_dimension_numbers<[1], [0], [0], [1], [0, 0, 1, 1], [], []>} : vector<2x128xf32>, vector<128x512xf32>, vector<2x512xf32> -> vector<2x512xf32>
    %42 = arith.addf %40, %41 : vector<2x512xf32>
    %43 = vector.extract_strided_slice %42 {offsets = [0, 0], sizes = [2, 128], strides = [1, 1]} : vector<2x512xf32> to vector<2x128xf32>
    %44 = arith.negf %43 : vector<2x128xf32>
    %45 = math.exp %44 : vector<2x128xf32>
    %cst_14 = arith.constant 1.000000e+00 : f32
    %46 = vector.broadcast %cst_14 : f32 to vector<2x128xf32>
    %47 = arith.addf %46, %45 : vector<2x128xf32>
    %48 = arith.divf %46, %47 : vector<2x128xf32>
    %49 = vector.extract_strided_slice %42 {offsets = [0, 128], sizes = [2, 128], strides = [1, 1]} : vector<2x512xf32> to vector<2x128xf32>
    %50 = arith.negf %49 : vector<2x128xf32>
    %51 = math.exp %50 : vector<2x128xf32>
    %cst_15 = arith.constant 1.000000e+00 : f32
    %52 = vector.broadcast %cst_15 : f32 to vector<2x128xf32>
    %53 = arith.addf %52, %51 : vector<2x128xf32>
    %54 = arith.divf %52, %53 : vector<2x128xf32>
    %55 = vector.extract_strided_slice %42 {offsets = [0, 256], sizes = [2, 128], strides = [1, 1]} : vector<2x512xf32> to vector<2x128xf32>
    %56 = math.tanh %55 : vector<2x128xf32>
    %57 = vector.extract_strided_slice %42 {offsets = [0, 384], sizes = [2, 128], strides = [1, 1]} : vector<2x512xf32> to vector<2x128xf32>
    %58 = arith.negf %57 : vector<2x128xf32>
    %59 = math.exp %58 : vector<2x128xf32>
    %cst_16 = arith.constant 1.000000e+00 : f32
    %60 = vector.broadcast %cst_16 : f32 to vector<2x128xf32>
    %61 = arith.addf %60, %59 : vector<2x128xf32>
    %62 = arith.divf %60, %61 : vector<2x128xf32>
    %63 = arith.mulf %54, %36 : vector<2x128xf32>
    %64 = arith.mulf %48, %56 : vector<2x128xf32>
    %65 = arith.addf %63, %64 : vector<2x128xf32>
    %66 = math.tanh %65 : vector<2x128xf32>
    %67 = arith.mulf %62, %66 : vector<2x128xf32>
    %68 = vector.extract_strided_slice %7 {offsets = [2, 0, 0], sizes = [1, 2, 512], strides = [1, 1, 1]} : vector<8x2x512xf32> to vector<1x2x512xf32>
    %69 = vector.shape_cast %68 : vector<1x2x512xf32> to vector<2x512xf32>
    %cst_17 = arith.constant dense<0.000000e+00> : vector<2x512xf32>
    %70 = tpu.matmul %67, %2, %cst_17 {dimension_numbers = #tpu.dot_dimension_numbers<[1], [0], [0], [1], [0, 0, 1, 1], [], []>} : vector<2x128xf32>, vector<128x512xf32>, vector<2x512xf32> -> vector<2x512xf32>
    %71 = arith.addf %69, %70 : vector<2x512xf32>
    %72 = vector.extract_strided_slice %71 {offsets = [0, 0], sizes = [2, 128], strides = [1, 1]} : vector<2x512xf32> to vector<2x128xf32>
    %73 = arith.negf %72 : vector<2x128xf32>
    %74 = math.exp %73 : vector<2x128xf32>
    %cst_18 = arith.constant 1.000000e+00 : f32
    %75 = vector.broadcast %cst_18 : f32 to vector<2x128xf32>
    %76 = arith.addf %75, %74 : vector<2x128xf32>
    %77 = arith.divf %75, %76 : vector<2x128xf32>
    %78 = vector.extract_strided_slice %71 {offsets = [0, 128], sizes = [2, 128], strides = [1, 1]} : vector<2x512xf32> to vector<2x128xf32>
    %79 = arith.negf %78 : vector<2x128xf32>
    %80 = math.exp %79 : vector<2x128xf32>
    %cst_19 = arith.constant 1.000000e+00 : f32
    %81 = vector.broadcast %cst_19 : f32 to vector<2x128xf32>
    %82 = arith.addf %81, %80 : vector<2x128xf32>
    %83 = arith.divf %81, %82 : vector<2x128xf32>
    %84 = vector.extract_strided_slice %71 {offsets = [0, 256], sizes = [2, 128], strides = [1, 1]} : vector<2x512xf32> to vector<2x128xf32>
    %85 = math.tanh %84 : vector<2x128xf32>
    %86 = vector.extract_strided_slice %71 {offsets = [0, 384], sizes = [2, 128], strides = [1, 1]} : vector<2x512xf32> to vector<2x128xf32>
    %87 = arith.negf %86 : vector<2x128xf32>
    %88 = math.exp %87 : vector<2x128xf32>
    %cst_20 = arith.constant 1.000000e+00 : f32
    %89 = vector.broadcast %cst_20 : f32 to vector<2x128xf32>
    %90 = arith.addf %89, %88 : vector<2x128xf32>
    %91 = arith.divf %89, %90 : vector<2x128xf32>
    %92 = arith.mulf %83, %65 : vector<2x128xf32>
    %93 = arith.mulf %77, %85 : vector<2x128xf32>
    %94 = arith.addf %92, %93 : vector<2x128xf32>
    %95 = math.tanh %94 : vector<2x128xf32>
    %96 = arith.mulf %91, %95 : vector<2x128xf32>
    %97 = vector.extract_strided_slice %7 {offsets = [3, 0, 0], sizes = [1, 2, 512], strides = [1, 1, 1]} : vector<8x2x512xf32> to vector<1x2x512xf32>
    %98 = vector.shape_cast %97 : vector<1x2x512xf32> to vector<2x512xf32>
    %cst_21 = arith.constant dense<0.000000e+00> : vector<2x512xf32>
    %99 = tpu.matmul %96, %2, %cst_21 {dimension_numbers = #tpu.dot_dimension_numbers<[1], [0], [0], [1], [0, 0, 1, 1], [], []>} : vector<2x128xf32>, vector<128x512xf32>, vector<2x512xf32> -> vector<2x512xf32>
    %100 = arith.addf %98, %99 : vector<2x512xf32>
    %101 = vector.extract_strided_slice %100 {offsets = [0, 0], sizes = [2, 128], strides = [1, 1]} : vector<2x512xf32> to vector<2x128xf32>
    %102 = arith.negf %101 : vector<2x128xf32>
    %103 = math.exp %102 : vector<2x128xf32>
    %cst_22 = arith.constant 1.000000e+00 : f32
    %104 = vector.broadcast %cst_22 : f32 to vector<2x128xf32>
    %105 = arith.addf %104, %103 : vector<2x128xf32>
    %106 = arith.divf %104, %105 : vector<2x128xf32>
    %107 = vector.extract_strided_slice %100 {offsets = [0, 128], sizes = [2, 128], strides = [1, 1]} : vector<2x512xf32> to vector<2x128xf32>
    %108 = arith.negf %107 : vector<2x128xf32>
    %109 = math.exp %108 : vector<2x128xf32>
    %cst_23 = arith.constant 1.000000e+00 : f32
    %110 = vector.broadcast %cst_23 : f32 to vector<2x128xf32>
    %111 = arith.addf %110, %109 : vector<2x128xf32>
    %112 = arith.divf %110, %111 : vector<2x128xf32>
    %113 = vector.extract_strided_slice %100 {offsets = [0, 256], sizes = [2, 128], strides = [1, 1]} : vector<2x512xf32> to vector<2x128xf32>
    %114 = math.tanh %113 : vector<2x128xf32>
    %115 = vector.extract_strided_slice %100 {offsets = [0, 384], sizes = [2, 128], strides = [1, 1]} : vector<2x512xf32> to vector<2x128xf32>
    %116 = arith.negf %115 : vector<2x128xf32>
    %117 = math.exp %116 : vector<2x128xf32>
    %cst_24 = arith.constant 1.000000e+00 : f32
    %118 = vector.broadcast %cst_24 : f32 to vector<2x128xf32>
    %119 = arith.addf %118, %117 : vector<2x128xf32>
    %120 = arith.divf %118, %119 : vector<2x128xf32>
    %121 = arith.mulf %112, %94 : vector<2x128xf32>
    %122 = arith.mulf %106, %114 : vector<2x128xf32>
    %123 = arith.addf %121, %122 : vector<2x128xf32>
    %124 = math.tanh %123 : vector<2x128xf32>
    %125 = arith.mulf %120, %124 : vector<2x128xf32>
    %126 = vector.extract_strided_slice %7 {offsets = [4, 0, 0], sizes = [1, 2, 512], strides = [1, 1, 1]} : vector<8x2x512xf32> to vector<1x2x512xf32>
    %127 = vector.shape_cast %126 : vector<1x2x512xf32> to vector<2x512xf32>
    %cst_25 = arith.constant dense<0.000000e+00> : vector<2x512xf32>
    %128 = tpu.matmul %125, %2, %cst_25 {dimension_numbers = #tpu.dot_dimension_numbers<[1], [0], [0], [1], [0, 0, 1, 1], [], []>} : vector<2x128xf32>, vector<128x512xf32>, vector<2x512xf32> -> vector<2x512xf32>
    %129 = arith.addf %127, %128 : vector<2x512xf32>
    %130 = vector.extract_strided_slice %129 {offsets = [0, 0], sizes = [2, 128], strides = [1, 1]} : vector<2x512xf32> to vector<2x128xf32>
    %131 = arith.negf %130 : vector<2x128xf32>
    %132 = math.exp %131 : vector<2x128xf32>
    %cst_26 = arith.constant 1.000000e+00 : f32
    %133 = vector.broadcast %cst_26 : f32 to vector<2x128xf32>
    %134 = arith.addf %133, %132 : vector<2x128xf32>
    %135 = arith.divf %133, %134 : vector<2x128xf32>
    %136 = vector.extract_strided_slice %129 {offsets = [0, 128], sizes = [2, 128], strides = [1, 1]} : vector<2x512xf32> to vector<2x128xf32>
    %137 = arith.negf %136 : vector<2x128xf32>
    %138 = math.exp %137 : vector<2x128xf32>
    %cst_27 = arith.constant 1.000000e+00 : f32
    %139 = vector.broadcast %cst_27 : f32 to vector<2x128xf32>
    %140 = arith.addf %139, %138 : vector<2x128xf32>
    %141 = arith.divf %139, %140 : vector<2x128xf32>
    %142 = vector.extract_strided_slice %129 {offsets = [0, 256], sizes = [2, 128], strides = [1, 1]} : vector<2x512xf32> to vector<2x128xf32>
    %143 = math.tanh %142 : vector<2x128xf32>
    %144 = vector.extract_strided_slice %129 {offsets = [0, 384], sizes = [2, 128], strides = [1, 1]} : vector<2x512xf32> to vector<2x128xf32>
    %145 = arith.negf %144 : vector<2x128xf32>
    %146 = math.exp %145 : vector<2x128xf32>
    %cst_28 = arith.constant 1.000000e+00 : f32
    %147 = vector.broadcast %cst_28 : f32 to vector<2x128xf32>
    %148 = arith.addf %147, %146 : vector<2x128xf32>
    %149 = arith.divf %147, %148 : vector<2x128xf32>
    %150 = arith.mulf %141, %123 : vector<2x128xf32>
    %151 = arith.mulf %135, %143 : vector<2x128xf32>
    %152 = arith.addf %150, %151 : vector<2x128xf32>
    %153 = math.tanh %152 : vector<2x128xf32>
    %154 = arith.mulf %149, %153 : vector<2x128xf32>
    %155 = vector.extract_strided_slice %7 {offsets = [5, 0, 0], sizes = [1, 2, 512], strides = [1, 1, 1]} : vector<8x2x512xf32> to vector<1x2x512xf32>
    %156 = vector.shape_cast %155 : vector<1x2x512xf32> to vector<2x512xf32>
    %cst_29 = arith.constant dense<0.000000e+00> : vector<2x512xf32>
    %157 = tpu.matmul %154, %2, %cst_29 {dimension_numbers = #tpu.dot_dimension_numbers<[1], [0], [0], [1], [0, 0, 1, 1], [], []>} : vector<2x128xf32>, vector<128x512xf32>, vector<2x512xf32> -> vector<2x512xf32>
    %158 = arith.addf %156, %157 : vector<2x512xf32>
    %159 = vector.extract_strided_slice %158 {offsets = [0, 0], sizes = [2, 128], strides = [1, 1]} : vector<2x512xf32> to vector<2x128xf32>
    %160 = arith.negf %159 : vector<2x128xf32>
    %161 = math.exp %160 : vector<2x128xf32>
    %cst_30 = arith.constant 1.000000e+00 : f32
    %162 = vector.broadcast %cst_30 : f32 to vector<2x128xf32>
    %163 = arith.addf %162, %161 : vector<2x128xf32>
    %164 = arith.divf %162, %163 : vector<2x128xf32>
    %165 = vector.extract_strided_slice %158 {offsets = [0, 128], sizes = [2, 128], strides = [1, 1]} : vector<2x512xf32> to vector<2x128xf32>
    %166 = arith.negf %165 : vector<2x128xf32>
    %167 = math.exp %166 : vector<2x128xf32>
    %cst_31 = arith.constant 1.000000e+00 : f32
    %168 = vector.broadcast %cst_31 : f32 to vector<2x128xf32>
    %169 = arith.addf %168, %167 : vector<2x128xf32>
    %170 = arith.divf %168, %169 : vector<2x128xf32>
    %171 = vector.extract_strided_slice %158 {offsets = [0, 256], sizes = [2, 128], strides = [1, 1]} : vector<2x512xf32> to vector<2x128xf32>
    %172 = math.tanh %171 : vector<2x128xf32>
    %173 = vector.extract_strided_slice %158 {offsets = [0, 384], sizes = [2, 128], strides = [1, 1]} : vector<2x512xf32> to vector<2x128xf32>
    %174 = arith.negf %173 : vector<2x128xf32>
    %175 = math.exp %174 : vector<2x128xf32>
    %cst_32 = arith.constant 1.000000e+00 : f32
    %176 = vector.broadcast %cst_32 : f32 to vector<2x128xf32>
    %177 = arith.addf %176, %175 : vector<2x128xf32>
    %178 = arith.divf %176, %177 : vector<2x128xf32>
    %179 = arith.mulf %170, %152 : vector<2x128xf32>
    %180 = arith.mulf %164, %172 : vector<2x128xf32>
    %181 = arith.addf %179, %180 : vector<2x128xf32>
    %182 = math.tanh %181 : vector<2x128xf32>
    %183 = arith.mulf %178, %182 : vector<2x128xf32>
    %184 = vector.extract_strided_slice %7 {offsets = [6, 0, 0], sizes = [1, 2, 512], strides = [1, 1, 1]} : vector<8x2x512xf32> to vector<1x2x512xf32>
    %185 = vector.shape_cast %184 : vector<1x2x512xf32> to vector<2x512xf32>
    %cst_33 = arith.constant dense<0.000000e+00> : vector<2x512xf32>
    %186 = tpu.matmul %183, %2, %cst_33 {dimension_numbers = #tpu.dot_dimension_numbers<[1], [0], [0], [1], [0, 0, 1, 1], [], []>} : vector<2x128xf32>, vector<128x512xf32>, vector<2x512xf32> -> vector<2x512xf32>
    %187 = arith.addf %185, %186 : vector<2x512xf32>
    %188 = vector.extract_strided_slice %187 {offsets = [0, 0], sizes = [2, 128], strides = [1, 1]} : vector<2x512xf32> to vector<2x128xf32>
    %189 = arith.negf %188 : vector<2x128xf32>
    %190 = math.exp %189 : vector<2x128xf32>
    %cst_34 = arith.constant 1.000000e+00 : f32
    %191 = vector.broadcast %cst_34 : f32 to vector<2x128xf32>
    %192 = arith.addf %191, %190 : vector<2x128xf32>
    %193 = arith.divf %191, %192 : vector<2x128xf32>
    %194 = vector.extract_strided_slice %187 {offsets = [0, 128], sizes = [2, 128], strides = [1, 1]} : vector<2x512xf32> to vector<2x128xf32>
    %195 = arith.negf %194 : vector<2x128xf32>
    %196 = math.exp %195 : vector<2x128xf32>
    %cst_35 = arith.constant 1.000000e+00 : f32
    %197 = vector.broadcast %cst_35 : f32 to vector<2x128xf32>
    %198 = arith.addf %197, %196 : vector<2x128xf32>
    %199 = arith.divf %197, %198 : vector<2x128xf32>
    %200 = vector.extract_strided_slice %187 {offsets = [0, 256], sizes = [2, 128], strides = [1, 1]} : vector<2x512xf32> to vector<2x128xf32>
    %201 = math.tanh %200 : vector<2x128xf32>
    %202 = vector.extract_strided_slice %187 {offsets = [0, 384], sizes = [2, 128], strides = [1, 1]} : vector<2x512xf32> to vector<2x128xf32>
    %203 = arith.negf %202 : vector<2x128xf32>
    %204 = math.exp %203 : vector<2x128xf32>
    %cst_36 = arith.constant 1.000000e+00 : f32
    %205 = vector.broadcast %cst_36 : f32 to vector<2x128xf32>
    %206 = arith.addf %205, %204 : vector<2x128xf32>
    %207 = arith.divf %205, %206 : vector<2x128xf32>
    %208 = arith.mulf %199, %181 : vector<2x128xf32>
    %209 = arith.mulf %193, %201 : vector<2x128xf32>
    %210 = arith.addf %208, %209 : vector<2x128xf32>
    %211 = math.tanh %210 : vector<2x128xf32>
    %212 = arith.mulf %207, %211 : vector<2x128xf32>
    %213 = vector.extract_strided_slice %7 {offsets = [7, 0, 0], sizes = [1, 2, 512], strides = [1, 1, 1]} : vector<8x2x512xf32> to vector<1x2x512xf32>
    %214 = vector.shape_cast %213 : vector<1x2x512xf32> to vector<2x512xf32>
    %cst_37 = arith.constant dense<0.000000e+00> : vector<2x512xf32>
    %215 = tpu.matmul %212, %2, %cst_37 {dimension_numbers = #tpu.dot_dimension_numbers<[1], [0], [0], [1], [0, 0, 1, 1], [], []>} : vector<2x128xf32>, vector<128x512xf32>, vector<2x512xf32> -> vector<2x512xf32>
    %216 = arith.addf %214, %215 : vector<2x512xf32>
    %217 = vector.extract_strided_slice %216 {offsets = [0, 0], sizes = [2, 128], strides = [1, 1]} : vector<2x512xf32> to vector<2x128xf32>
    %218 = arith.negf %217 : vector<2x128xf32>
    %219 = math.exp %218 : vector<2x128xf32>
    %cst_38 = arith.constant 1.000000e+00 : f32
    %220 = vector.broadcast %cst_38 : f32 to vector<2x128xf32>
    %221 = arith.addf %220, %219 : vector<2x128xf32>
    %222 = arith.divf %220, %221 : vector<2x128xf32>
    %223 = vector.extract_strided_slice %216 {offsets = [0, 128], sizes = [2, 128], strides = [1, 1]} : vector<2x512xf32> to vector<2x128xf32>
    %224 = arith.negf %223 : vector<2x128xf32>
    %225 = math.exp %224 : vector<2x128xf32>
    %cst_39 = arith.constant 1.000000e+00 : f32
    %226 = vector.broadcast %cst_39 : f32 to vector<2x128xf32>
    %227 = arith.addf %226, %225 : vector<2x128xf32>
    %228 = arith.divf %226, %227 : vector<2x128xf32>
    %229 = vector.extract_strided_slice %216 {offsets = [0, 256], sizes = [2, 128], strides = [1, 1]} : vector<2x512xf32> to vector<2x128xf32>
    %230 = math.tanh %229 : vector<2x128xf32>
    %231 = vector.extract_strided_slice %216 {offsets = [0, 384], sizes = [2, 128], strides = [1, 1]} : vector<2x512xf32> to vector<2x128xf32>
    %232 = arith.negf %231 : vector<2x128xf32>
    %233 = math.exp %232 : vector<2x128xf32>
    %cst_40 = arith.constant 1.000000e+00 : f32
    %234 = vector.broadcast %cst_40 : f32 to vector<2x128xf32>
    %235 = arith.addf %234, %233 : vector<2x128xf32>
    %236 = arith.divf %234, %235 : vector<2x128xf32>
    %237 = arith.mulf %228, %210 : vector<2x128xf32>
    %238 = arith.mulf %222, %230 : vector<2x128xf32>
    %239 = arith.addf %237, %238 : vector<2x128xf32>
    %240 = math.tanh %239 : vector<2x128xf32>
    %241 = arith.mulf %236, %240 : vector<2x128xf32>
    %242 = tpu.concatenate %38, %67, %96, %125, %154, %183, %212, %241 in 0 : vector<2x128xf32>, vector<2x128xf32>, vector<2x128xf32>, vector<2x128xf32>, vector<2x128xf32>, vector<2x128xf32>, vector<2x128xf32>, vector<2x128xf32> -> vector<16x128xf32>
    %c0_41 = arith.constant 0 : index
    %c0_42 = arith.constant 0 : index
    %243 = vector.load %arg4[%c0_41, %c0_42] : memref<128x512xf32, #tpu.memory_space<vmem>>, vector<128x512xf32>
    %c0_43 = arith.constant 0 : index
    %c0_44 = arith.constant 0 : index
    %244 = vector.load %arg5[%c0_43, %c0_44] : memref<128x512xf32, #tpu.memory_space<vmem>>, vector<128x512xf32>
    %c0_45 = arith.constant 0 : index
    %c0_46 = arith.constant 0 : index
    %245 = vector.load %arg6[%c0_45, %c0_46] : memref<1x512xf32, #tpu.memory_space<vmem>>, vector<1x512xf32>
    %cst_47 = arith.constant dense<0.000000e+00> : vector<16x512xf32>
    %246 = tpu.matmul %242, %243, %cst_47 {dimension_numbers = #tpu.dot_dimension_numbers<[1], [0], [0], [1], [0, 0, 1, 1], [], []>} : vector<16x128xf32>, vector<128x512xf32>, vector<16x512xf32> -> vector<16x512xf32>
    %247 = vector.broadcast %245 : vector<1x512xf32> to vector<16x512xf32>
    %248 = arith.addf %246, %247 : vector<16x512xf32>
    %249 = vector.shape_cast %248 : vector<16x512xf32> to vector<8x2x512xf32>
    %cst_48 = arith.constant 0.000000e+00 : f32
    %250 = vector.broadcast %cst_48 : f32 to vector<2x128xf32>
    %cst_49 = arith.constant 0.000000e+00 : f32
    %251 = vector.broadcast %cst_49 : f32 to vector<2x128xf32>
    %252 = vector.extract_strided_slice %249 {offsets = [0, 0, 0], sizes = [1, 2, 512], strides = [1, 1, 1]} : vector<8x2x512xf32> to vector<1x2x512xf32>
    %253 = vector.shape_cast %252 : vector<1x2x512xf32> to vector<2x512xf32>
    %cst_50 = arith.constant dense<0.000000e+00> : vector<2x512xf32>
    %254 = tpu.matmul %250, %244, %cst_50 {dimension_numbers = #tpu.dot_dimension_numbers<[1], [0], [0], [1], [0, 0, 1, 1], [], []>} : vector<2x128xf32>, vector<128x512xf32>, vector<2x512xf32> -> vector<2x512xf32>
    %255 = arith.addf %253, %254 : vector<2x512xf32>
    %256 = vector.extract_strided_slice %255 {offsets = [0, 0], sizes = [2, 128], strides = [1, 1]} : vector<2x512xf32> to vector<2x128xf32>
    %257 = arith.negf %256 : vector<2x128xf32>
    %258 = math.exp %257 : vector<2x128xf32>
    %cst_51 = arith.constant 1.000000e+00 : f32
    %259 = vector.broadcast %cst_51 : f32 to vector<2x128xf32>
    %260 = arith.addf %259, %258 : vector<2x128xf32>
    %261 = arith.divf %259, %260 : vector<2x128xf32>
    %262 = vector.extract_strided_slice %255 {offsets = [0, 128], sizes = [2, 128], strides = [1, 1]} : vector<2x512xf32> to vector<2x128xf32>
    %263 = arith.negf %262 : vector<2x128xf32>
    %264 = math.exp %263 : vector<2x128xf32>
    %cst_52 = arith.constant 1.000000e+00 : f32
    %265 = vector.broadcast %cst_52 : f32 to vector<2x128xf32>
    %266 = arith.addf %265, %264 : vector<2x128xf32>
    %267 = arith.divf %265, %266 : vector<2x128xf32>
    %268 = vector.extract_strided_slice %255 {offsets = [0, 256], sizes = [2, 128], strides = [1, 1]} : vector<2x512xf32> to vector<2x128xf32>
    %269 = math.tanh %268 : vector<2x128xf32>
    %270 = vector.extract_strided_slice %255 {offsets = [0, 384], sizes = [2, 128], strides = [1, 1]} : vector<2x512xf32> to vector<2x128xf32>
    %271 = arith.negf %270 : vector<2x128xf32>
    %272 = math.exp %271 : vector<2x128xf32>
    %cst_53 = arith.constant 1.000000e+00 : f32
    %273 = vector.broadcast %cst_53 : f32 to vector<2x128xf32>
    %274 = arith.addf %273, %272 : vector<2x128xf32>
    %275 = arith.divf %273, %274 : vector<2x128xf32>
    %276 = arith.mulf %267, %251 : vector<2x128xf32>
    %277 = arith.mulf %261, %269 : vector<2x128xf32>
    %278 = arith.addf %276, %277 : vector<2x128xf32>
    %279 = math.tanh %278 : vector<2x128xf32>
    %280 = arith.mulf %275, %279 : vector<2x128xf32>
    %281 = vector.extract_strided_slice %249 {offsets = [1, 0, 0], sizes = [1, 2, 512], strides = [1, 1, 1]} : vector<8x2x512xf32> to vector<1x2x512xf32>
    %282 = vector.shape_cast %281 : vector<1x2x512xf32> to vector<2x512xf32>
    %cst_54 = arith.constant dense<0.000000e+00> : vector<2x512xf32>
    %283 = tpu.matmul %280, %244, %cst_54 {dimension_numbers = #tpu.dot_dimension_numbers<[1], [0], [0], [1], [0, 0, 1, 1], [], []>} : vector<2x128xf32>, vector<128x512xf32>, vector<2x512xf32> -> vector<2x512xf32>
    %284 = arith.addf %282, %283 : vector<2x512xf32>
    %285 = vector.extract_strided_slice %284 {offsets = [0, 0], sizes = [2, 128], strides = [1, 1]} : vector<2x512xf32> to vector<2x128xf32>
    %286 = arith.negf %285 : vector<2x128xf32>
    %287 = math.exp %286 : vector<2x128xf32>
    %cst_55 = arith.constant 1.000000e+00 : f32
    %288 = vector.broadcast %cst_55 : f32 to vector<2x128xf32>
    %289 = arith.addf %288, %287 : vector<2x128xf32>
    %290 = arith.divf %288, %289 : vector<2x128xf32>
    %291 = vector.extract_strided_slice %284 {offsets = [0, 128], sizes = [2, 128], strides = [1, 1]} : vector<2x512xf32> to vector<2x128xf32>
    %292 = arith.negf %291 : vector<2x128xf32>
    %293 = math.exp %292 : vector<2x128xf32>
    %cst_56 = arith.constant 1.000000e+00 : f32
    %294 = vector.broadcast %cst_56 : f32 to vector<2x128xf32>
    %295 = arith.addf %294, %293 : vector<2x128xf32>
    %296 = arith.divf %294, %295 : vector<2x128xf32>
    %297 = vector.extract_strided_slice %284 {offsets = [0, 256], sizes = [2, 128], strides = [1, 1]} : vector<2x512xf32> to vector<2x128xf32>
    %298 = math.tanh %297 : vector<2x128xf32>
    %299 = vector.extract_strided_slice %284 {offsets = [0, 384], sizes = [2, 128], strides = [1, 1]} : vector<2x512xf32> to vector<2x128xf32>
    %300 = arith.negf %299 : vector<2x128xf32>
    %301 = math.exp %300 : vector<2x128xf32>
    %cst_57 = arith.constant 1.000000e+00 : f32
    %302 = vector.broadcast %cst_57 : f32 to vector<2x128xf32>
    %303 = arith.addf %302, %301 : vector<2x128xf32>
    %304 = arith.divf %302, %303 : vector<2x128xf32>
    %305 = arith.mulf %296, %278 : vector<2x128xf32>
    %306 = arith.mulf %290, %298 : vector<2x128xf32>
    %307 = arith.addf %305, %306 : vector<2x128xf32>
    %308 = math.tanh %307 : vector<2x128xf32>
    %309 = arith.mulf %304, %308 : vector<2x128xf32>
    %310 = vector.extract_strided_slice %249 {offsets = [2, 0, 0], sizes = [1, 2, 512], strides = [1, 1, 1]} : vector<8x2x512xf32> to vector<1x2x512xf32>
    %311 = vector.shape_cast %310 : vector<1x2x512xf32> to vector<2x512xf32>
    %cst_58 = arith.constant dense<0.000000e+00> : vector<2x512xf32>
    %312 = tpu.matmul %309, %244, %cst_58 {dimension_numbers = #tpu.dot_dimension_numbers<[1], [0], [0], [1], [0, 0, 1, 1], [], []>} : vector<2x128xf32>, vector<128x512xf32>, vector<2x512xf32> -> vector<2x512xf32>
    %313 = arith.addf %311, %312 : vector<2x512xf32>
    %314 = vector.extract_strided_slice %313 {offsets = [0, 0], sizes = [2, 128], strides = [1, 1]} : vector<2x512xf32> to vector<2x128xf32>
    %315 = arith.negf %314 : vector<2x128xf32>
    %316 = math.exp %315 : vector<2x128xf32>
    %cst_59 = arith.constant 1.000000e+00 : f32
    %317 = vector.broadcast %cst_59 : f32 to vector<2x128xf32>
    %318 = arith.addf %317, %316 : vector<2x128xf32>
    %319 = arith.divf %317, %318 : vector<2x128xf32>
    %320 = vector.extract_strided_slice %313 {offsets = [0, 128], sizes = [2, 128], strides = [1, 1]} : vector<2x512xf32> to vector<2x128xf32>
    %321 = arith.negf %320 : vector<2x128xf32>
    %322 = math.exp %321 : vector<2x128xf32>
    %cst_60 = arith.constant 1.000000e+00 : f32
    %323 = vector.broadcast %cst_60 : f32 to vector<2x128xf32>
    %324 = arith.addf %323, %322 : vector<2x128xf32>
    %325 = arith.divf %323, %324 : vector<2x128xf32>
    %326 = vector.extract_strided_slice %313 {offsets = [0, 256], sizes = [2, 128], strides = [1, 1]} : vector<2x512xf32> to vector<2x128xf32>
    %327 = math.tanh %326 : vector<2x128xf32>
    %328 = vector.extract_strided_slice %313 {offsets = [0, 384], sizes = [2, 128], strides = [1, 1]} : vector<2x512xf32> to vector<2x128xf32>
    %329 = arith.negf %328 : vector<2x128xf32>
    %330 = math.exp %329 : vector<2x128xf32>
    %cst_61 = arith.constant 1.000000e+00 : f32
    %331 = vector.broadcast %cst_61 : f32 to vector<2x128xf32>
    %332 = arith.addf %331, %330 : vector<2x128xf32>
    %333 = arith.divf %331, %332 : vector<2x128xf32>
    %334 = arith.mulf %325, %307 : vector<2x128xf32>
    %335 = arith.mulf %319, %327 : vector<2x128xf32>
    %336 = arith.addf %334, %335 : vector<2x128xf32>
    %337 = math.tanh %336 : vector<2x128xf32>
    %338 = arith.mulf %333, %337 : vector<2x128xf32>
    %339 = vector.extract_strided_slice %249 {offsets = [3, 0, 0], sizes = [1, 2, 512], strides = [1, 1, 1]} : vector<8x2x512xf32> to vector<1x2x512xf32>
    %340 = vector.shape_cast %339 : vector<1x2x512xf32> to vector<2x512xf32>
    %cst_62 = arith.constant dense<0.000000e+00> : vector<2x512xf32>
    %341 = tpu.matmul %338, %244, %cst_62 {dimension_numbers = #tpu.dot_dimension_numbers<[1], [0], [0], [1], [0, 0, 1, 1], [], []>} : vector<2x128xf32>, vector<128x512xf32>, vector<2x512xf32> -> vector<2x512xf32>
    %342 = arith.addf %340, %341 : vector<2x512xf32>
    %343 = vector.extract_strided_slice %342 {offsets = [0, 0], sizes = [2, 128], strides = [1, 1]} : vector<2x512xf32> to vector<2x128xf32>
    %344 = arith.negf %343 : vector<2x128xf32>
    %345 = math.exp %344 : vector<2x128xf32>
    %cst_63 = arith.constant 1.000000e+00 : f32
    %346 = vector.broadcast %cst_63 : f32 to vector<2x128xf32>
    %347 = arith.addf %346, %345 : vector<2x128xf32>
    %348 = arith.divf %346, %347 : vector<2x128xf32>
    %349 = vector.extract_strided_slice %342 {offsets = [0, 128], sizes = [2, 128], strides = [1, 1]} : vector<2x512xf32> to vector<2x128xf32>
    %350 = arith.negf %349 : vector<2x128xf32>
    %351 = math.exp %350 : vector<2x128xf32>
    %cst_64 = arith.constant 1.000000e+00 : f32
    %352 = vector.broadcast %cst_64 : f32 to vector<2x128xf32>
    %353 = arith.addf %352, %351 : vector<2x128xf32>
    %354 = arith.divf %352, %353 : vector<2x128xf32>
    %355 = vector.extract_strided_slice %342 {offsets = [0, 256], sizes = [2, 128], strides = [1, 1]} : vector<2x512xf32> to vector<2x128xf32>
    %356 = math.tanh %355 : vector<2x128xf32>
    %357 = vector.extract_strided_slice %342 {offsets = [0, 384], sizes = [2, 128], strides = [1, 1]} : vector<2x512xf32> to vector<2x128xf32>
    %358 = arith.negf %357 : vector<2x128xf32>
    %359 = math.exp %358 : vector<2x128xf32>
    %cst_65 = arith.constant 1.000000e+00 : f32
    %360 = vector.broadcast %cst_65 : f32 to vector<2x128xf32>
    %361 = arith.addf %360, %359 : vector<2x128xf32>
    %362 = arith.divf %360, %361 : vector<2x128xf32>
    %363 = arith.mulf %354, %336 : vector<2x128xf32>
    %364 = arith.mulf %348, %356 : vector<2x128xf32>
    %365 = arith.addf %363, %364 : vector<2x128xf32>
    %366 = math.tanh %365 : vector<2x128xf32>
    %367 = arith.mulf %362, %366 : vector<2x128xf32>
    %368 = vector.extract_strided_slice %249 {offsets = [4, 0, 0], sizes = [1, 2, 512], strides = [1, 1, 1]} : vector<8x2x512xf32> to vector<1x2x512xf32>
    %369 = vector.shape_cast %368 : vector<1x2x512xf32> to vector<2x512xf32>
    %cst_66 = arith.constant dense<0.000000e+00> : vector<2x512xf32>
    %370 = tpu.matmul %367, %244, %cst_66 {dimension_numbers = #tpu.dot_dimension_numbers<[1], [0], [0], [1], [0, 0, 1, 1], [], []>} : vector<2x128xf32>, vector<128x512xf32>, vector<2x512xf32> -> vector<2x512xf32>
    %371 = arith.addf %369, %370 : vector<2x512xf32>
    %372 = vector.extract_strided_slice %371 {offsets = [0, 0], sizes = [2, 128], strides = [1, 1]} : vector<2x512xf32> to vector<2x128xf32>
    %373 = arith.negf %372 : vector<2x128xf32>
    %374 = math.exp %373 : vector<2x128xf32>
    %cst_67 = arith.constant 1.000000e+00 : f32
    %375 = vector.broadcast %cst_67 : f32 to vector<2x128xf32>
    %376 = arith.addf %375, %374 : vector<2x128xf32>
    %377 = arith.divf %375, %376 : vector<2x128xf32>
    %378 = vector.extract_strided_slice %371 {offsets = [0, 128], sizes = [2, 128], strides = [1, 1]} : vector<2x512xf32> to vector<2x128xf32>
    %379 = arith.negf %378 : vector<2x128xf32>
    %380 = math.exp %379 : vector<2x128xf32>
    %cst_68 = arith.constant 1.000000e+00 : f32
    %381 = vector.broadcast %cst_68 : f32 to vector<2x128xf32>
    %382 = arith.addf %381, %380 : vector<2x128xf32>
    %383 = arith.divf %381, %382 : vector<2x128xf32>
    %384 = vector.extract_strided_slice %371 {offsets = [0, 256], sizes = [2, 128], strides = [1, 1]} : vector<2x512xf32> to vector<2x128xf32>
    %385 = math.tanh %384 : vector<2x128xf32>
    %386 = vector.extract_strided_slice %371 {offsets = [0, 384], sizes = [2, 128], strides = [1, 1]} : vector<2x512xf32> to vector<2x128xf32>
    %387 = arith.negf %386 : vector<2x128xf32>
    %388 = math.exp %387 : vector<2x128xf32>
    %cst_69 = arith.constant 1.000000e+00 : f32
    %389 = vector.broadcast %cst_69 : f32 to vector<2x128xf32>
    %390 = arith.addf %389, %388 : vector<2x128xf32>
    %391 = arith.divf %389, %390 : vector<2x128xf32>
    %392 = arith.mulf %383, %365 : vector<2x128xf32>
    %393 = arith.mulf %377, %385 : vector<2x128xf32>
    %394 = arith.addf %392, %393 : vector<2x128xf32>
    %395 = math.tanh %394 : vector<2x128xf32>
    %396 = arith.mulf %391, %395 : vector<2x128xf32>
    %397 = vector.extract_strided_slice %249 {offsets = [5, 0, 0], sizes = [1, 2, 512], strides = [1, 1, 1]} : vector<8x2x512xf32> to vector<1x2x512xf32>
    %398 = vector.shape_cast %397 : vector<1x2x512xf32> to vector<2x512xf32>
    %cst_70 = arith.constant dense<0.000000e+00> : vector<2x512xf32>
    %399 = tpu.matmul %396, %244, %cst_70 {dimension_numbers = #tpu.dot_dimension_numbers<[1], [0], [0], [1], [0, 0, 1, 1], [], []>} : vector<2x128xf32>, vector<128x512xf32>, vector<2x512xf32> -> vector<2x512xf32>
    %400 = arith.addf %398, %399 : vector<2x512xf32>
    %401 = vector.extract_strided_slice %400 {offsets = [0, 0], sizes = [2, 128], strides = [1, 1]} : vector<2x512xf32> to vector<2x128xf32>
    %402 = arith.negf %401 : vector<2x128xf32>
    %403 = math.exp %402 : vector<2x128xf32>
    %cst_71 = arith.constant 1.000000e+00 : f32
    %404 = vector.broadcast %cst_71 : f32 to vector<2x128xf32>
    %405 = arith.addf %404, %403 : vector<2x128xf32>
    %406 = arith.divf %404, %405 : vector<2x128xf32>
    %407 = vector.extract_strided_slice %400 {offsets = [0, 128], sizes = [2, 128], strides = [1, 1]} : vector<2x512xf32> to vector<2x128xf32>
    %408 = arith.negf %407 : vector<2x128xf32>
    %409 = math.exp %408 : vector<2x128xf32>
    %cst_72 = arith.constant 1.000000e+00 : f32
    %410 = vector.broadcast %cst_72 : f32 to vector<2x128xf32>
    %411 = arith.addf %410, %409 : vector<2x128xf32>
    %412 = arith.divf %410, %411 : vector<2x128xf32>
    %413 = vector.extract_strided_slice %400 {offsets = [0, 256], sizes = [2, 128], strides = [1, 1]} : vector<2x512xf32> to vector<2x128xf32>
    %414 = math.tanh %413 : vector<2x128xf32>
    %415 = vector.extract_strided_slice %400 {offsets = [0, 384], sizes = [2, 128], strides = [1, 1]} : vector<2x512xf32> to vector<2x128xf32>
    %416 = arith.negf %415 : vector<2x128xf32>
    %417 = math.exp %416 : vector<2x128xf32>
    %cst_73 = arith.constant 1.000000e+00 : f32
    %418 = vector.broadcast %cst_73 : f32 to vector<2x128xf32>
    %419 = arith.addf %418, %417 : vector<2x128xf32>
    %420 = arith.divf %418, %419 : vector<2x128xf32>
    %421 = arith.mulf %412, %394 : vector<2x128xf32>
    %422 = arith.mulf %406, %414 : vector<2x128xf32>
    %423 = arith.addf %421, %422 : vector<2x128xf32>
    %424 = math.tanh %423 : vector<2x128xf32>
    %425 = arith.mulf %420, %424 : vector<2x128xf32>
    %426 = vector.extract_strided_slice %249 {offsets = [6, 0, 0], sizes = [1, 2, 512], strides = [1, 1, 1]} : vector<8x2x512xf32> to vector<1x2x512xf32>
    %427 = vector.shape_cast %426 : vector<1x2x512xf32> to vector<2x512xf32>
    %cst_74 = arith.constant dense<0.000000e+00> : vector<2x512xf32>
    %428 = tpu.matmul %425, %244, %cst_74 {dimension_numbers = #tpu.dot_dimension_numbers<[1], [0], [0], [1], [0, 0, 1, 1], [], []>} : vector<2x128xf32>, vector<128x512xf32>, vector<2x512xf32> -> vector<2x512xf32>
    %429 = arith.addf %427, %428 : vector<2x512xf32>
    %430 = vector.extract_strided_slice %429 {offsets = [0, 0], sizes = [2, 128], strides = [1, 1]} : vector<2x512xf32> to vector<2x128xf32>
    %431 = arith.negf %430 : vector<2x128xf32>
    %432 = math.exp %431 : vector<2x128xf32>
    %cst_75 = arith.constant 1.000000e+00 : f32
    %433 = vector.broadcast %cst_75 : f32 to vector<2x128xf32>
    %434 = arith.addf %433, %432 : vector<2x128xf32>
    %435 = arith.divf %433, %434 : vector<2x128xf32>
    %436 = vector.extract_strided_slice %429 {offsets = [0, 128], sizes = [2, 128], strides = [1, 1]} : vector<2x512xf32> to vector<2x128xf32>
    %437 = arith.negf %436 : vector<2x128xf32>
    %438 = math.exp %437 : vector<2x128xf32>
    %cst_76 = arith.constant 1.000000e+00 : f32
    %439 = vector.broadcast %cst_76 : f32 to vector<2x128xf32>
    %440 = arith.addf %439, %438 : vector<2x128xf32>
    %441 = arith.divf %439, %440 : vector<2x128xf32>
    %442 = vector.extract_strided_slice %429 {offsets = [0, 256], sizes = [2, 128], strides = [1, 1]} : vector<2x512xf32> to vector<2x128xf32>
    %443 = math.tanh %442 : vector<2x128xf32>
    %444 = vector.extract_strided_slice %429 {offsets = [0, 384], sizes = [2, 128], strides = [1, 1]} : vector<2x512xf32> to vector<2x128xf32>
    %445 = arith.negf %444 : vector<2x128xf32>
    %446 = math.exp %445 : vector<2x128xf32>
    %cst_77 = arith.constant 1.000000e+00 : f32
    %447 = vector.broadcast %cst_77 : f32 to vector<2x128xf32>
    %448 = arith.addf %447, %446 : vector<2x128xf32>
    %449 = arith.divf %447, %448 : vector<2x128xf32>
    %450 = arith.mulf %441, %423 : vector<2x128xf32>
    %451 = arith.mulf %435, %443 : vector<2x128xf32>
    %452 = arith.addf %450, %451 : vector<2x128xf32>
    %453 = math.tanh %452 : vector<2x128xf32>
    %454 = arith.mulf %449, %453 : vector<2x128xf32>
    %455 = vector.extract_strided_slice %249 {offsets = [7, 0, 0], sizes = [1, 2, 512], strides = [1, 1, 1]} : vector<8x2x512xf32> to vector<1x2x512xf32>
    %456 = vector.shape_cast %455 : vector<1x2x512xf32> to vector<2x512xf32>
    %cst_78 = arith.constant dense<0.000000e+00> : vector<2x512xf32>
    %457 = tpu.matmul %454, %244, %cst_78 {dimension_numbers = #tpu.dot_dimension_numbers<[1], [0], [0], [1], [0, 0, 1, 1], [], []>} : vector<2x128xf32>, vector<128x512xf32>, vector<2x512xf32> -> vector<2x512xf32>
    %458 = arith.addf %456, %457 : vector<2x512xf32>
    %459 = vector.extract_strided_slice %458 {offsets = [0, 0], sizes = [2, 128], strides = [1, 1]} : vector<2x512xf32> to vector<2x128xf32>
    %460 = arith.negf %459 : vector<2x128xf32>
    %461 = math.exp %460 : vector<2x128xf32>
    %cst_79 = arith.constant 1.000000e+00 : f32
    %462 = vector.broadcast %cst_79 : f32 to vector<2x128xf32>
    %463 = arith.addf %462, %461 : vector<2x128xf32>
    %464 = arith.divf %462, %463 : vector<2x128xf32>
    %465 = vector.extract_strided_slice %458 {offsets = [0, 128], sizes = [2, 128], strides = [1, 1]} : vector<2x512xf32> to vector<2x128xf32>
    %466 = arith.negf %465 : vector<2x128xf32>
    %467 = math.exp %466 : vector<2x128xf32>
    %cst_80 = arith.constant 1.000000e+00 : f32
    %468 = vector.broadcast %cst_80 : f32 to vector<2x128xf32>
    %469 = arith.addf %468, %467 : vector<2x128xf32>
    %470 = arith.divf %468, %469 : vector<2x128xf32>
    %471 = vector.extract_strided_slice %458 {offsets = [0, 256], sizes = [2, 128], strides = [1, 1]} : vector<2x512xf32> to vector<2x128xf32>
    %472 = math.tanh %471 : vector<2x128xf32>
    %473 = vector.extract_strided_slice %458 {offsets = [0, 384], sizes = [2, 128], strides = [1, 1]} : vector<2x512xf32> to vector<2x128xf32>
    %474 = arith.negf %473 : vector<2x128xf32>
    %475 = math.exp %474 : vector<2x128xf32>
    %cst_81 = arith.constant 1.000000e+00 : f32
    %476 = vector.broadcast %cst_81 : f32 to vector<2x128xf32>
    %477 = arith.addf %476, %475 : vector<2x128xf32>
    %478 = arith.divf %476, %477 : vector<2x128xf32>
    %479 = arith.mulf %470, %452 : vector<2x128xf32>
    %480 = arith.mulf %464, %472 : vector<2x128xf32>
    %481 = arith.addf %479, %480 : vector<2x128xf32>
    %482 = math.tanh %481 : vector<2x128xf32>
    %483 = arith.mulf %478, %482 : vector<2x128xf32>
    %c0_82 = arith.constant 0 : index
    %c0_83 = arith.constant 0 : index
    %484 = vector.load %arg7[%c0_82, %c0_83] : memref<128x128xf32, #tpu.memory_space<vmem>>, vector<128x128xf32>
    %cst_84 = arith.constant dense<0.000000e+00> : vector<2x128xf32>
    %485 = tpu.matmul %483, %484, %cst_84 {dimension_numbers = #tpu.dot_dimension_numbers<[1], [0], [0], [1], [0, 0, 1, 1], [], []>} : vector<2x128xf32>, vector<128x128xf32>, vector<2x128xf32> -> vector<2x128xf32>
    %c0_85 = arith.constant 0 : index
    %c0_86 = arith.constant 0 : index
    %486 = vector.load %arg8[%c0_85, %c0_86] : memref<1x128xf32, #tpu.memory_space<vmem>>, vector<1x128xf32>
    %487 = vector.broadcast %486 : vector<1x128xf32> to vector<2x128xf32>
    %488 = arith.addf %485, %487 : vector<2x128xf32>
    %c0_87 = arith.constant 0 : index
    %c0_88 = arith.constant 0 : index
    %489 = vector.load %arg9[%c0_87, %c0_88] : memref<2x128xf32, #tpu.memory_space<vmem>>, vector<2x128xf32>
    tpu.vector_store %arg9[%c0_87, %c0_88], %488 {strides = array<i32>} : memref<2x128xf32, #tpu.memory_space<vmem>>, vector<2x128xf32>,
    return
  }
}

</mosaic_0001>

<bundles_post_ra>
// kernel: tpu_custom_call.1
= control target key start
LH: loop header
LB: loop body
LE: loop exit
PB: predicated region body
PF: predicated region fallthrough
CT: control target
= control target key end

     0   :  { %14 = vsyncpa [#allocation3], 0  ;;  %s6832_s0 = inlined_call_operand.hbm [shape: f32[16,16], index: 0, kind: input, shape index: {}]   ;;  %s6833_s1 = inlined_call_operand.hbm [shape: f32[16,512], index: 1, kind: input, shape index: {}]   ;;  %s6834_s2 = inlined_call_operand.hbm [shape: f32[128,512], index: 2, kind: input, shape index: {}]   ;;  %s6835_s3 = inlined_call_operand.vmem [shape: f32[1,512], index: 3, kind: input, shape index: {}]   ;;  %s6836_s4 = inlined_call_operand.hbm [shape: f32[128,512], index: 4, kind: input, shape index: {}]   ;;  %s6837_s5 = inlined_call_operand.hbm [shape: f32[128,512], index: 5, kind: input, shape index: {}]   ;;  %s6838_s6 = inlined_call_operand.vmem [shape: f32[1,512], index: 6, kind: input, shape index: {}]   ;;  %s6839_s7 = inlined_call_operand.hbm [shape: f32[128,128], index: 7, kind: input, shape index: {}]   ;;  %s6840_s8 = inlined_call_operand.vmem [shape: f32[1,128], index: 8, kind: input, shape index: {}]   ;;  %s6841_s9 = inlined_call_operand.hbm [shape: f32[2,128], index: 9, kind: output, shape index: {}]  }
   0x1   :  { %15 = vsyncpa [#allocation6], 0 }
   0x2   :  { %16 = vsyncpa [#allocation9], 0 }
   0x3   :  { %17 = vsyncpa [#allocation12], 0 }
   0x4   :  { %18 = vsyncpa [#allocation4], 0  ;;  %s4824_s30 = smov [#allocation5]  }
   0x5   :  { %s36_s10 = sshll.u32 %s4824_s30, 4  ;;  %s37_s10 = int_to_ptr.vmem [resolvable:$true] %s36_s10 }
   0x6   :  { %s4682_s11 = scalar_lea.vmem %s37_s10, 1024  ;;  %p4687_p1 = scmp.lt.s32.totalorder %s37_s10, %s37_s10 }
   0x7   :  { %p4683_p0 = scmp.ne.s32.totalorder %s37_s10, %s4682_s11  ;;  %p4688_p2 = scmp.lt.s32.totalorder %s4682_s11, %s4682_s11 }
   0x9   :  { %p4689_p3 = por %p4688_p2, %p4687_p1 }
   0xb   :  { %p4690_p4 = pnand %p4689_p3, %p4683_p0 }
   0xd   :  { %4693 = shalt.err (!%p4690_p4)
}
   0xe   :  { %s4825_s12 = smov 512   ;;  %s4826_s13 = smov 32  }
   0xf   :  { %42 = dma.hbm_to_vmem [thread:$0]  %s6833_s1, 1024, %s37_s10, [#allocation6], %s4825_s12, %s4825_s12, %s4826_s13  }
  0x10   :  { %s4827_s16 = smov [#allocation8]   ;;  %s4828_s18 = smov [#allocation2]  }
  0x11   :  { %s62_s17 = sshll.u32 %s4827_s16, 4  ;;  %s24_s19 = sshll.u32 %s4828_s18, 4  ;;  %s63_s17 = int_to_ptr.vmem [resolvable:$true] %s62_s17  ;;  %s25_s19 = int_to_ptr.vmem [resolvable:$true] %s24_s19 }
  0x12   :  { %s4702_s20 = scalar_lea.vmem %s63_s17, 8192  ;;  %p4707_p6 = scmp.lt.s32.totalorder %s63_s17, %s63_s17 }
  0x13   :  { %p4703_p5 = scmp.ne.s32.totalorder %s63_s17, %s4702_s20  ;;  %p4708_p7 = scmp.lt.s32.totalorder %s4702_s20, %s4702_s20 }
  0x15   :  { %p4709_p8 = por %p4708_p7, %p4707_p6 }
  0x17   :  { %p4710_p9 = pnand %p4709_p8, %p4703_p5 }
  0x19   :  { %4713 = shalt.err (!%p4710_p9)
}
  0x1a   :  { %68 = dma.hbm_to_vmem [thread:$0]  %s6836_s4, 8192, %s63_s17, [#allocation9], %s4825_s12, %s4825_s12, %s4826_s13  }
  0x1b   :  { %s4722_s1 = scalar_lea.vmem %s25_s19, 256  ;;  %p4727_p11 = scmp.lt.s32.totalorder %s25_s19, %s25_s19 }
  0x1c   :  { %p4723_p10 = scmp.ne.s32.totalorder %s25_s19, %s4722_s1  ;;  %p4728_p12 = scmp.lt.s32.totalorder %s4722_s1, %s4722_s1 }
  0x1e   :  { %p4729_p13 = por %p4728_p12, %p4727_p11 }
  0x20   :  { %p4730_p0 = pnand %p4729_p13, %p4723_p10 }
  0x22   :  { %4733 = shalt.err (!%p4730_p0)
}
  0x23   :  { %s4829_s23 = smov 128   ;;  %s4830_s24 = smov 8  }
  0x24   :  { %30 = dma.hbm_to_vmem [thread:$0]  %s6832_s0, 256, %s25_s19, [#allocation3], %s4829_s23, %s4829_s23, %s4830_s24  }
  0x25   :  { %s4831_s27 = smov [#allocation7]   ;;  %s4832_s4 = smov [#allocation10]  }
  0x26   :  { %s48_s28 = sshll.u32 %s4831_s27, 4  ;;  %s74_s29 = sshll.u32 %s4832_s4, 4  ;;  %s49_s28 = int_to_ptr.vmem [resolvable:$true] %s48_s28  ;;  %s75_s29 = int_to_ptr.vmem [resolvable:$true] %s74_s29 }
  0x27   :  { %s4742_s30 = scalar_lea.vmem %s49_s28, 8192  ;;  %p4747_p2 = scmp.lt.s32.totalorder %s49_s28, %s49_s28 }
  0x28   :  { %p4743_p1 = scmp.ne.s32.totalorder %s49_s28, %s4742_s30  ;;  %p4748_p3 = scmp.lt.s32.totalorder %s4742_s30, %s4742_s30 }
  0x2a   :  { %p4749_p4 = por %p4748_p3, %p4747_p2 }
  0x2c   :  { %p4750_p5 = pnand %p4749_p4, %p4743_p1 }
  0x2e   :  { %4753 = shalt.err (!%p4750_p5)
}
  0x2f   :  { %54 = dma.hbm_to_vmem [thread:$0]  %s6834_s2, 8192, %s49_s28, [#allocation6], %s4825_s12, %s4825_s12, %s4826_s13  }
  0x30   :  { %s4762_s0 = scalar_lea.vmem %s75_s29, 8192  ;;  %p4767_p7 = scmp.lt.s32.totalorder %s75_s29, %s75_s29 }
  0x31   :  { %p4763_p6 = scmp.ne.s32.totalorder %s75_s29, %s4762_s0  ;;  %p4768_p8 = scmp.lt.s32.totalorder %s4762_s0, %s4762_s0 }
  0x33   :  { %p4769_p9 = por %p4768_p8, %p4767_p7 }
  0x35   :  { %p4770_p10 = pnand %p4769_p9, %p4763_p6 }
  0x37   :  { %4773 = shalt.err (!%p4770_p10)
}
  0x38   :  { %80 = dma.hbm_to_vmem [thread:$0]  %s6837_s5, 8192, %s75_s29, [#allocation9], %s4825_s12, %s4825_s12, %s4826_s13  }
  0x39   :  { %s4833_s16 = smov [#allocation11]  }
  0x3a   :  { %s88_s17 = sshll.u32 %s4833_s16, 4  ;;  %s89_s17 = int_to_ptr.vmem [resolvable:$true] %s88_s17 }
  0x3b   :  { %s4782_s18 = scalar_lea.vmem %s89_s17, 2048  ;;  %p4787_p12 = scmp.lt.s32.totalorder %s89_s17, %s89_s17 }
  0x3c   :  { %p4783_p11 = scmp.ne.s32.totalorder %s89_s17, %s4782_s18  ;;  %p4788_p13 = scmp.lt.s32.totalorder %s4782_s18, %s4782_s18 }
  0x3e   :  { %p4789_p0 = por %p4788_p13, %p4787_p12 }
  0x40   :  { %p4790_p1 = pnand %p4789_p0, %p4783_p11 }
  0x42   :  { %4793 = shalt.err (!%p4790_p1)
}
  0x43   :  { %94 = dma.hbm_to_vmem [thread:$0]  %s6839_s7, 2048, %s89_s17, [#allocation12], %s4829_s23, %s4829_s23, %s4830_s24  }
  0x44   :  { %4814 = dma.done.wait [#allocation3], 256  }
  0x45   :  { %4815 = vsyncadd [#allocation3], 4294967040 }
  0x46   :  { %4816 = dma.done.wait [#allocation6], 9216  }
  0x47   :  { %4817 = vsyncadd [#allocation6], 4294958080 }
  0x48   :  { %4818 = dma.done.wait [#allocation9], 16384  }
  0x49   :  { %4819 = vsyncadd [#allocation9], 4294950912 }
  0x4a   :  { %4820 = dma.done.wait [#allocation12], 2048  }
  0x4b   :  { %4821 = vsyncadd [#allocation12], 4294965248  ;;  %v6844_v0 = vmov 0.0   ;;  %v122_v1 = vld [vmem:[#allocation5 + $0x28] sm:$0xff]  ;;  %v121_v2 = vld [vmem:[#allocation5 + $0x20] sm:$0xff]  ;;  %vm211_vm0 = vcmask 130048  }
  0x4c   :  { %282 = vmatprep.mubr.f32.mxu1 %v6844_v0  ;;  %524 = vmatprep.mubr.f32.mxu0 %v6844_v0  ;;  %v118_v3 = vld [vmem:[#allocation5 + $0x8] sm:$0xff]  ;;  %v117_v4 = vld [vmem:[#allocation5] sm:$0xff]  ;;  %v115_v5 = vld [vmem:[#allocation2] sm:$0xff]  ;;  %vm2090_vm1 = vcmask 1041408   ;;  %vm2092_vm2 = vcmask 1043456   ;;  %vm2094_vm3 = vcmask 1045504  }
  0x4d   :  { %246 = vmatprep.subr.mxu1 %v122_v1  ;;  %v124_v6 = vld [vmem:[#allocation5 + $0x38] sm:$0xff]  ;;  %v123_v7 = vld [vmem:[#allocation5 + $0x30] sm:$0xff]  ;;  %v4926_v8 = vld [vmem:[#allocation7 + $0x1e8] sm:$0xff]  ;;  %vm4836_vm4 = vmmov 0   ;;  %s4837_s20 = smov [#allocation13]  }
  0x4e   :  { %247 = vmatpush1.msra.mxu1 %v121_v2  ;;  %7079 = vst [vmem:[#allocation19_spill] sm:$0xff] %v4926_v8  ;;  %v120_v9 = vld [vmem:[#allocation5 + $0x18] sm:$0xff]  ;;  %460 = vmatprep.subr.mxu0 %v4926_v8  ;;  %v4929_v10 = vld [vmem:[#allocation7 + $0x1e0] sm:$0xff]  ;;  %v119_v11 = vld [vmem:[#allocation5 + $0x10] sm:$0xff]  ;;  %s4159_s21 = sshll.u32 %s4837_s20, 4  ;;  %s4160_s21 = int_to_ptr.vmem [resolvable:$true] %s4159_s21 }
  0x4f   :  { %248 = vmatprep.subr.mxu1 %v118_v3  ;;  %v4932_v12 = vld [vmem:[#allocation7 + $0x1c8] sm:$0xff]  ;;  %v116_v13 = vld [vmem:[#allocation2 + $0x8] sm:$0xff]  ;;  %461 = vmatpush1.msra.mxu0 %v4929_v10  ;;  %v4938_v15 = vld [vmem:[#allocation7 + $0x1c0] sm:$0xff]  ;;  %s4794_s22 = scalar_lea.vmem %s4160_s21, 32  ;;  %p4799_p3 = scmp.lt.s32.totalorder %s4160_s21, %s4160_s21 }
  0x50   :  { %249 = vmatpush1.msra.mxu1 %v117_v4  ;;  %v4935_v14 = vld [vmem:[#allocation7 + $0x1f8] sm:$0xff]  ;;  %462 = vmatprep.subr.mxu0 %v4932_v12  ;;  %v4941_v16 = vld [vmem:[#allocation7 + $0x1a8] sm:$0xff]  ;;  %v4945_v17 = vld [vmem:[#allocation7 + $0x1a0] sm:$0xff]  ;;  %p4795_p2 = scmp.ne.s32.totalorder %s4160_s21, %s4794_s22  ;;  %p4800_p4 = scmp.lt.s32.totalorder %s4794_s22, %s4794_s22 }
  0x51   :  { %4171 = vmatmul.mubr.msk.f32.vlgmr.msra.gmra.mxu1 %vm211_vm0, %v115_v5  ;;  %323 = vmatprep.subr.mxu1 %v124_v6  ;;  %7080 = vst [vmem:[#allocation20_spill] sm:$0xff] %v4935_v14  ;;  %v4949_v18 = vld [vmem:[#allocation7 + $0x188] sm:$0xff]  ;;  %v4951_v19 = vld [vmem:[#allocation7 + $0x1f0] sm:$0xff]  ;;  %v4954_v20 = vld [vmem:[#allocation7 + $0x1d8] sm:$0xff] }
  0x52   :  { %324 = vmatpush1.msra.mxu1 %v123_v7  ;;  %288 = vmatprep.mubr.f32.mxu1 %v6844_v0  ;;  %v4957_v21 = vld [vmem:[#allocation7 + $0x180] sm:$0xff]  ;;  %v4960_v22 = vld [vmem:[#allocation7 + $0x1d0] sm:$0xff]  ;;  %v4963_v23 = vld [vmem:[#allocation7 + $0x168] sm:$0xff]  ;;  %p4801_p5 = por %p4800_p4, %p4799_p3 }
  0x53   :  { %325 = vmatprep.subr.mxu1 %v120_v9  ;;  %463 = vmatpush1.msra.mxu0 %v4938_v15  ;;  %v4967_v24 = vld [vmem:[#allocation7 + $0x1b8] sm:$0xff]  ;;  %v4970_v25 = vld [vmem:[#allocation7 + $0x1b0] sm:$0xff]  ;;  %v4973_v26 = vld [vmem:[#allocation7 + $0x160] sm:$0xff] }
  0x54   :  { %326 = vmatpush1.msra.mxu1 %v119_v11  ;;  %464 = vmatprep.subr.mxu0 %v4941_v16  ;;  %v4976_v27 = vld [vmem:[#allocation7 + $0x198] sm:$0xff]  ;;  %v4979_v28 = vld [vmem:[#allocation7 + $0x148] sm:$0xff]  ;;  %v4983_v29 = vld [vmem:[#allocation7 + $0x190] sm:$0xff]  ;;  %p4802_p6 = pnand %p4801_p5, %p4795_p2 }
  0x55   :  { %4172 = vmatmul.mubr.msk.f32.gmra.mxu1 %vm211_vm0, %v116_v13  ;;  %531 = vmatprep.subr.mxu1 %v4935_v14  ;;  %v4985_v30 = vld [vmem:[#allocation7 + $0x140] sm:$0xff]  ;;  %v4989_v31 = vld [vmem:[#allocation7 + $0x178] sm:$0xff]  ;;  %v4991_v32 = vld [vmem:[#allocation7 + $0x128] sm:$0xff] }
  0x56   :  { %359 = vmatprep.mubr.f32.mxu1 %v6844_v0  ;;  %465 = vmatpush1.msra.mxu0 %v4945_v17  ;;  %v4995_v33 = vld [vmem:[#allocation7 + $0x170] sm:$0xff]  ;;  %v4997_v34 = vld [vmem:[#allocation7 + $0x120] sm:$0xff]  ;;  %v5001_v35 = vld [vmem:[#allocation7 + $0x158] sm:$0xff] }
  0x57   :  { %466 = vmatprep.subr.mxu0 %v4949_v18  ;;  %v5003_v36 = vld [vmem:[#allocation7 + $0x108] sm:$0xff]  ;;  %v5007_v37 = vld [vmem:[#allocation7 + $0x150] sm:$0xff]  ;;  %v5009_v38 = vld [vmem:[#allocation7 + $0x100] sm:$0xff] }
  0x58   :  { %467 = vmatpush1.msra.mxu0 %v4957_v21  ;;  %v5013_v39 = vld [vmem:[#allocation7 + $0x138] sm:$0xff]  ;;  %v5015_v40 = vld [vmem:[#allocation7 + $0xe8] sm:$0xff]  ;;  %v5019_v41 = vld [vmem:[#allocation7 + $0x130] sm:$0xff] }
  0x59   :  { %4173 = vmatmul.mubr.msk.f32.vlgmr.msra.gmra.mxu1 %vm211_vm0, %v115_v5  ;;  %468 = vmatprep.subr.mxu0 %v4963_v23  ;;  %v5021_v42 = vld [vmem:[#allocation7 + $0xe0] sm:$0xff]  ;;  %v5025_v43 = vld [vmem:[#allocation7 + $0x118] sm:$0xff]  ;;  %v5027_v44 = vld [vmem:[#allocation7 + $0xc8] sm:$0xff] }
  0x5a   :  { %532 = vmatpush1.msra.mxu1 %v4951_v19  ;;  %365 = vmatprep.mubr.f32.mxu1 %v6844_v0  ;;  %v5031_v45 = vld [vmem:[#allocation7 + $0x110] sm:$0xff]  ;;  %v5033_v46 = vld [vmem:[#allocation7 + $0xc0] sm:$0xff]  ;;  %v5037_v47 = vld [vmem:[#allocation7 + $0xf8] sm:$0xff] }
  0x5b   :  { %533 = vmatprep.subr.mxu1 %v4954_v20  ;;  %469 = vmatpush1.msra.mxu0 %v4973_v26  ;;  %v5039_v48 = vld [vmem:[#allocation7 + $0xa8] sm:$0xff]  ;;  %v5043_v49 = vld [vmem:[#allocation7 + $0xf0] sm:$0xff]  ;;  %v5045_v50 = vld [vmem:[#allocation7 + $0xa0] sm:$0xff] }
  0x5c   :  { %534 = vmatpush1.msra.mxu1 %v4960_v22  ;;  %470 = vmatprep.subr.mxu0 %v4979_v28  ;;  %7081 = vst [vmem:[#allocation21_spill] sm:$0xff] %v5045_v50  ;;  %v5049_v51 = vld [vmem:[#allocation7 + $0xd8] sm:$0xff]  ;;  %v5051_v52 = vld [vmem:[#allocation7 + $0x88] sm:$0xff]  ;;  %v5055_v53 = vld [vmem:[#allocation7 + $0xd0] sm:$0xff] }
  0x5d   :  { %535 = vmatprep.subr.mxu1 %v4967_v24  ;;  %4174 = vmatmul.mubr.msk.f32.gmra.mxu1 %vm211_vm0, %v116_v13  ;;  %7082 = vst [vmem:[#allocation22_spill] sm:$0xff] %v5051_v52  ;;  %v5057_v54 = vld [vmem:[#allocation7 + $0x80] sm:$0xff]  ;;  %v5061_v55 = vld [vmem:[#allocation7 + $0xb8] sm:$0xff]  ;;  %v5063_v56 = vld [vmem:[#allocation7 + $0x68] sm:$0xff] }
  0x5e   :  { %536 = vmatpush1.msra.mxu1 %v4970_v25  ;;  %471 = vmatpush1.msra.mxu0 %v4985_v30  ;;  %7083 = vst [vmem:[#allocation23_spill] sm:$0xff] %v5057_v54  ;;  %7084 = vst [vmem:[#allocation24_spill] sm:$0xff] %v5061_v55  ;;  %v5067_v57 = vld [vmem:[#allocation7 + $0xb0] sm:$0xff]  ;;  %v5069_v58 = vld [vmem:[#allocation7 + $0x60] sm:$0xff] }
  0x5f   :  { %537 = vmatprep.subr.mxu1 %v4976_v27  ;;  %472 = vmatprep.subr.mxu0 %v4991_v32  ;;  %7085 = vst [vmem:[#allocation25_spill] sm:$0xff] %v5063_v56  ;;  %7086 = vst [vmem:[#allocation26_spill] sm:$0xff] %v5067_v57  ;;  %v5073_v59 = vld [vmem:[#allocation7 + $0x98] sm:$0xff]  ;;  %v5075_v60 = vld [vmem:[#allocation7 + $0x48] sm:$0xff] }
  0x60   :  { %538 = vmatpush1.msra.mxu1 %v4983_v29  ;;  %473 = vmatpush1.msra.mxu0 %v4997_v34  ;;  %7087 = vst [vmem:[#allocation27_spill] sm:$0xff] %v5069_v58  ;;  %7088 = vst [vmem:[#allocation28_spill] sm:$0xff] %v5073_v59  ;;  %v5079_v61 = vld [vmem:[#allocation7 + $0x90] sm:$0xff]  ;;  %v5081_v62 = vld [vmem:[#allocation7 + $0x40] sm:$0xff] }
  0x61   :  { %539 = vmatprep.subr.mxu1 %v4989_v31  ;;  %474 = vmatprep.subr.mxu0 %v5003_v36  ;;  %7089 = vst [vmem:[#allocation29_spill] sm:$0xff] %v5075_v60  ;;  %7090 = vst [vmem:[#allocation30_spill] sm:$0xff] %v5079_v61  ;;  %v5085_v63 = vld [vmem:[#allocation7 + $0x78] sm:$0xff]  ;;  %v5087_v1 = vld [vmem:[#allocation7 + $0x28] sm:$0xff] }
  0x62   :  { %540 = vmatpush1.msra.mxu1 %v4995_v33  ;;  %475 = vmatpush1.msra.mxu0 %v5009_v38  ;;  %7091 = vst [vmem:[#allocation31_spill] sm:$0xff] %v5081_v62  ;;  %7092 = vst [vmem:[#allocation32_spill] sm:$0xff] %v5085_v63  ;;  %v5091_v2 = vld [vmem:[#allocation7 + $0x70] sm:$0xff]  ;;  %v5093_v3 = vld [vmem:[#allocation7 + $0x20] sm:$0xff] }
  0x63   :  { %541 = vmatprep.subr.mxu1 %v5001_v35  ;;  %476 = vmatprep.subr.mxu0 %v5015_v40  ;;  %7093 = vst [vmem:[#allocation33_spill] sm:$0xff] %v5087_v1  ;;  %7094 = vst [vmem:[#allocation34_spill] sm:$0xff] %v5091_v2  ;;  %v5097_v4 = vld [vmem:[#allocation7 + $0x58] sm:$0xff]  ;;  %v5099_v5 = vld [vmem:[#allocation7 + $0x8] sm:$0xff] }
  0x64   :  { %542 = vmatpush1.msra.mxu1 %v5007_v37  ;;  %477 = vmatpush1.msra.mxu0 %v5021_v42  ;;  %7095 = vst [vmem:[#allocation35_spill] sm:$0xff] %v5093_v3  ;;  %7096 = vst [vmem:[#allocation36_spill] sm:$0xff] %v5097_v4  ;;  %v5103_v6 = vld [vmem:[#allocation7 + $0x50] sm:$0xff]  ;;  %v5105_v7 = vld [vmem:[#allocation7] sm:$0xff] }
  0x65   :  { %543 = vmatprep.subr.mxu1 %v5013_v39  ;;  %478 = vmatprep.subr.mxu0 %v5027_v44  ;;  %7097 = vst [vmem:[#allocation37_spill] sm:$0xff] %v5099_v5  ;;  %7098 = vst [vmem:[#allocation38_spill] sm:$0xff] %v5103_v6  ;;  %v5109_v9 = vld [vmem:[#allocation7 + $0x38] sm:$0xff]  ;;  %v5113_v11 = vld [vmem:[#allocation7 + $0x30] sm:$0xff] }
  0x66   :  { %544 = vmatpush1.msra.mxu1 %v5019_v41  ;;  %479 = vmatpush1.msra.mxu0 %v5033_v46  ;;  %7099 = vst [vmem:[#allocation39_spill] sm:$0xff] %v5105_v7  ;;  %7100 = vst [vmem:[#allocation40_spill] sm:$0xff] %v5109_v9  ;;  %v5117_v13 = vld [vmem:[#allocation7 + $0x18] sm:$0xff] }
  0x67   :  { %545 = vmatprep.subr.mxu1 %v5025_v43  ;;  %480 = vmatprep.subr.mxu0 %v5039_v48  ;;  %7101 = vst [vmem:[#allocation41_spill] sm:$0xff] %v5113_v11  ;;  %7102 = vst [vmem:[#allocation42_spill] sm:$0xff] %v5117_v13 }
  0x68   :  { %546 = vmatpush1.msra.mxu1 %v5031_v45  ;;  %481 = vmatpush1.msra.mxu0 %v5045_v50 }
  0x69   :  { %547 = vmatprep.subr.mxu1 %v5037_v47  ;;  %482 = vmatprep.subr.mxu0 %v5051_v52 }
  0x6a   :  { %548 = vmatpush1.msra.mxu1 %v5043_v49  ;;  %483 = vmatpush1.msra.mxu0 %v5057_v54 }
  0x6b   :  { %549 = vmatprep.subr.mxu1 %v5049_v51  ;;  %484 = vmatprep.subr.mxu0 %v5063_v56 }
  0x6c   :  { %550 = vmatpush1.msra.mxu1 %v5055_v53  ;;  %485 = vmatpush1.msra.mxu0 %v5069_v58 }
  0x6d   :  { %551 = vmatprep.subr.mxu1 %v5061_v55  ;;  %486 = vmatprep.subr.mxu0 %v5075_v60 }
  0x6e   :  { %552 = vmatpush1.msra.mxu1 %v5067_v57  ;;  %487 = vmatpush1.msra.mxu0 %v5081_v62 }
  0x6f   :  { %553 = vmatprep.subr.mxu1 %v5073_v59  ;;  %488 = vmatprep.subr.mxu0 %v5087_v1  ;;  %v5121_v1 = vld [vmem:[#allocation7 + $0x10] sm:$0xff] }
  0x70   :  { %554 = vmatpush1.msra.mxu1 %v5079_v61  ;;  %489 = vmatpush1.msra.mxu0 %v5093_v3  ;;  %7103 = vst [vmem:[#allocation43_spill] sm:$0xff] %v5121_v1 }
  0x71   :  { %555 = vmatprep.subr.mxu1 %v5085_v63  ;;  %490 = vmatprep.subr.mxu0 %v5099_v5 }
  0x72   :  { %556 = vmatpush1.msra.mxu1 %v5091_v2  ;;  %491 = vmatpush1.msra.mxu0 %v5105_v7 }
  0x73   :  { %557 = vmatprep.subr.mxu1 %v5097_v4  ;;  %525 = vmatmul.mubr.f32.vlgmr.msra.gmra.mxu0 %v6844_v0 }
  0x74   :  { %558 = vmatpush1.msra.mxu1 %v5103_v6  ;;  %595 = vmatprep.mubr.f32.mxu1 %v6844_v0 }
  0x75   :  { %559 = vmatprep.subr.mxu1 %v5109_v9  ;;  %656 = vmatprep.subr.mxu0 %v4926_v8 }
  0x76   :  { %560 = vmatpush1.msra.mxu1 %v5113_v11  ;;  %657 = vmatpush1.msra.mxu0 %v4929_v10 }
  0x77   :  { %561 = vmatprep.subr.mxu1 %v5117_v13  ;;  %658 = vmatprep.subr.mxu0 %v4932_v12 }
  0x78   :  { %562 = vmatpush1.msra.mxu1 %v5121_v1  ;;  %659 = vmatpush1.msra.mxu0 %v4938_v15 }
  0x79   :  { %596 = vmatmul.mubr.f32.vlgmr.msra.gmra.mxu1 %v6844_v0  ;;  %727 = vmatprep.subr.mxu1 %v4935_v14  ;;  %v7104_v0 = vld [vmem:[#allocation33_spill] sm:$0xff] }
  0x7a   :  { %728 = vmatpush1.msra.mxu1 %v4951_v19  ;;  %660 = vmatprep.subr.mxu0 %v4941_v16 }
  0x7b   :  { %729 = vmatprep.subr.mxu1 %v4954_v20  ;;  %661 = vmatpush1.msra.mxu0 %v4945_v17 }
  0x7c   :  { %730 = vmatpush1.msra.mxu1 %v4960_v22  ;;  %662 = vmatprep.subr.mxu0 %v4949_v18 }
  0x7d   :  { %731 = vmatprep.subr.mxu1 %v4967_v24  ;;  %663 = vmatpush1.msra.mxu0 %v4957_v21 }
  0x7e   :  { %732 = vmatpush1.msra.mxu1 %v4970_v25  ;;  %664 = vmatprep.subr.mxu0 %v4963_v23 }
  0x7f   :  { %733 = vmatprep.subr.mxu1 %v4976_v27  ;;  %665 = vmatpush1.msra.mxu0 %v4973_v26 }
  0x80   :  { %734 = vmatpush1.msra.mxu1 %v4983_v29  ;;  %666 = vmatprep.subr.mxu0 %v4979_v28 }
  0x81   :  { %735 = vmatprep.subr.mxu1 %v4989_v31  ;;  %667 = vmatpush1.msra.mxu0 %v4985_v30 }
  0x82   :  { %736 = vmatpush1.msra.mxu1 %v4995_v33  ;;  %668 = vmatprep.subr.mxu0 %v4991_v32 }
  0x83   :  { %737 = vmatprep.subr.mxu1 %v5001_v35  ;;  %669 = vmatpush1.msra.mxu0 %v4997_v34 }
  0x84   :  { %738 = vmatpush1.msra.mxu1 %v5007_v37  ;;  %670 = vmatprep.subr.mxu0 %v5003_v36 }
  0x85   :  { %739 = vmatprep.subr.mxu1 %v5013_v39  ;;  %671 = vmatpush1.msra.mxu0 %v5009_v38 }
  0x86   :  { %740 = vmatpush1.msra.mxu1 %v5019_v41  ;;  %672 = vmatprep.subr.mxu0 %v5015_v40 }
  0x87   :  { %741 = vmatprep.subr.mxu1 %v5025_v43  ;;  %673 = vmatpush1.msra.mxu0 %v5021_v42 }
  0x88   :  { %742 = vmatpush1.msra.mxu1 %v5031_v45  ;;  %674 = vmatprep.subr.mxu0 %v5027_v44 }
  0x89   :  { %743 = vmatprep.subr.mxu1 %v5037_v47  ;;  %675 = vmatpush1.msra.mxu0 %v5033_v46 }
  0x8a   :  { %744 = vmatpush1.msra.mxu1 %v5043_v49  ;;  %676 = vmatprep.subr.mxu0 %v5039_v48 }
  0x8b   :  { %745 = vmatprep.subr.mxu1 %v5049_v51  ;;  %677 = vmatpush1.msra.mxu0 %v5045_v50 }
  0x8c   :  { %746 = vmatpush1.msra.mxu1 %v5055_v53  ;;  %678 = vmatprep.subr.mxu0 %v5051_v52 }
  0x8d   :  { %747 = vmatprep.subr.mxu1 %v5061_v55  ;;  %679 = vmatpush1.msra.mxu0 %v5057_v54 }
  0x8e   :  { %748 = vmatpush1.msra.mxu1 %v5067_v57  ;;  %680 = vmatprep.subr.mxu0 %v5063_v56 }
  0x8f   :  { %749 = vmatprep.subr.mxu1 %v5073_v59  ;;  %681 = vmatpush1.msra.mxu0 %v5069_v58 }
  0x90   :  { %750 = vmatpush1.msra.mxu1 %v5079_v61  ;;  %682 = vmatprep.subr.mxu0 %v5075_v60  ;;  %v7105_v60 = vmov 0.0  }
  0x91   :  { %751 = vmatprep.subr.mxu1 %v5085_v63  ;;  %683 = vmatpush1.msra.mxu0 %v5081_v62 }
  0x92   :  { %752 = vmatpush1.msra.mxu1 %v5091_v2  ;;  %684 = vmatprep.subr.mxu0 %v7104_v0 }
  0x93   :  { %753 = vmatprep.subr.mxu1 %v5097_v4  ;;  %685 = vmatpush1.msra.mxu0 %v5093_v3 }
  0x94   :  { %754 = vmatpush1.msra.mxu1 %v5103_v6  ;;  %686 = vmatprep.subr.mxu0 %v5099_v5 }
  0x95   :  { %755 = vmatprep.subr.mxu1 %v5109_v9  ;;  %687 = vmatpush1.msra.mxu0 %v5105_v7  ;;  %v191_v9 = vlaneseq  ;;  %v189_v7 = vld [vmem:[%s6835_s3] sm:$0xf] }
  0x96   :  { %756 = vmatpush1.msra.mxu1 %v5113_v11  ;;  %720 = vmatprep.mubr.f32.mxu0 %v7105_v60 }
  0x97   :  { %757 = vmatprep.subr.mxu1 %v5117_v13  ;;  %791 = vmatprep.mubr.f32.mxu1 %v7105_v60  ;;  %v5196_v3 = vshrl.u32 %v191_v9, 7  ;;  %v4835_v13 = vmov 1983009808  }
  0x98   :  { %758 = vmatpush1.msra.mxu1 %v5121_v1  ;;  %852 = vmatprep.subr.mxu0 %v4926_v8 }
  0x99   :  { %923 = vmatprep.subr.mxu1 %v4935_v14  ;;  %7106 = vst [vmem:[#allocation44_spill] sm:$0xff] %v5196_v3  ;;  %v6885_v11 = vsub.s32 0, %v5196_v3  ;;  %v6886_v5 = vsub.s32 1, %v5196_v3  ;;  %v385_v14 = vunpack.c.l.s4 %v4835_v13  ;;  %v6897_v62 = vsub.s32 2, %v5196_v3 }
  0x9a   :  { %v6898_v4 = vsub.s32 3, %v5196_v3 }
  0x9b   :  { %v194_v1 = vrot.slane %v189_v7, %v6885_v11  ;;  %v198_v60 = vrot.slane %v189_v7, %v6886_v5  ;;  %v386_v56 = vunpack.c.0.s8 %v385_v14  ;;  %v202_v11 = vrot.slane %v189_v7, %v6897_v62 }
  0x9c   :  { %v206_v5 = vrot.slane %v189_v7, %v6898_v4 }
 0x111   :  { %v284_v8 = vpop.f32.mrf.mxu1 }
 0x112   :  { %v285_v9 = vadd.f32 %v284_v8, %v194_v1 }
 0x113   :  { %v286_v0 = vpop.f32.mrf.mxu1 }
 0x114   :  { %v287_v6 = vadd.f32 %v286_v0, %v198_v60  ;;  %v5214_v0 = vsub.s32 %v386_v56, %v5196_v3 }
 0x115   :  { %v290_v2 = vpop.f32.mrf.mxu1 }
 0x116   :  { %v381_v58 = vcombine.high %v285_v9, %v287_v6  ;;  %v291_v63 = vadd.f32 %v290_v2, %v194_v1  ;;  %v380_v52 = vcombine.low %v285_v9, %v287_v6 }
 0x117   :  { %v292_v61 = vpop.f32.mrf.mxu1 }
 0x118   :  { %v293_v54 = vadd.f32 %v292_v61, %v198_v60  ;;  %v5217_v61 = vrot.slane %v380_v52, %v5214_v0  ;;  %v5220_v7 = vrot.slane %v381_v58, %v5214_v0 }
 0x119   :  { %v361_v13 = vpop.f32.mrf.mxu1 }
 0x11a   :  { %v416_v59 = vcombine.low %v291_v63, %v293_v54  ;;  %v417_v8 = vcombine.high %v291_v63, %v293_v54  ;;  %v362_v50 = vadd.f32 %v361_v13, %v202_v11  ;;  %7107 = vst [vmem:[#allocation45_spill] sm:$0xff] %v5220_v7  ;;  %v7134_v7 = vld [vmem:[#allocation42_spill] sm:$0xff] }
 0x11b   :  { %v363_v57 = vpop.f32.mrf.mxu1 }
 0x11c   :  { %v364_v55 = vadd.f32 %v363_v57, %v206_v5  ;;  %v5235_v58 = vrot.slane %v416_v59, %v5214_v0 }
 0x11d   :  { %v367_v1 = vpop.f32.mrf.mxu1 }
 0x11e   :  { %v382_v14 = vcombine.low %v362_v50, %v364_v55  ;;  %v383_v2 = vcombine.high %v362_v50, %v364_v55  ;;  %v368_v60 = vadd.f32 %v367_v1, %v202_v11  ;;  %7109 = vst [vmem:[#allocation47_spill] sm:$0xff] %v5235_v58  ;;  %v5238_v11 = vrot.slane %v417_v8, %v5214_v0  ;;  %v7131_v58 = vld [vmem:[#allocation35_spill] sm:$0xff] }
 0x11f   :  { %v369_v62 = vpop.f32.mrf.mxu1 }
 0x120   :  { %v5223_v54 = vrot.slane %v382_v14, %v5214_v0  ;;  %v5226_v56 = vrot.slane %v383_v2, %v5214_v0  ;;  %v370_v63 = vadd.f32 %v369_v62, %v206_v5  ;;  %7110 = vst [vmem:[#allocation48_spill] sm:$0xff] %v5238_v11  ;;  %v7129_v11 = vld [vmem:[#allocation33_spill] sm:$0xff] }
 0x122   :  { %7108 = vst [vmem:[#allocation46_spill] sm:$0xff] %v5226_v56  ;;  %v418_v55 = vcombine.low %v368_v60, %v370_v63  ;;  %v419_v6 = vcombine.high %v368_v60, %v370_v63  ;;  %v412_v5 = vcombine.low %v5217_v61, %v5223_v54  ;;  %v7133_v56 = vld [vmem:[#allocation37_spill] sm:$0xff] }
 0x124   :  { %v5241_v9 = vrot.slane %v418_v55, %v5214_v0  ;;  %v5244_v62 = vrot.slane %v419_v6, %v5214_v0 }
 0x126   :  { %7111 = vst [vmem:[#allocation49_spill] sm:$0xff] %v5241_v9  ;;  %7112 = vst [vmem:[#allocation50_spill] sm:$0xff] %v5244_v62  ;;  %v7130_v9 = vld [vmem:[#allocation40_spill] sm:$0xff] }
 0x133   :  { %v526_v8 = vpop.f32.mrf.mxu0 }
 0x135   :  { %v528_v14 = vpop.f32.mrf.mxu0 }
 0x136   :  { %v606_v60 = vcombine.low %v526_v8, %v528_v14 }
 0x138   :  { %v614_v6 = vrot.slane %v606_v60, %v5214_v0 }
 0x139   :  { %v597_v2 = vpop.f32.mrf.mxu1 }
 0x13b   :  { %v599_v63 = vpop.f32.mrf.mxu1 }
 0x13c   :  { %v607_v55 = vcombine.low %v597_v2, %v599_v63 }
 0x13e   :  { %v621_v4 = vrot.slane %v607_v55, %v5214_v0 }
 0x140   :  { %v622_v13 = vcombine.low %v614_v6, %v621_v4 }
 0x142   :  { %v624_v52 = vadd.f32 %v622_v13, %v412_v5 }
 0x144   :  { %v4175_v50 = vmul.f32 -1.442695, %v624_v52  ;;  %v632_v1 = vrot.slane %v624_v52, 2  ;;  %v643_v59 = vrot.slane %v624_v52, 6  ;;  %v640_v8 = vrot.slane %v624_v52, 4 }
 0x146   :  { %4290 = vpow2.f32 %v4175_v50  ;;  %v4176_v57 = vmul.f32 -1.442695, %v632_v1  ;;  %v4177_v3 = vmul.f32 -1.442695, %v643_v59  ;;  %v7115_v59 = vld [vmem:[#allocation21_spill] sm:$0xff] }
 0x148   :  { %4292 = vpow2.f32 %v4176_v57 }
 0x149   :  { %4294 = vpow2.f32 %v4177_v3  ;;  %v7114_v3 = vld [vmem:[#allocation24_spill] sm:$0xff] }
 0x153   :  { %v4291_v62 = vpop.eup %4290 }
 0x154   :  { %v628_v14 = vadd.f32 1.0, %v4291_v62 }
 0x155   :  { %v4293_v2 = vpop.eup %4292 }
 0x156   :  { %4296 = vrcp.f32 %v628_v14  ;;  %v637_v60 = vadd.f32 1.0, %v4293_v2  ;;  %v4295_v63 = vpop.eup %4294  ;;  %v7117_v14 = vld [vmem:[#allocation22_spill] sm:$0xff]  ;;  %v7118_v2 = vld [vmem:[#allocation28_spill] sm:$0xff] }
 0x157   :  { %4298 = vtanh.f32 %v640_v8  ;;  %v648_v13 = vadd.f32 1.0, %v4295_v63  ;;  %v7116_v8 = vld [vmem:[#allocation26_spill] sm:$0xff] }
 0x158   :  { %4300 = vrcp.f32 %v637_v60  ;;  %v7119_v60 = vld [vmem:[#allocation23_spill] sm:$0xff]  ;;  %v7120_v63 = vld [vmem:[#allocation30_spill] sm:$0xff] }
 0x159   :  { %4302 = vrcp.f32 %v648_v13  ;;  %v7124_v13 = vld [vmem:[#allocation34_spill] sm:$0xff] }
 0x163   :  { %v4297_v55 = vpop.eup %4296 }
 0x164   :  { %v4299_v4 = vpop.eup %4298 }
 0x165   :  { %v4301_v5 = vpop.eup %4300  ;;  %v652_v50 = vmul.f32 %v4299_v4, %v4297_v55  ;;  %v7121_v55 = vld [vmem:[#allocation25_spill] sm:$0xff]  ;;  %v7122_v4 = vld [vmem:[#allocation32_spill] sm:$0xff] }
 0x166   :  { %v651_v6 = vmul.f32 0.0, %v4301_v5  ;;  %v4303_v57 = vpop.eup %4302  ;;  %v7123_v5 = vld [vmem:[#allocation27_spill] sm:$0xff] }
 0x168   :  { %v5258_v1 = vadd.f32 %v652_v50, %v651_v6  ;;  %v7125_v6 = vld [vmem:[#allocation29_spill] sm:$0xff]  ;;  %v7126_v50 = vld [vmem:[#allocation36_spill] sm:$0xff] }
 0x16a   :  { %4304 = vtanh.f32 %v5258_v1 }
 0x177   :  { %v4305_v52 = vpop.eup %4304 }
 0x178   :  { %v5261_v62 = vmul.f32 %v4305_v52, %v4303_v57  ;;  %v7127_v57 = vld [vmem:[#allocation31_spill] sm:$0xff]  ;;  %v7128_v52 = vld [vmem:[#allocation38_spill] sm:$0xff] }
 0x17a   :  { %7113 = vst [vmem:[#allocation51_spill] sm:$0xff] %v5261_v62  ;;  %721 = vmatmul.mubr.f32.vlgmr.msra.gmra.mxu0 %v5261_v62  ;;  %792 = vmatmul.mubr.f32.vlgmr.msra.gmra.mxu1 %v5261_v62  ;;  %v7132_v62 = vld [vmem:[#allocation41_spill] sm:$0xff] }
 0x17b   :  { %853 = vmatpush1.msra.mxu0 %v4929_v10  ;;  %924 = vmatpush1.msra.mxu1 %v4951_v19 }
 0x17c   :  { %854 = vmatprep.subr.mxu0 %v4932_v12  ;;  %925 = vmatprep.subr.mxu1 %v4954_v20 }
 0x17d   :  { %855 = vmatpush1.msra.mxu0 %v4938_v15  ;;  %926 = vmatpush1.msra.mxu1 %v4960_v22 }
 0x17e   :  { %856 = vmatprep.subr.mxu0 %v4941_v16  ;;  %927 = vmatprep.subr.mxu1 %v4967_v24 }
 0x17f   :  { %857 = vmatpush1.msra.mxu0 %v4945_v17  ;;  %928 = vmatpush1.msra.mxu1 %v4970_v25 }
 0x180   :  { %858 = vmatprep.subr.mxu0 %v4949_v18  ;;  %929 = vmatprep.subr.mxu1 %v4976_v27 }
 0x181   :  { %859 = vmatpush1.msra.mxu0 %v4957_v21  ;;  %930 = vmatpush1.msra.mxu1 %v4983_v29 }
 0x182   :  { %860 = vmatprep.subr.mxu0 %v4963_v23  ;;  %931 = vmatprep.subr.mxu1 %v4989_v31 }
 0x183   :  { %861 = vmatpush1.msra.mxu0 %v4973_v26  ;;  %932 = vmatpush1.msra.mxu1 %v4995_v33 }
 0x184   :  { %862 = vmatprep.subr.mxu0 %v4979_v28  ;;  %933 = vmatprep.subr.mxu1 %v5001_v35 }
 0x185   :  { %863 = vmatpush1.msra.mxu0 %v4985_v30  ;;  %934 = vmatpush1.msra.mxu1 %v5007_v37 }
 0x186   :  { %864 = vmatprep.subr.mxu0 %v4991_v32  ;;  %935 = vmatprep.subr.mxu1 %v5013_v39 }
 0x187   :  { %865 = vmatpush1.msra.mxu0 %v4997_v34  ;;  %936 = vmatpush1.msra.mxu1 %v5019_v41 }
 0x188   :  { %866 = vmatprep.subr.mxu0 %v5003_v36  ;;  %937 = vmatprep.subr.mxu1 %v5025_v43 }
 0x189   :  { %867 = vmatpush1.msra.mxu0 %v5009_v38  ;;  %938 = vmatpush1.msra.mxu1 %v5031_v45 }
 0x18a   :  { %868 = vmatprep.subr.mxu0 %v5015_v40  ;;  %939 = vmatprep.subr.mxu1 %v5037_v47 }
 0x18b   :  { %869 = vmatpush1.msra.mxu0 %v5021_v42  ;;  %940 = vmatpush1.msra.mxu1 %v5043_v49 }
 0x18c   :  { %870 = vmatprep.subr.mxu0 %v5027_v44  ;;  %941 = vmatprep.subr.mxu1 %v5049_v51 }
 0x18d   :  { %871 = vmatpush1.msra.mxu0 %v5033_v46  ;;  %942 = vmatpush1.msra.mxu1 %v5055_v53 }
 0x18e   :  { %872 = vmatprep.subr.mxu0 %v5039_v48  ;;  %943 = vmatprep.subr.mxu1 %v7114_v3 }
 0x18f   :  { %873 = vmatpush1.msra.mxu0 %v7115_v59  ;;  %944 = vmatpush1.msra.mxu1 %v7116_v8 }
 0x190   :  { %874 = vmatprep.subr.mxu0 %v7117_v14  ;;  %945 = vmatprep.subr.mxu1 %v7118_v2 }
 0x191   :  { %875 = vmatpush1.msra.mxu0 %v7119_v60  ;;  %946 = vmatpush1.msra.mxu1 %v7120_v63 }
 0x192   :  { %876 = vmatprep.subr.mxu0 %v7121_v55  ;;  %947 = vmatprep.subr.mxu1 %v7122_v4 }
 0x193   :  { %877 = vmatpush1.msra.mxu0 %v7123_v5  ;;  %948 = vmatpush1.msra.mxu1 %v7124_v13  ;;  %v7135_v13 = vld [vmem:[#allocation39_spill] sm:$0xff] }
 0x194   :  { %878 = vmatprep.subr.mxu0 %v7125_v6  ;;  %949 = vmatprep.subr.mxu1 %v7126_v50  ;;  %v7136_v6 = vmov 0.0   ;;  %v7137_v50 = vld [vmem:[#allocation43_spill] sm:$0xff] }
 0x195   :  { %879 = vmatpush1.msra.mxu0 %v7127_v57  ;;  %950 = vmatpush1.msra.mxu1 %v7128_v52  ;;  %v7138_v52 = vld [vmem:[#allocation19_spill] sm:$0xff] }
 0x196   :  { %880 = vmatprep.subr.mxu0 %v7129_v11  ;;  %951 = vmatprep.subr.mxu1 %v7130_v9  ;;  %v7139_v11 = vld [vmem:[#allocation20_spill] sm:$0xff] }
 0x197   :  { %881 = vmatpush1.msra.mxu0 %v7131_v58  ;;  %952 = vmatpush1.msra.mxu1 %v7132_v62 }
 0x198   :  { %882 = vmatprep.subr.mxu0 %v7133_v56  ;;  %953 = vmatprep.subr.mxu1 %v7134_v7 }
 0x199   :  { %883 = vmatpush1.msra.mxu0 %v7135_v13  ;;  %916 = vmatprep.mubr.f32.mxu0 %v7136_v6 }
 0x19a   :  { %954 = vmatpush1.msra.mxu1 %v7137_v50  ;;  %987 = vmatprep.mubr.f32.mxu1 %v7136_v6  ;;  %v7140_v50 = vcombine.high %v5217_v61, %v5223_v54 }
 0x19b   :  { %1048 = vmatprep.subr.mxu0 %v7138_v52  ;;  %1119 = vmatprep.subr.mxu1 %v7139_v11 }
 0x23a   :  { %v722_v9 = vpop.f32.mrf.mxu0  ;;  %v793_v58 = vpop.f32.mrf.mxu1 }
 0x23c   :  { %v724_v57 = vpop.f32.mrf.mxu0  ;;  %v795_v62 = vpop.f32.mrf.mxu1 }
 0x23d   :  { %v802_v5 = vcombine.low %v722_v9, %v724_v57  ;;  %v803_v56 = vcombine.low %v793_v58, %v795_v62  ;;  %v7154_v57 = vld [vmem:[#allocation40_spill] sm:$0xff] }
 0x23f   :  { %v810_v7 = vrot.slane %v802_v5, %v5214_v0  ;;  %v817_v13 = vrot.slane %v803_v56, %v5214_v0 }
 0x241   :  { %v818_v4 = vcombine.low %v810_v7, %v817_v13 }
 0x243   :  { %v820_v55 = vadd.f32 %v818_v4, %v7140_v50  ;;  %v7153_v50 = vld [vmem:[#allocation33_spill] sm:$0xff] }
 0x245   :  { %v4178_v6 = vmul.f32 -1.442695, %v820_v55  ;;  %v828_v63 = vrot.slane %v820_v55, 2  ;;  %v839_v11 = vrot.slane %v820_v55, 6  ;;  %v836_v14 = vrot.slane %v820_v55, 4  ;;  %v7151_v55 = vld [vmem:[#allocation31_spill] sm:$0xff] }
 0x247   :  { %4306 = vpow2.f32 %v4178_v6  ;;  %v4179_v52 = vmul.f32 -1.442695, %v828_v63  ;;  %v4180_v60 = vmul.f32 -1.442695, %v839_v11  ;;  %v7152_v6 = vld [vmem:[#allocation38_spill] sm:$0xff] }
 0x249   :  { %4308 = vpow2.f32 %v4179_v52  ;;  %v7155_v52 = vld [vmem:[#allocation35_spill] sm:$0xff] }
 0x24a   :  { %4310 = vpow2.f32 %v4180_v60 }
 0x254   :  { %v4307_v2 = vpop.eup %4306 }
 0x255   :  { %v824_v9 = vadd.f32 1.0, %v4307_v2 }
 0x256   :  { %v4309_v58 = vpop.eup %4308 }
 0x257   :  { %4312 = vrcp.f32 %v824_v9  ;;  %v833_v62 = vadd.f32 1.0, %v4309_v58  ;;  %v4311_v7 = vpop.eup %4310  ;;  %v7156_v9 = vld [vmem:[#allocation41_spill] sm:$0xff] }
 0x258   :  { %4314 = vtanh.f32 %v836_v14  ;;  %v844_v4 = vadd.f32 1.0, %v4311_v7  ;;  %v7150_v14 = vld [vmem:[#allocation36_spill] sm:$0xff]  ;;  %v7157_v58 = vld [vmem:[#allocation37_spill] sm:$0xff]  ;;  %v7159_v7 = vld [vmem:[#allocation39_spill] sm:$0xff] }
 0x259   :  { %4316 = vrcp.f32 %v833_v62  ;;  %v7158_v62 = vld [vmem:[#allocation42_spill] sm:$0xff] }
 0x25a   :  { %4318 = vrcp.f32 %v844_v4  ;;  %v7163_v4 = vld [vmem:[#allocation20_spill] sm:$0xff] }
 0x264   :  { %v4313_v56 = vpop.eup %4312 }
 0x265   :  { %v4315_v61 = vpop.eup %4314 }
 0x266   :  { %v4317_v54 = vpop.eup %4316  ;;  %v848_v63 = vmul.f32 %v4315_v61, %v4313_v56  ;;  %v7160_v56 = vmov 0.0   ;;  %v7161_v61 = vld [vmem:[#allocation43_spill] sm:$0xff] }
 0x267   :  { %v847_v5 = vmul.f32 %v4317_v54, %v5258_v1  ;;  %v4319_v11 = vpop.eup %4318  ;;  %v7149_v1 = vld [vmem:[#allocation29_spill] sm:$0xff]  ;;  %v7162_v54 = vld [vmem:[#allocation19_spill] sm:$0xff] }
 0x269   :  { %v5337_v13 = vadd.f32 %v848_v63, %v847_v5 }
 0x26b   :  { %4320 = vtanh.f32 %v5337_v13 }
 0x278   :  { %v4321_v2 = vpop.eup %4320 }
 0x279   :  { %v5340_v60 = vmul.f32 %v4321_v2, %v4319_v11 }
 0x27b   :  { %917 = vmatmul.mubr.f32.vlgmr.msra.gmra.mxu0 %v5340_v60  ;;  %988 = vmatmul.mubr.f32.vlgmr.msra.gmra.mxu1 %v5340_v60 }
 0x27c   :  { %1049 = vmatpush1.msra.mxu0 %v4929_v10  ;;  %1120 = vmatpush1.msra.mxu1 %v4951_v19  ;;  %v7141_v10 = vld [vmem:[#allocation22_spill] sm:$0xff] }
 0x27d   :  { %1050 = vmatprep.subr.mxu0 %v4932_v12  ;;  %1121 = vmatprep.subr.mxu1 %v4954_v20  ;;  %v7142_v12 = vld [vmem:[#allocation28_spill] sm:$0xff] }
 0x27e   :  { %1051 = vmatpush1.msra.mxu0 %v4938_v15  ;;  %1122 = vmatpush1.msra.mxu1 %v4960_v22  ;;  %v7143_v15 = vld [vmem:[#allocation23_spill] sm:$0xff] }
 0x27f   :  { %1052 = vmatprep.subr.mxu0 %v4941_v16  ;;  %1123 = vmatprep.subr.mxu1 %v4967_v24  ;;  %v7144_v16 = vld [vmem:[#allocation30_spill] sm:$0xff] }
 0x280   :  { %1053 = vmatpush1.msra.mxu0 %v4945_v17  ;;  %1124 = vmatpush1.msra.mxu1 %v4970_v25  ;;  %v7145_v17 = vld [vmem:[#allocation25_spill] sm:$0xff] }
 0x281   :  { %1054 = vmatprep.subr.mxu0 %v4949_v18  ;;  %1125 = vmatprep.subr.mxu1 %v4976_v27  ;;  %v7146_v18 = vld [vmem:[#allocation32_spill] sm:$0xff] }
 0x282   :  { %1055 = vmatpush1.msra.mxu0 %v4957_v21  ;;  %1126 = vmatpush1.msra.mxu1 %v4983_v29  ;;  %v7147_v21 = vld [vmem:[#allocation27_spill] sm:$0xff] }
 0x283   :  { %1056 = vmatprep.subr.mxu0 %v4963_v23  ;;  %1127 = vmatprep.subr.mxu1 %v4989_v31  ;;  %v7148_v23 = vld [vmem:[#allocation34_spill] sm:$0xff] }
 0x284   :  { %1057 = vmatpush1.msra.mxu0 %v4973_v26  ;;  %1128 = vmatpush1.msra.mxu1 %v4995_v33 }
 0x285   :  { %1058 = vmatprep.subr.mxu0 %v4979_v28  ;;  %1129 = vmatprep.subr.mxu1 %v5001_v35 }
 0x286   :  { %1059 = vmatpush1.msra.mxu0 %v4985_v30  ;;  %1130 = vmatpush1.msra.mxu1 %v5007_v37 }
 0x287   :  { %1060 = vmatprep.subr.mxu0 %v4991_v32  ;;  %1131 = vmatprep.subr.mxu1 %v5013_v39 }
 0x288   :  { %1061 = vmatpush1.msra.mxu0 %v4997_v34  ;;  %1132 = vmatpush1.msra.mxu1 %v5019_v41 }
 0x289   :  { %1062 = vmatprep.subr.mxu0 %v5003_v36  ;;  %1133 = vmatprep.subr.mxu1 %v5025_v43 }
 0x28a   :  { %1063 = vmatpush1.msra.mxu0 %v5009_v38  ;;  %1134 = vmatpush1.msra.mxu1 %v5031_v45 }
 0x28b   :  { %1064 = vmatprep.subr.mxu0 %v5015_v40  ;;  %1135 = vmatprep.subr.mxu1 %v5037_v47 }
 0x28c   :  { %1065 = vmatpush1.msra.mxu0 %v5021_v42  ;;  %1136 = vmatpush1.msra.mxu1 %v5043_v49 }
 0x28d   :  { %1066 = vmatprep.subr.mxu0 %v5027_v44  ;;  %1137 = vmatprep.subr.mxu1 %v5049_v51 }
 0x28e   :  { %1067 = vmatpush1.msra.mxu0 %v5033_v46  ;;  %1138 = vmatpush1.msra.mxu1 %v5055_v53 }
 0x28f   :  { %1068 = vmatprep.subr.mxu0 %v5039_v48  ;;  %1139 = vmatprep.subr.mxu1 %v7114_v3 }
 0x290   :  { %1069 = vmatpush1.msra.mxu0 %v7115_v59  ;;  %1140 = vmatpush1.msra.mxu1 %v7116_v8 }
 0x291   :  { %1070 = vmatprep.subr.mxu0 %v7141_v10  ;;  %1141 = vmatprep.subr.mxu1 %v7142_v12 }
 0x292   :  { %1071 = vmatpush1.msra.mxu0 %v7143_v15  ;;  %1142 = vmatpush1.msra.mxu1 %v7144_v16 }
 0x293   :  { %1072 = vmatprep.subr.mxu0 %v7145_v17  ;;  %1143 = vmatprep.subr.mxu1 %v7146_v18 }
 0x294   :  { %1073 = vmatpush1.msra.mxu0 %v7147_v21  ;;  %1144 = vmatpush1.msra.mxu1 %v7148_v23 }
 0x295   :  { %1074 = vmatprep.subr.mxu0 %v7149_v1  ;;  %1145 = vmatprep.subr.mxu1 %v7150_v14 }
 0x296   :  { %1075 = vmatpush1.msra.mxu0 %v7151_v55  ;;  %1146 = vmatpush1.msra.mxu1 %v7152_v6 }
 0x297   :  { %1076 = vmatprep.subr.mxu0 %v7153_v50  ;;  %1147 = vmatprep.subr.mxu1 %v7154_v57  ;;  %v7164_v57 = vld [vmem:[#allocation45_spill] sm:$0xff]  ;;  %v7165_v50 = vld [vmem:[#allocation46_spill] sm:$0xff] }
 0x298   :  { %1077 = vmatpush1.msra.mxu0 %v7155_v52  ;;  %1148 = vmatpush1.msra.mxu1 %v7156_v9 }
 0x299   :  { %1078 = vmatprep.subr.mxu0 %v7157_v58  ;;  %1149 = vmatprep.subr.mxu1 %v7158_v62 }
 0x29a   :  { %1079 = vmatpush1.msra.mxu0 %v7159_v7  ;;  %1112 = vmatprep.mubr.f32.mxu0 %v7160_v56 }
 0x29b   :  { %1150 = vmatpush1.msra.mxu1 %v7161_v61  ;;  %1183 = vmatprep.mubr.f32.mxu1 %v7160_v56  ;;  %v7166_v61 = vcombine.low %v7164_v57, %v7165_v50 }
 0x29c   :  { %1244 = vmatprep.subr.mxu0 %v7162_v54  ;;  %1315 = vmatprep.subr.mxu1 %v7163_v4 }
 0x33b   :  { %v918_v5 = vpop.f32.mrf.mxu0  ;;  %v989_v63 = vpop.f32.mrf.mxu1 }
 0x33d   :  { %v920_v11 = vpop.f32.mrf.mxu0  ;;  %v991_v2 = vpop.f32.mrf.mxu1 }
 0x33e   :  { %v998_v9 = vcombine.low %v918_v5, %v920_v11  ;;  %v999_v58 = vcombine.low %v989_v63, %v991_v2 }
 0x340   :  { %v1006_v62 = vrot.slane %v998_v9, %v5214_v0  ;;  %v1013_v7 = vrot.slane %v999_v58, %v5214_v0 }
 0x342   :  { %v1014_v52 = vcombine.low %v1006_v62, %v1013_v7 }
 0x344   :  { %v1016_v6 = vadd.f32 %v1014_v52, %v7166_v61 }
 0x346   :  { %v4181_v56 = vmul.f32 -1.442695, %v1016_v6  ;;  %v1024_v55 = vrot.slane %v1016_v6, 2  ;;  %v1035_v4 = vrot.slane %v1016_v6, 6  ;;  %v1032_v23 = vrot.slane %v1016_v6, 4 }
 0x348   :  { %4322 = vpow2.f32 %v4181_v56  ;;  %v4182_v54 = vmul.f32 -1.442695, %v1024_v55  ;;  %v4183_v14 = vmul.f32 -1.442695, %v1035_v4  ;;  %v5427_v4 = vld [vmem:[#allocation7 + $0x1c8] sm:$0xff] }
 0x34a   :  { %4324 = vpow2.f32 %v4182_v54 }
 0x34b   :  { %4326 = vpow2.f32 %v4183_v14 }
 0x355   :  { %v4323_v1 = vpop.eup %4322 }
 0x356   :  { %v1020_v5 = vadd.f32 1.0, %v4323_v1  ;;  %v2029_v1 = vcombine.low %v5340_v60, %v5340_v60 }
 0x357   :  { %v4325_v63 = vpop.eup %4324 }
 0x358   :  { %4328 = vrcp.f32 %v1020_v5  ;;  %v1029_v9 = vadd.f32 1.0, %v4325_v63  ;;  %v4327_v58 = vpop.eup %4326  ;;  %v2036_v2 = vrot.slane %v2029_v1, %v5214_v0  ;;  %v5431_v5 = vld [vmem:[#allocation7 + $0x1c0] sm:$0xff] }
 0x359   :  { %4330 = vtanh.f32 %v1032_v23  ;;  %v1040_v61 = vadd.f32 1.0, %v4327_v58  ;;  %v7167_v63 = vld [vmem:[#allocation51_spill] sm:$0xff] }
 0x35a   :  { %4332 = vrcp.f32 %v1029_v9  ;;  %v2091_v9 = vsel %vm2090_vm1, %v7167_v63, %v2036_v2  ;;  %v5437_v58 = vld [vmem:[#allocation7 + $0x1a8] sm:$0xff]  ;;  %v5533_v63 = vld [vmem:[#allocation7 + $0x1d0] sm:$0xff] }
 0x35b   :  { %4334 = vrcp.f32 %v1040_v61 }
 0x365   :  { %v4329_v62 = vpop.eup %4328 }
 0x366   :  { %v4331_v7 = vpop.eup %4330 }
 0x367   :  { %v4333_v52 = vpop.eup %4332  ;;  %v1044_v55 = vmul.f32 %v4331_v7, %v4329_v62  ;;  %v5448_v62 = vld [vmem:[#allocation7 + $0x188] sm:$0xff] }
 0x368   :  { %v1043_v56 = vmul.f32 %v4333_v52, %v5337_v13  ;;  %v4335_v14 = vpop.eup %4334  ;;  %v5423_v13 = vld [vmem:[#allocation7 + $0x1e0] sm:$0xff] }
 0x36a   :  { %v5416_v11 = vadd.f32 %v1044_v55, %v1043_v56 }
 0x36c   :  { %4336 = vtanh.f32 %v5416_v11 }
 0x379   :  { %v4337_v6 = vpop.eup %4336 }
 0x37a   :  { %v1047_v23 = vmul.f32 %v4337_v6, %v4335_v14 }
 0x37c   :  { %1113 = vmatmul.mubr.f32.vlgmr.msra.gmra.mxu0 %v1047_v23  ;;  %1184 = vmatmul.mubr.f32.vlgmr.msra.gmra.mxu1 %v1047_v23  ;;  %v2045_v54 = vrot.slane %v1047_v23, %v5214_v0 }
 0x37d   :  { %1245 = vmatpush1.msra.mxu0 %v5423_v13  ;;  %1316 = vmatpush1.msra.mxu1 %v4951_v19 }
 0x37e   :  { %1246 = vmatprep.subr.mxu0 %v5427_v4  ;;  %1317 = vmatprep.subr.mxu1 %v4954_v20  ;;  %v2046_v60 = vcombine.low %v2045_v54, %v2045_v54  ;;  %v5444_v20 = vld [vmem:[#allocation7 + $0x1a0] sm:$0xff]  ;;  %v5524_v54 = vld [vmem:[#allocation7 + $0x1f0] sm:$0xff] }
 0x37f   :  { %1247 = vmatpush1.msra.mxu0 %v5431_v5  ;;  %1318 = vmatpush1.msra.mxu1 %v4960_v22  ;;  %v5452_v22 = vld [vmem:[#allocation7 + $0x180] sm:$0xff] }
 0x380   :  { %1248 = vmatprep.subr.mxu0 %v5437_v58  ;;  %1319 = vmatprep.subr.mxu1 %v4967_v24  ;;  %v5442_v19 = vsel %vm2092_vm2, %v2091_v9, %v2046_v60  ;;  %v5456_v24 = vld [vmem:[#allocation7 + $0x168] sm:$0xff]  ;;  %v5537_v9 = vld [vmem:[#allocation7 + $0x1b8] sm:$0xff] }
 0x381   :  { %1249 = vmatpush1.msra.mxu0 %v5444_v20  ;;  %1320 = vmatpush1.msra.mxu1 %v4970_v25  ;;  %v7168_v25 = vld [vmem:[#allocation34_spill] sm:$0xff] }
 0x382   :  { %1250 = vmatprep.subr.mxu0 %v5448_v62  ;;  %1321 = vmatprep.subr.mxu1 %v4976_v27  ;;  %v7170_v27 = vld [vmem:[#allocation36_spill] sm:$0xff] }
 0x383   :  { %1251 = vmatpush1.msra.mxu0 %v5452_v22  ;;  %1322 = vmatpush1.msra.mxu1 %v4983_v29  ;;  %v7172_v29 = vld [vmem:[#allocation38_spill] sm:$0xff] }
 0x384   :  { %1252 = vmatprep.subr.mxu0 %v5456_v24  ;;  %1323 = vmatprep.subr.mxu1 %v4989_v31  ;;  %v7174_v31 = vld [vmem:[#allocation40_spill] sm:$0xff] }
 0x385   :  { %1253 = vmatpush1.msra.mxu0 %v4973_v26  ;;  %1324 = vmatpush1.msra.mxu1 %v4995_v33  ;;  %v7169_v26 = vld [vmem:[#allocation29_spill] sm:$0xff] }
 0x386   :  { %1254 = vmatprep.subr.mxu0 %v4979_v28  ;;  %1325 = vmatprep.subr.mxu1 %v5001_v35  ;;  %v7171_v28 = vld [vmem:[#allocation31_spill] sm:$0xff]  ;;  %v7176_v33 = vld [vmem:[#allocation41_spill] sm:$0xff]  ;;  %v7178_v35 = vld [vmem:[#allocation42_spill] sm:$0xff] }
 0x387   :  { %1255 = vmatpush1.msra.mxu0 %v4985_v30  ;;  %1326 = vmatpush1.msra.mxu1 %v5007_v37  ;;  %v7173_v30 = vld [vmem:[#allocation33_spill] sm:$0xff]  ;;  %v7180_v37 = vmov 0.0  }
 0x388   :  { %1256 = vmatprep.subr.mxu0 %v4991_v32  ;;  %1327 = vmatprep.subr.mxu1 %v5013_v39  ;;  %v7175_v32 = vld [vmem:[#allocation35_spill] sm:$0xff] }
 0x389   :  { %1257 = vmatpush1.msra.mxu0 %v4997_v34  ;;  %1328 = vmatpush1.msra.mxu1 %v5019_v41  ;;  %v7177_v34 = vld [vmem:[#allocation37_spill] sm:$0xff]  ;;  %v5508_v39 = vld [vmem:[#allocation7 + $0x1e8] sm:$0xff] }
 0x38a   :  { %1258 = vmatprep.subr.mxu0 %v5003_v36  ;;  %1329 = vmatprep.subr.mxu1 %v5025_v43  ;;  %v7179_v36 = vld [vmem:[#allocation39_spill] sm:$0xff]  ;;  %7182 = vst [vmem:[#allocation24_spill] sm:$0xff] %v5508_v39 }
 0x38b   :  { %1259 = vmatpush1.msra.mxu0 %v5009_v38  ;;  %1330 = vmatpush1.msra.mxu1 %v5031_v45  ;;  %v7181_v38 = vld [vmem:[#allocation43_spill] sm:$0xff] }
 0x38c   :  { %1260 = vmatprep.subr.mxu0 %v5015_v40  ;;  %1331 = vmatprep.subr.mxu1 %v5037_v47  ;;  %v5511_v40 = vld [vmem:[#allocation7 + $0x1f8] sm:$0xff] }
 0x38d   :  { %1261 = vmatpush1.msra.mxu0 %v5021_v42  ;;  %1332 = vmatpush1.msra.mxu1 %v5043_v49  ;;  %7183 = vst [vmem:[#allocation21_spill] sm:$0xff] %v5511_v40 }
 0x38e   :  { %1262 = vmatprep.subr.mxu0 %v5027_v44  ;;  %1333 = vmatprep.subr.mxu1 %v5049_v51  ;;  %v7184_v51 = vcombine.high %v7164_v57, %v7165_v50 }
 0x38f   :  { %1263 = vmatpush1.msra.mxu0 %v5033_v46  ;;  %1334 = vmatpush1.msra.mxu1 %v5055_v53 }
 0x390   :  { %1264 = vmatprep.subr.mxu0 %v5039_v48  ;;  %1335 = vmatprep.subr.mxu1 %v7114_v3 }
 0x391   :  { %1265 = vmatpush1.msra.mxu0 %v7115_v59  ;;  %1336 = vmatpush1.msra.mxu1 %v7116_v8 }
 0x392   :  { %1266 = vmatprep.subr.mxu0 %v7141_v10  ;;  %1337 = vmatprep.subr.mxu1 %v7142_v12 }
 0x393   :  { %1267 = vmatpush1.msra.mxu0 %v7143_v15  ;;  %1338 = vmatpush1.msra.mxu1 %v7144_v16 }
 0x394   :  { %1268 = vmatprep.subr.mxu0 %v7145_v17  ;;  %1339 = vmatprep.subr.mxu1 %v7146_v18 }
 0x395   :  { %1269 = vmatpush1.msra.mxu0 %v7147_v21  ;;  %1340 = vmatpush1.msra.mxu1 %v7168_v25 }
 0x396   :  { %1270 = vmatprep.subr.mxu0 %v7169_v26  ;;  %1341 = vmatprep.subr.mxu1 %v7170_v27  ;;  %v5541_v26 = vld [vmem:[#allocation7 + $0x1b0] sm:$0xff]  ;;  %v5545_v27 = vld [vmem:[#allocation7 + $0x198] sm:$0xff] }
 0x397   :  { %1271 = vmatpush1.msra.mxu0 %v7171_v28  ;;  %1342 = vmatpush1.msra.mxu1 %v7172_v29  ;;  %v5553_v29 = vld [vmem:[#allocation7 + $0x190] sm:$0xff] }
 0x398   :  { %1272 = vmatprep.subr.mxu0 %v7173_v30  ;;  %1343 = vmatprep.subr.mxu1 %v7174_v31  ;;  %v5557_v30 = vld [vmem:[#allocation7 + $0x178] sm:$0xff]  ;;  %v5560_v31 = vld [vmem:[#allocation7 + $0x160] sm:$0xff] }
 0x399   :  { %1273 = vmatpush1.msra.mxu0 %v7175_v32  ;;  %1344 = vmatpush1.msra.mxu1 %v7176_v33  ;;  %v5563_v32 = vld [vmem:[#allocation7 + $0x170] sm:$0xff]  ;;  %v5569_v33 = vld [vmem:[#allocation7 + $0x158] sm:$0xff] }
 0x39a   :  { %1274 = vmatprep.subr.mxu0 %v7177_v34  ;;  %1345 = vmatprep.subr.mxu1 %v7178_v35  ;;  %v5572_v34 = vld [vmem:[#allocation7 + $0x140] sm:$0xff]  ;;  %v5575_v35 = vld [vmem:[#allocation7 + $0x150] sm:$0xff] }
 0x39b   :  { %1275 = vmatpush1.msra.mxu0 %v7179_v36  ;;  %1308 = vmatprep.mubr.f32.mxu0 %v7180_v37  ;;  %v5578_v36 = vld [vmem:[#allocation7 + $0x128] sm:$0xff] }
 0x39c   :  { %1346 = vmatpush1.msra.mxu1 %v7181_v38  ;;  %1379 = vmatprep.mubr.f32.mxu1 %v7180_v37  ;;  %v5581_v38 = vld [vmem:[#allocation7 + $0x138] sm:$0xff] }
 0x39d   :  { %1440 = vmatprep.subr.mxu0 %v5508_v39  ;;  %1511 = vmatprep.subr.mxu1 %v5511_v40 }
 0x43c   :  { %v1114_v41 = vpop.f32.mrf.mxu0  ;;  %v1185_v42 = vpop.f32.mrf.mxu1 }
 0x43e   :  { %v1116_v43 = vpop.f32.mrf.mxu0  ;;  %v1187_v44 = vpop.f32.mrf.mxu1 }
 0x43f   :  { %v1194_v45 = vcombine.low %v1114_v41, %v1116_v43  ;;  %v1195_v46 = vcombine.low %v1185_v42, %v1187_v44  ;;  %v5584_v41 = vld [vmem:[#allocation7 + $0x120] sm:$0xff]  ;;  %v5587_v42 = vld [vmem:[#allocation7 + $0x130] sm:$0xff]  ;;  %v5590_v43 = vld [vmem:[#allocation7 + $0x108] sm:$0xff] }
 0x440   :  { %v5593_v44 = vld [vmem:[#allocation7 + $0x118] sm:$0xff] }
 0x441   :  { %v1202_v47 = vrot.slane %v1194_v45, %v5214_v0  ;;  %v1209_v48 = vrot.slane %v1195_v46, %v5214_v0  ;;  %v5596_v45 = vld [vmem:[#allocation7 + $0x100] sm:$0xff]  ;;  %v5599_v46 = vld [vmem:[#allocation7 + $0x110] sm:$0xff] }
 0x443   :  { %v1210_v49 = vcombine.low %v1202_v47, %v1209_v48  ;;  %v5602_v47 = vld [vmem:[#allocation7 + $0xe8] sm:$0xff]  ;;  %v5605_v48 = vld [vmem:[#allocation7 + $0xf8] sm:$0xff] }
 0x445   :  { %v1212_v53 = vadd.f32 %v1210_v49, %v7184_v51  ;;  %v5608_v49 = vld [vmem:[#allocation7 + $0xe0] sm:$0xff]  ;;  %v5611_v51 = vld [vmem:[#allocation7 + $0xf0] sm:$0xff] }
 0x447   :  { %v4184_v3 = vmul.f32 -1.442695, %v1212_v53  ;;  %v1220_v59 = vrot.slane %v1212_v53, 2  ;;  %v1231_v10 = vrot.slane %v1212_v53, 6  ;;  %v1228_v16 = vrot.slane %v1212_v53, 4  ;;  %v5614_v53 = vld [vmem:[#allocation7 + $0xc8] sm:$0xff] }
 0x449   :  { %4338 = vpow2.f32 %v4184_v3  ;;  %v4185_v8 = vmul.f32 -1.442695, %v1220_v59  ;;  %v4186_v12 = vmul.f32 -1.442695, %v1231_v10  ;;  %v5617_v3 = vld [vmem:[#allocation7 + $0xd8] sm:$0xff]  ;;  %v5620_v59 = vld [vmem:[#allocation7 + $0xc0] sm:$0xff] }
 0x44a   :  { %v5626_v10 = vld [vmem:[#allocation7 + $0xa8] sm:$0xff] }
 0x44b   :  { %4340 = vpow2.f32 %v4185_v8  ;;  %v5623_v8 = vld [vmem:[#allocation7 + $0xd0] sm:$0xff] }
 0x44c   :  { %4342 = vpow2.f32 %v4186_v12  ;;  %v5629_v12 = vld [vmem:[#allocation7 + $0xb8] sm:$0xff] }
 0x456   :  { %v4339_v15 = vpop.eup %4338 }
 0x457   :  { %v1216_v17 = vadd.f32 1.0, %v4339_v15  ;;  %v5632_v15 = vld [vmem:[#allocation7 + $0xa0] sm:$0xff] }
 0x458   :  { %v4341_v18 = vpop.eup %4340 }
 0x459   :  { %4344 = vrcp.f32 %v1216_v17  ;;  %v1225_v21 = vadd.f32 1.0, %v4341_v18  ;;  %v4343_v7 = vpop.eup %4342  ;;  %v5638_v17 = vld [vmem:[#allocation7 + $0x88] sm:$0xff]  ;;  %v5641_v18 = vld [vmem:[#allocation7 + $0x98] sm:$0xff] }
 0x45a   :  { %4346 = vtanh.f32 %v1228_v16  ;;  %v1236_v61 = vadd.f32 1.0, %v4343_v7  ;;  %v5635_v16 = vld [vmem:[#allocation7 + $0xb0] sm:$0xff]  ;;  %7186 = vst [vmem:[#allocation22_spill] sm:$0xff] %v5638_v17  ;;  %7187 = vst [vmem:[#allocation28_spill] sm:$0xff] %v5641_v18 }
 0x45b   :  { %4348 = vrcp.f32 %v1225_v21  ;;  %v5644_v21 = vld [vmem:[#allocation7 + $0x80] sm:$0xff]  ;;  %v5647_v7 = vld [vmem:[#allocation7 + $0x90] sm:$0xff] }
 0x45c   :  { %4350 = vrcp.f32 %v1236_v61  ;;  %7188 = vst [vmem:[#allocation23_spill] sm:$0xff] %v5644_v21  ;;  %7189 = vst [vmem:[#allocation30_spill] sm:$0xff] %v5647_v7  ;;  %v5659_v61 = vld [vmem:[#allocation7 + $0x70] sm:$0xff] }
 0x45d   :  { %7193 = vst [vmem:[#allocation19_spill] sm:$0xff] %v5659_v61 }
 0x466   :  { %v4345_v52 = vpop.eup %4344 }
 0x467   :  { %v4347_v50 = vpop.eup %4346 }
 0x468   :  { %v4349_v57 = vpop.eup %4348  ;;  %v1240_v55 = vmul.f32 %v4347_v50, %v4345_v52  ;;  %v5650_v52 = vld [vmem:[#allocation7 + $0x68] sm:$0xff]  ;;  %v5653_v50 = vld [vmem:[#allocation7 + $0x78] sm:$0xff] }
 0x469   :  { %v1239_v56 = vmul.f32 %v4349_v57, %v5416_v11  ;;  %v4351_v14 = vpop.eup %4350  ;;  %v5528_v11 = vld [vmem:[#allocation7 + $0x1d8] sm:$0xff]  ;;  %7190 = vst [vmem:[#allocation25_spill] sm:$0xff] %v5650_v52  ;;  %7191 = vst [vmem:[#allocation32_spill] sm:$0xff] %v5653_v50  ;;  %v5656_v57 = vld [vmem:[#allocation7 + $0x60] sm:$0xff] }
 0x46a   :  { %7192 = vst [vmem:[#allocation27_spill] sm:$0xff] %v5656_v57 }
 0x46b   :  { %v5520_v1 = vadd.f32 %v1240_v55, %v1239_v56  ;;  %v5662_v56 = vld [vmem:[#allocation7 + $0x48] sm:$0xff]  ;;  %v5665_v55 = vld [vmem:[#allocation7 + $0x58] sm:$0xff] }
 0x46c   :  { %7194 = vst [vmem:[#allocation20_spill] sm:$0xff] %v5662_v56  ;;  %7195 = vst [vmem:[#allocation45_spill] sm:$0xff] %v5665_v55 }
 0x46d   :  { %4352 = vtanh.f32 %v5520_v1 }
 0x47a   :  { %v4353_v6 = vpop.eup %4352 }
 0x47b   :  { %v1243_v23 = vmul.f32 %v4353_v6, %v4351_v14  ;;  %v5668_v14 = vld [vmem:[#allocation7 + $0x40] sm:$0xff]  ;;  %v5671_v6 = vld [vmem:[#allocation7 + $0x50] sm:$0xff] }
 0x47c   :  { %7196 = vst [vmem:[#allocation46_spill] sm:$0xff] %v5668_v14  ;;  %7197 = vst [vmem:[#allocation51_spill] sm:$0xff] %v5671_v6 }
 0x47d   :  { %1309 = vmatmul.mubr.f32.vlgmr.msra.gmra.mxu0 %v1243_v23  ;;  %1380 = vmatmul.mubr.f32.vlgmr.msra.gmra.mxu1 %v1243_v23  ;;  %v2049_v2 = vcombine.low %v1243_v23, %v1243_v23  ;;  %v5674_v23 = vld [vmem:[#allocation7 + $0x28] sm:$0xff] }
 0x47e   :  { %1441 = vmatpush1.msra.mxu0 %v5423_v13  ;;  %1512 = vmatpush1.msra.mxu1 %v5524_v54  ;;  %7198 = vst [vmem:[#allocation34_spill] sm:$0xff] %v5674_v23 }
 0x47f   :  { %1442 = vmatprep.subr.mxu0 %v5427_v4  ;;  %1513 = vmatprep.subr.mxu1 %v5528_v11  ;;  %v2056_v60 = vrot.slane %v2049_v2, %v5214_v0  ;;  %v5677_v2 = vld [vmem:[#allocation7 + $0x38] sm:$0xff] }
 0x480   :  { %1443 = vmatpush1.msra.mxu0 %v5431_v5  ;;  %1514 = vmatpush1.msra.mxu1 %v5533_v63  ;;  %7199 = vst [vmem:[#allocation29_spill] sm:$0xff] %v5677_v2 }
 0x481   :  { %1444 = vmatprep.subr.mxu0 %v5437_v58  ;;  %1515 = vmatprep.subr.mxu1 %v5537_v9  ;;  %v2057_v25 = vcombine.low %v2056_v60, %v2056_v60  ;;  %v5680_v60 = vld [vmem:[#allocation7 + $0x20] sm:$0xff] }
 0x482   :  { %1445 = vmatpush1.msra.mxu0 %v5444_v20  ;;  %1516 = vmatpush1.msra.mxu1 %v5541_v26  ;;  %7200 = vst [vmem:[#allocation36_spill] sm:$0xff] %v5680_v60 }
 0x483   :  { %1446 = vmatprep.subr.mxu0 %v5448_v62  ;;  %1517 = vmatprep.subr.mxu1 %v5545_v27  ;;  %v5550_v28 = vsel %vm2094_vm3, %v5442_v19, %v2057_v25  ;;  %v5566_v19 = vld [vmem:[#allocation7 + $0x148] sm:$0xff]  ;;  %v5683_v25 = vld [vmem:[#allocation7 + $0x30] sm:$0xff] }
 0x484   :  { %7185 = vst [vmem:[#allocation26_spill] sm:$0xff] %v5550_v28  ;;  %1447 = vmatpush1.msra.mxu0 %v5452_v22  ;;  %1518 = vmatpush1.msra.mxu1 %v5553_v29  ;;  %7201 = vst [vmem:[#allocation31_spill] sm:$0xff] %v5683_v25  ;;  %v5686_v28 = vld [vmem:[#allocation7 + $0x8] sm:$0xff] }
 0x485   :  { %1448 = vmatprep.subr.mxu0 %v5456_v24  ;;  %1519 = vmatprep.subr.mxu1 %v5557_v30  ;;  %7202 = vst [vmem:[#allocation38_spill] sm:$0xff] %v5686_v28 }
 0x486   :  { %1449 = vmatpush1.msra.mxu0 %v5560_v31  ;;  %1520 = vmatpush1.msra.mxu1 %v5563_v32 }
 0x487   :  { %1450 = vmatprep.subr.mxu0 %v5566_v19  ;;  %1521 = vmatprep.subr.mxu1 %v5569_v33 }
 0x488   :  { %1451 = vmatpush1.msra.mxu0 %v5572_v34  ;;  %1522 = vmatpush1.msra.mxu1 %v5575_v35 }
 0x489   :  { %1452 = vmatprep.subr.mxu0 %v5578_v36  ;;  %1523 = vmatprep.subr.mxu1 %v5581_v38 }
 0x48a   :  { %1453 = vmatpush1.msra.mxu0 %v5584_v41  ;;  %1524 = vmatpush1.msra.mxu1 %v5587_v42 }
 0x48b   :  { %1454 = vmatprep.subr.mxu0 %v5590_v43  ;;  %1525 = vmatprep.subr.mxu1 %v5593_v44 }
 0x48c   :  { %1455 = vmatpush1.msra.mxu0 %v5596_v45  ;;  %1526 = vmatpush1.msra.mxu1 %v5599_v46 }
 0x48d   :  { %1456 = vmatprep.subr.mxu0 %v5602_v47  ;;  %1527 = vmatprep.subr.mxu1 %v5605_v48 }
 0x48e   :  { %1457 = vmatpush1.msra.mxu0 %v5608_v49  ;;  %1528 = vmatpush1.msra.mxu1 %v5611_v51 }
 0x48f   :  { %1458 = vmatprep.subr.mxu0 %v5614_v53  ;;  %1529 = vmatprep.subr.mxu1 %v5617_v3 }
 0x490   :  { %1459 = vmatpush1.msra.mxu0 %v5620_v59  ;;  %1530 = vmatpush1.msra.mxu1 %v5623_v8 }
 0x491   :  { %1460 = vmatprep.subr.mxu0 %v5626_v10  ;;  %1531 = vmatprep.subr.mxu1 %v5629_v12 }
 0x492   :  { %1461 = vmatpush1.msra.mxu0 %v5632_v15  ;;  %1532 = vmatpush1.msra.mxu1 %v5635_v16 }
 0x493   :  { %1462 = vmatprep.subr.mxu0 %v5638_v17  ;;  %1533 = vmatprep.subr.mxu1 %v5641_v18 }
 0x494   :  { %1463 = vmatpush1.msra.mxu0 %v5644_v21  ;;  %1534 = vmatpush1.msra.mxu1 %v5647_v7 }
 0x495   :  { %1464 = vmatprep.subr.mxu0 %v5650_v52  ;;  %1535 = vmatprep.subr.mxu1 %v5653_v50  ;;  %v7207_v50 = vld [vmem:[#allocation49_spill] sm:$0xff] }
 0x496   :  { %1465 = vmatpush1.msra.mxu0 %v5656_v57  ;;  %1536 = vmatpush1.msra.mxu1 %v5659_v61  ;;  %v7206_v57 = vld [vmem:[#allocation47_spill] sm:$0xff] }
 0x497   :  { %1466 = vmatprep.subr.mxu0 %v5662_v56  ;;  %1537 = vmatprep.subr.mxu1 %v5665_v55 }
 0x498   :  { %1467 = vmatpush1.msra.mxu0 %v5668_v14  ;;  %1538 = vmatpush1.msra.mxu1 %v5671_v6  ;;  %v5689_v6 = vld [vmem:[#allocation7 + $0x18] sm:$0xff] }
 0x499   :  { %1468 = vmatprep.subr.mxu0 %v5674_v23  ;;  %1539 = vmatprep.subr.mxu1 %v5677_v2  ;;  %7203 = vst [vmem:[#allocation33_spill] sm:$0xff] %v5689_v6  ;;  %v5692_v23 = vld [vmem:[#allocation7] sm:$0xff]  ;;  %v5696_v2 = vld [vmem:[#allocation7 + $0x10] sm:$0xff] }
 0x49a   :  { %1469 = vmatpush1.msra.mxu0 %v5680_v60  ;;  %1540 = vmatpush1.msra.mxu1 %v5683_v25  ;;  %7204 = vst [vmem:[#allocation40_spill] sm:$0xff] %v5692_v23  ;;  %7205 = vst [vmem:[#allocation35_spill] sm:$0xff] %v5696_v2 }
 0x49b   :  { %1470 = vmatprep.subr.mxu0 %v5686_v28  ;;  %1541 = vmatprep.subr.mxu1 %v5689_v6 }
 0x49c   :  { %1471 = vmatpush1.msra.mxu0 %v5692_v23  ;;  %1504 = vmatprep.mubr.f32.mxu0 %v7180_v37 }
 0x49d   :  { %1542 = vmatpush1.msra.mxu1 %v5696_v2  ;;  %1575 = vmatprep.mubr.f32.mxu1 %v7180_v37  ;;  %v7208_v2 = vcombine.low %v7206_v57, %v7207_v50 }
 0x49e   :  { %1636 = vmatprep.subr.mxu0 %v5508_v39  ;;  %1707 = vmatprep.subr.mxu1 %v5511_v40 }
 0x53d   :  { %v1310_v28 = vpop.f32.mrf.mxu0  ;;  %v1381_v25 = vpop.f32.mrf.mxu1 }
 0x53f   :  { %v1312_v60 = vpop.f32.mrf.mxu0  ;;  %v1383_v6 = vpop.f32.mrf.mxu1 }
 0x540   :  { %v1390_v14 = vcombine.low %v1310_v28, %v1312_v60  ;;  %v1391_v55 = vcombine.low %v1381_v25, %v1383_v6  ;;  %v7213_v60 = vld [vmem:[#allocation30_spill] sm:$0xff]  ;;  %v7214_v25 = vld [vmem:[#allocation25_spill] sm:$0xff] }
 0x542   :  { %v1398_v23 = vrot.slane %v1390_v14, %v5214_v0  ;;  %v1405_v56 = vrot.slane %v1391_v55, %v5214_v0 }
 0x544   :  { %v1406_v61 = vcombine.low %v1398_v23, %v1405_v56 }
 0x546   :  { %v1408_v52 = vadd.f32 %v1406_v61, %v7208_v2 }
 0x548   :  { %v4187_v37 = vmul.f32 -1.442695, %v1408_v52  ;;  %v1416_v7 = vrot.slane %v1408_v52, 2  ;;  %v1427_v40 = vrot.slane %v1408_v52, 6  ;;  %v1424_v17 = vrot.slane %v1408_v52, 4  ;;  %v7212_v52 = vld [vmem:[#allocation23_spill] sm:$0xff] }
 0x54a   :  { %4354 = vpow2.f32 %v4187_v37  ;;  %v4188_v39 = vmul.f32 -1.442695, %v1416_v7  ;;  %v4189_v21 = vmul.f32 -1.442695, %v1427_v40 }
 0x54c   :  { %4356 = vpow2.f32 %v4188_v39 }
 0x54d   :  { %4358 = vpow2.f32 %v4189_v21 }
 0x557   :  { %v4355_v18 = vpop.eup %4354 }
 0x558   :  { %v1412_v28 = vadd.f32 1.0, %v4355_v18 }
 0x559   :  { %v4357_v6 = vpop.eup %4356 }
 0x55a   :  { %4360 = vrcp.f32 %v1412_v28  ;;  %v1421_v14 = vadd.f32 1.0, %v4357_v6  ;;  %v4359_v56 = vpop.eup %4358  ;;  %v7215_v28 = vld [vmem:[#allocation32_spill] sm:$0xff]  ;;  %v7216_v6 = vld [vmem:[#allocation27_spill] sm:$0xff] }
 0x55b   :  { %4362 = vtanh.f32 %v1424_v17  ;;  %v1432_v2 = vadd.f32 1.0, %v4359_v56  ;;  %v7211_v17 = vld [vmem:[#allocation28_spill] sm:$0xff] }
 0x55c   :  { %4364 = vrcp.f32 %v1421_v14  ;;  %v7217_v14 = vld [vmem:[#allocation19_spill] sm:$0xff]  ;;  %v7218_v56 = vld [vmem:[#allocation20_spill] sm:$0xff] }
 0x55d   :  { %4366 = vrcp.f32 %v1432_v2  ;;  %v7222_v2 = vld [vmem:[#allocation34_spill] sm:$0xff] }
 0x567   :  { %v4361_v55 = vpop.eup %4360 }
 0x568   :  { %v4363_v23 = vpop.eup %4362 }
 0x569   :  { %v4365_v61 = vpop.eup %4364  ;;  %v1436_v7 = vmul.f32 %v4363_v23, %v4361_v55  ;;  %v7219_v55 = vld [vmem:[#allocation45_spill] sm:$0xff]  ;;  %v7220_v23 = vld [vmem:[#allocation46_spill] sm:$0xff] }
 0x56a   :  { %v1435_v37 = vmul.f32 %v4365_v61, %v5520_v1  ;;  %v4367_v40 = vpop.eup %4366  ;;  %v7210_v1 = vld [vmem:[#allocation22_spill] sm:$0xff]  ;;  %v7221_v61 = vld [vmem:[#allocation51_spill] sm:$0xff] }
 0x56c   :  { %v5708_v39 = vadd.f32 %v1436_v7, %v1435_v37  ;;  %v7223_v37 = vld [vmem:[#allocation29_spill] sm:$0xff]  ;;  %v7224_v7 = vld [vmem:[#allocation36_spill] sm:$0xff] }
 0x56e   :  { %4368 = vtanh.f32 %v5708_v39 }
 0x57b   :  { %v4369_v18 = vpop.eup %4368 }
 0x57c   :  { %v5711_v21 = vmul.f32 %v4369_v18, %v4367_v40  ;;  %v7225_v40 = vld [vmem:[#allocation31_spill] sm:$0xff]  ;;  %v7226_v18 = vld [vmem:[#allocation38_spill] sm:$0xff] }
 0x57e   :  { %7209 = vst [vmem:[#allocation41_spill] sm:$0xff] %v5711_v21  ;;  %1505 = vmatmul.mubr.f32.vlgmr.msra.gmra.mxu0 %v5711_v21  ;;  %1576 = vmatmul.mubr.f32.vlgmr.msra.gmra.mxu1 %v5711_v21  ;;  %v7227_v21 = vld [vmem:[#allocation33_spill] sm:$0xff] }
 0x57f   :  { %1637 = vmatpush1.msra.mxu0 %v5423_v13  ;;  %1708 = vmatpush1.msra.mxu1 %v5524_v54 }
 0x580   :  { %1638 = vmatprep.subr.mxu0 %v5427_v4  ;;  %1709 = vmatprep.subr.mxu1 %v5528_v11 }
 0x581   :  { %1639 = vmatpush1.msra.mxu0 %v5431_v5  ;;  %1710 = vmatpush1.msra.mxu1 %v5533_v63 }
 0x582   :  { %1640 = vmatprep.subr.mxu0 %v5437_v58  ;;  %1711 = vmatprep.subr.mxu1 %v5537_v9 }
 0x583   :  { %1641 = vmatpush1.msra.mxu0 %v5444_v20  ;;  %1712 = vmatpush1.msra.mxu1 %v5541_v26 }
 0x584   :  { %1642 = vmatprep.subr.mxu0 %v5448_v62  ;;  %1713 = vmatprep.subr.mxu1 %v5545_v27 }
 0x585   :  { %1643 = vmatpush1.msra.mxu0 %v5452_v22  ;;  %1714 = vmatpush1.msra.mxu1 %v5553_v29 }
 0x586   :  { %1644 = vmatprep.subr.mxu0 %v5456_v24  ;;  %1715 = vmatprep.subr.mxu1 %v5557_v30 }
 0x587   :  { %1645 = vmatpush1.msra.mxu0 %v5560_v31  ;;  %1716 = vmatpush1.msra.mxu1 %v5563_v32 }
 0x588   :  { %1646 = vmatprep.subr.mxu0 %v5566_v19  ;;  %1717 = vmatprep.subr.mxu1 %v5569_v33 }
 0x589   :  { %1647 = vmatpush1.msra.mxu0 %v5572_v34  ;;  %1718 = vmatpush1.msra.mxu1 %v5575_v35 }
 0x58a   :  { %1648 = vmatprep.subr.mxu0 %v5578_v36  ;;  %1719 = vmatprep.subr.mxu1 %v5581_v38 }
 0x58b   :  { %1649 = vmatpush1.msra.mxu0 %v5584_v41  ;;  %1720 = vmatpush1.msra.mxu1 %v5587_v42 }
 0x58c   :  { %1650 = vmatprep.subr.mxu0 %v5590_v43  ;;  %1721 = vmatprep.subr.mxu1 %v5593_v44 }
 0x58d   :  { %1651 = vmatpush1.msra.mxu0 %v5596_v45  ;;  %1722 = vmatpush1.msra.mxu1 %v5599_v46 }
 0x58e   :  { %1652 = vmatprep.subr.mxu0 %v5602_v47  ;;  %1723 = vmatprep.subr.mxu1 %v5605_v48 }
 0x58f   :  { %1653 = vmatpush1.msra.mxu0 %v5608_v49  ;;  %1724 = vmatpush1.msra.mxu1 %v5611_v51 }
 0x590   :  { %1654 = vmatprep.subr.mxu0 %v5614_v53  ;;  %1725 = vmatprep.subr.mxu1 %v5617_v3 }
 0x591   :  { %1655 = vmatpush1.msra.mxu0 %v5620_v59  ;;  %1726 = vmatpush1.msra.mxu1 %v5623_v8 }
 0x592   :  { %1656 = vmatprep.subr.mxu0 %v5626_v10  ;;  %1727 = vmatprep.subr.mxu1 %v5629_v12 }
 0x593   :  { %1657 = vmatpush1.msra.mxu0 %v5632_v15  ;;  %1728 = vmatpush1.msra.mxu1 %v5635_v16 }
 0x594   :  { %1658 = vmatprep.subr.mxu0 %v7210_v1  ;;  %1729 = vmatprep.subr.mxu1 %v7211_v17 }
 0x595   :  { %1659 = vmatpush1.msra.mxu0 %v7212_v52  ;;  %1730 = vmatpush1.msra.mxu1 %v7213_v60 }
 0x596   :  { %1660 = vmatprep.subr.mxu0 %v7214_v25  ;;  %1731 = vmatprep.subr.mxu1 %v7215_v28 }
 0x597   :  { %1661 = vmatpush1.msra.mxu0 %v7216_v6  ;;  %1732 = vmatpush1.msra.mxu1 %v7217_v14  ;;  %v7228_v14 = vld [vmem:[#allocation40_spill] sm:$0xff] }
 0x598   :  { %1662 = vmatprep.subr.mxu0 %v7218_v56  ;;  %1733 = vmatprep.subr.mxu1 %v7219_v55  ;;  %v7229_v56 = vmov 0.0   ;;  %v7230_v55 = vld [vmem:[#allocation35_spill] sm:$0xff] }
 0x599   :  { %1663 = vmatpush1.msra.mxu0 %v7220_v23  ;;  %1734 = vmatpush1.msra.mxu1 %v7221_v61  ;;  %v7231_v61 = vld [vmem:[#allocation24_spill] sm:$0xff] }
 0x59a   :  { %1664 = vmatprep.subr.mxu0 %v7222_v2  ;;  %1735 = vmatprep.subr.mxu1 %v7223_v37  ;;  %v7232_v2 = vld [vmem:[#allocation21_spill] sm:$0xff] }
 0x59b   :  { %1665 = vmatpush1.msra.mxu0 %v7224_v7  ;;  %1736 = vmatpush1.msra.mxu1 %v7225_v40 }
 0x59c   :  { %1666 = vmatprep.subr.mxu0 %v7226_v18  ;;  %1737 = vmatprep.subr.mxu1 %v7227_v21 }
 0x59d   :  { %1667 = vmatpush1.msra.mxu0 %v7228_v14  ;;  %1700 = vmatprep.mubr.f32.mxu0 %v7229_v56 }
 0x59e   :  { %1738 = vmatpush1.msra.mxu1 %v7230_v55  ;;  %1771 = vmatprep.mubr.f32.mxu1 %v7229_v56  ;;  %v7233_v55 = vcombine.high %v7206_v57, %v7207_v50 }
 0x59f   :  { %1832 = vmatprep.subr.mxu0 %v7231_v61  ;;  %1903 = vmatprep.subr.mxu1 %v7232_v2 }
 0x63e   :  { %v1506_v37 = vpop.f32.mrf.mxu0  ;;  %v1577_v7 = vpop.f32.mrf.mxu1 }
 0x640   :  { %v1508_v23 = vpop.f32.mrf.mxu0  ;;  %v1579_v40 = vpop.f32.mrf.mxu1 }
 0x641   :  { %v1586_v6 = vcombine.low %v1506_v37, %v1508_v23  ;;  %v1587_v18 = vcombine.low %v1577_v7, %v1579_v40 }
 0x643   :  { %v1594_v21 = vrot.slane %v1586_v6, %v5214_v0  ;;  %v1601_v14 = vrot.slane %v1587_v18, %v5214_v0 }
 0x645   :  { %v1602_v28 = vcombine.low %v1594_v21, %v1601_v14 }
 0x647   :  { %v1604_v25 = vadd.f32 %v1602_v28, %v7233_v55 }
 0x649   :  { %v4190_v56 = vmul.f32 -1.442695, %v1604_v25  ;;  %v1612_v60 = vrot.slane %v1604_v25, 2  ;;  %v1623_v2 = vrot.slane %v1604_v25, 6  ;;  %v1620_v1 = vrot.slane %v1604_v25, 4 }
 0x64b   :  { %4370 = vpow2.f32 %v4190_v56  ;;  %v4191_v61 = vmul.f32 -1.442695, %v1612_v60  ;;  %v4192_v52 = vmul.f32 -1.442695, %v1623_v2 }
 0x64d   :  { %4372 = vpow2.f32 %v4191_v61 }
 0x64e   :  { %4374 = vpow2.f32 %v4192_v52 }
 0x658   :  { %v4371_v17 = vpop.eup %4370 }
 0x659   :  { %v1608_v23 = vadd.f32 1.0, %v4371_v17 }
 0x65a   :  { %v4373_v37 = vpop.eup %4372 }
 0x65b   :  { %4376 = vrcp.f32 %v1608_v23  ;;  %v1617_v6 = vadd.f32 1.0, %v4373_v37  ;;  %v4375_v21 = vpop.eup %4374 }
 0x65c   :  { %4378 = vtanh.f32 %v1620_v1  ;;  %v1628_v28 = vadd.f32 1.0, %v4375_v21 }
 0x65d   :  { %4380 = vrcp.f32 %v1617_v6 }
 0x65e   :  { %4382 = vrcp.f32 %v1628_v28 }
 0x668   :  { %v4377_v14 = vpop.eup %4376 }
 0x669   :  { %v4379_v50 = vpop.eup %4378 }
 0x66a   :  { %v4381_v57 = vpop.eup %4380  ;;  %v1632_v60 = vmul.f32 %v4379_v50, %v4377_v14 }
 0x66b   :  { %v1631_v56 = vmul.f32 %v4381_v57, %v5708_v39  ;;  %v4383_v17 = vpop.eup %4382 }
 0x66d   :  { %v5787_v55 = vadd.f32 %v1632_v60, %v1631_v56  ;;  %v2159_v60 = vld [vmem:[#allocation8 + $0x1e0] sm:$0xff] }
 0x66f   :  { %4384 = vtanh.f32 %v5787_v55 }
 0x67c   :  { %v4385_v25 = vpop.eup %4384 }
 0x67d   :  { %v5790_v52 = vmul.f32 %v4385_v25, %v4383_v17  ;;  %v2161_v17 = vld [vmem:[#allocation8 + $0x1f0] sm:$0xff]  ;;  %v2156_v25 = vld [vmem:[#allocation8 + $0x1c8] sm:$0xff] }
 0x67f   :  { %1701 = vmatmul.mubr.f32.vlgmr.msra.gmra.mxu0 %v5790_v52  ;;  %1772 = vmatmul.mubr.f32.vlgmr.msra.gmra.mxu1 %v5790_v52  ;;  %v2060_v50 = vcombine.low %v5790_v52, %v5790_v52  ;;  %v2151_v52 = vld [vmem:[#allocation8 + $0x1a0] sm:$0xff] }
 0x680   :  { %1833 = vmatpush1.msra.mxu0 %v5423_v13  ;;  %1904 = vmatpush1.msra.mxu1 %v5524_v54  ;;  %v7234_v13 = vld [vmem:[#allocation22_spill] sm:$0xff]  ;;  %v7242_v54 = vld [vmem:[#allocation20_spill] sm:$0xff] }
 0x681   :  { %1834 = vmatprep.subr.mxu0 %v5427_v4  ;;  %1905 = vmatprep.subr.mxu1 %v5528_v11  ;;  %v7235_v4 = vld [vmem:[#allocation28_spill] sm:$0xff]  ;;  %v7243_v11 = vld [vmem:[#allocation45_spill] sm:$0xff] }
 0x682   :  { %1835 = vmatpush1.msra.mxu0 %v5431_v5  ;;  %1906 = vmatpush1.msra.mxu1 %v5533_v63  ;;  %v7236_v5 = vld [vmem:[#allocation23_spill] sm:$0xff]  ;;  %v7244_v63 = vld [vmem:[#allocation46_spill] sm:$0xff] }
 0x683   :  { %1836 = vmatprep.subr.mxu0 %v5437_v58  ;;  %1907 = vmatprep.subr.mxu1 %v5537_v9  ;;  %v7237_v58 = vld [vmem:[#allocation30_spill] sm:$0xff]  ;;  %v7245_v9 = vld [vmem:[#allocation51_spill] sm:$0xff] }
 0x684   :  { %1837 = vmatpush1.msra.mxu0 %v5444_v20  ;;  %1908 = vmatpush1.msra.mxu1 %v5541_v26  ;;  %v7238_v20 = vld [vmem:[#allocation25_spill] sm:$0xff]  ;;  %v7246_v26 = vld [vmem:[#allocation34_spill] sm:$0xff] }
 0x685   :  { %1838 = vmatprep.subr.mxu0 %v5448_v62  ;;  %1909 = vmatprep.subr.mxu1 %v5545_v27  ;;  %v7239_v62 = vld [vmem:[#allocation32_spill] sm:$0xff]  ;;  %v7247_v27 = vld [vmem:[#allocation29_spill] sm:$0xff] }
 0x686   :  { %1839 = vmatpush1.msra.mxu0 %v5452_v22  ;;  %1910 = vmatpush1.msra.mxu1 %v5553_v29  ;;  %v7240_v22 = vld [vmem:[#allocation27_spill] sm:$0xff]  ;;  %v7248_v29 = vld [vmem:[#allocation36_spill] sm:$0xff] }
 0x687   :  { %1840 = vmatprep.subr.mxu0 %v5456_v24  ;;  %1911 = vmatprep.subr.mxu1 %v5557_v30  ;;  %v7241_v24 = vld [vmem:[#allocation19_spill] sm:$0xff] }
 0x688   :  { %1841 = vmatpush1.msra.mxu0 %v5560_v31  ;;  %1912 = vmatpush1.msra.mxu1 %v5563_v32  ;;  %v7249_v30 = vld [vmem:[#allocation31_spill] sm:$0xff]  ;;  %v7250_v31 = vld [vmem:[#allocation38_spill] sm:$0xff]  ;;  %v7251_v32 = vld [vmem:[#allocation33_spill] sm:$0xff] }
 0x689   :  { %1842 = vmatprep.subr.mxu0 %v5566_v19  ;;  %1913 = vmatprep.subr.mxu1 %v5569_v33  ;;  %v7252_v19 = vld [vmem:[#allocation40_spill] sm:$0xff]  ;;  %v7253_v33 = vld [vmem:[#allocation35_spill] sm:$0xff] }
 0x68a   :  { %1843 = vmatpush1.msra.mxu0 %v5572_v34  ;;  %1914 = vmatpush1.msra.mxu1 %v5575_v35  ;;  %v7254_v34 = vmov 0.0   ;;  %v2160_v35 = vld [vmem:[#allocation8 + $0x1e8] sm:$0xff] }
 0x68b   :  { %1844 = vmatprep.subr.mxu0 %v5578_v36  ;;  %1915 = vmatprep.subr.mxu1 %v5581_v38  ;;  %v2162_v36 = vld [vmem:[#allocation8 + $0x1f8] sm:$0xff] }
 0x68c   :  { %1845 = vmatpush1.msra.mxu0 %v5584_v41  ;;  %1916 = vmatpush1.msra.mxu1 %v5587_v42 }
 0x68d   :  { %1846 = vmatprep.subr.mxu0 %v5590_v43  ;;  %1917 = vmatprep.subr.mxu1 %v5593_v44 }
 0x68e   :  { %1847 = vmatpush1.msra.mxu0 %v5596_v45  ;;  %1918 = vmatpush1.msra.mxu1 %v5599_v46 }
 0x68f   :  { %1848 = vmatprep.subr.mxu0 %v5602_v47  ;;  %1919 = vmatprep.subr.mxu1 %v5605_v48 }
 0x690   :  { %1849 = vmatpush1.msra.mxu0 %v5608_v49  ;;  %1920 = vmatpush1.msra.mxu1 %v5611_v51  ;;  %v7255_v49 = vld [vmem:[#allocation48_spill] sm:$0xff]  ;;  %v7256_v51 = vld [vmem:[#allocation50_spill] sm:$0xff] }
 0x691   :  { %1850 = vmatprep.subr.mxu0 %v5614_v53  ;;  %1921 = vmatprep.subr.mxu1 %v5617_v3  ;;  %v7257_v53 = vcombine.low %v7255_v49, %v7256_v51 }
 0x692   :  { %1851 = vmatpush1.msra.mxu0 %v5620_v59  ;;  %1922 = vmatpush1.msra.mxu1 %v5623_v8 }
 0x693   :  { %1852 = vmatprep.subr.mxu0 %v5626_v10  ;;  %1923 = vmatprep.subr.mxu1 %v5629_v12 }
 0x694   :  { %1853 = vmatpush1.msra.mxu0 %v5632_v15  ;;  %1924 = vmatpush1.msra.mxu1 %v5635_v16 }
 0x695   :  { %1854 = vmatprep.subr.mxu0 %v7234_v13  ;;  %1925 = vmatprep.subr.mxu1 %v7235_v4  ;;  %v2158_v13 = vld [vmem:[#allocation8 + $0x1d8] sm:$0xff]  ;;  %v2067_v4 = vrot.slane %v2060_v50, %v5214_v0  ;;  %v2113_v50 = vld [vmem:[#allocation8 + $0x70] sm:$0xff] }
 0x696   :  { %1855 = vmatpush1.msra.mxu0 %v7236_v5  ;;  %1926 = vmatpush1.msra.mxu1 %v7237_v58  ;;  %v2157_v5 = vld [vmem:[#allocation8 + $0x1d0] sm:$0xff] }
 0x697   :  { %1856 = vmatprep.subr.mxu0 %v7238_v20  ;;  %1927 = vmatprep.subr.mxu1 %v7239_v62  ;;  %v2152_v20 = vld [vmem:[#allocation8 + $0x1a8] sm:$0xff]  ;;  %v2154_v62 = vld [vmem:[#allocation8 + $0x1b8] sm:$0xff] }
 0x698   :  { %1857 = vmatpush1.msra.mxu0 %v7240_v22  ;;  %1928 = vmatpush1.msra.mxu1 %v7241_v24  ;;  %v2153_v22 = vld [vmem:[#allocation8 + $0x1b0] sm:$0xff] }
 0x699   :  { %1858 = vmatprep.subr.mxu0 %v7242_v54  ;;  %1929 = vmatprep.subr.mxu1 %v7243_v11  ;;  %v2148_v54 = vld [vmem:[#allocation8 + $0x188] sm:$0xff]  ;;  %v2150_v11 = vld [vmem:[#allocation8 + $0x198] sm:$0xff] }
 0x69a   :  { %1859 = vmatpush1.msra.mxu0 %v7244_v63  ;;  %1930 = vmatpush1.msra.mxu1 %v7245_v9  ;;  %v7258_v63 = vld [vmem:[#allocation41_spill] sm:$0xff] }
 0x69b   :  { %1860 = vmatprep.subr.mxu0 %v7246_v26  ;;  %1931 = vmatprep.subr.mxu1 %v7247_v27  ;;  %v2096_v9 = vsel %vm2090_vm1, %v7258_v63, %v2067_v4  ;;  %v2147_v26 = vld [vmem:[#allocation8 + $0x180] sm:$0xff]  ;;  %v2149_v27 = vld [vmem:[#allocation8 + $0x190] sm:$0xff]  ;;  %v5894_v63 = vld [vmem:[#allocation10 + $0x1d8] sm:$0xff] }
 0x69c   :  { %1861 = vmatpush1.msra.mxu0 %v7248_v29  ;;  %1932 = vmatpush1.msra.mxu1 %v7249_v30  ;;  %v2144_v30 = vld [vmem:[#allocation8 + $0x168] sm:$0xff]  ;;  %v2105_v4 = vld [vmem:[#allocation8 + $0x30] sm:$0xff] }
 0x69d   :  { %1862 = vmatprep.subr.mxu0 %v7250_v31  ;;  %1933 = vmatprep.subr.mxu1 %v7251_v32  ;;  %v2146_v31 = vld [vmem:[#allocation8 + $0x178] sm:$0xff]  ;;  %v2143_v32 = vld [vmem:[#allocation8 + $0x160] sm:$0xff] }
 0x69e   :  { %1863 = vmatpush1.msra.mxu0 %v7252_v19  ;;  %1934 = vmatpush1.msra.mxu1 %v7253_v33  ;;  %v2145_v19 = vld [vmem:[#allocation8 + $0x170] sm:$0xff]  ;;  %v2140_v33 = vld [vmem:[#allocation8 + $0x148] sm:$0xff] }
 0x69f   :  { %1896 = vmatprep.mubr.f32.mxu0 %v7254_v34  ;;  %1967 = vmatprep.mubr.f32.mxu1 %v7254_v34 }
 0x6a0   :  { %2249 = vmatprep.subr.mxu0 %v2160_v35  ;;  %2326 = vmatprep.subr.mxu1 %v2162_v36  ;;  %v2142_v35 = vld [vmem:[#allocation8 + $0x158] sm:$0xff]  ;;  %v2139_v36 = vld [vmem:[#allocation8 + $0x140] sm:$0xff] }
 0x73f   :  { %v1702_v38 = vpop.f32.mrf.mxu0  ;;  %v1773_v41 = vpop.f32.mrf.mxu1 }
 0x741   :  { %v1704_v42 = vpop.f32.mrf.mxu0  ;;  %v1775_v43 = vpop.f32.mrf.mxu1 }
 0x742   :  { %v1782_v44 = vcombine.low %v1702_v38, %v1704_v42  ;;  %v1783_v45 = vcombine.low %v1773_v41, %v1775_v43  ;;  %v2141_v38 = vld [vmem:[#allocation8 + $0x150] sm:$0xff]  ;;  %v2136_v41 = vld [vmem:[#allocation8 + $0x128] sm:$0xff]  ;;  %v2138_v42 = vld [vmem:[#allocation8 + $0x138] sm:$0xff] }
 0x743   :  { %v2135_v43 = vld [vmem:[#allocation8 + $0x120] sm:$0xff] }
 0x744   :  { %v1790_v46 = vrot.slane %v1782_v44, %v5214_v0  ;;  %v1797_v47 = vrot.slane %v1783_v45, %v5214_v0  ;;  %v2137_v44 = vld [vmem:[#allocation8 + $0x130] sm:$0xff]  ;;  %v2132_v45 = vld [vmem:[#allocation8 + $0x108] sm:$0xff] }
 0x746   :  { %v1798_v48 = vcombine.low %v1790_v46, %v1797_v47  ;;  %v2134_v46 = vld [vmem:[#allocation8 + $0x118] sm:$0xff]  ;;  %v2131_v47 = vld [vmem:[#allocation8 + $0x100] sm:$0xff] }
 0x748   :  { %v1800_v3 = vadd.f32 %v1798_v48, %v7257_v53  ;;  %v2133_v48 = vld [vmem:[#allocation8 + $0x110] sm:$0xff]  ;;  %v2128_v53 = vld [vmem:[#allocation8 + $0xe8] sm:$0xff] }
 0x74a   :  { %v4193_v59 = vmul.f32 -1.442695, %v1800_v3  ;;  %v1808_v8 = vrot.slane %v1800_v3, 2  ;;  %v1819_v12 = vrot.slane %v1800_v3, 6  ;;  %v1816_v39 = vrot.slane %v1800_v3, 4  ;;  %v2130_v3 = vld [vmem:[#allocation8 + $0xf8] sm:$0xff] }
 0x74c   :  { %4386 = vpow2.f32 %v4193_v59  ;;  %v4194_v10 = vmul.f32 -1.442695, %v1808_v8  ;;  %v4195_v15 = vmul.f32 -1.442695, %v1819_v12  ;;  %v2127_v59 = vld [vmem:[#allocation8 + $0xe0] sm:$0xff]  ;;  %v2129_v8 = vld [vmem:[#allocation8 + $0xf0] sm:$0xff] }
 0x74d   :  { %v2126_v12 = vld [vmem:[#allocation8 + $0xd8] sm:$0xff] }
 0x74e   :  { %4388 = vpow2.f32 %v4194_v10  ;;  %v2124_v10 = vld [vmem:[#allocation8 + $0xc8] sm:$0xff] }
 0x74f   :  { %4390 = vpow2.f32 %v4195_v15  ;;  %v2123_v15 = vld [vmem:[#allocation8 + $0xc0] sm:$0xff] }
 0x759   :  { %v4387_v16 = vpop.eup %4386 }
 0x75a   :  { %v1804_v1 = vadd.f32 1.0, %v4387_v16  ;;  %v2125_v16 = vld [vmem:[#allocation8 + $0xd0] sm:$0xff] }
 0x75b   :  { %v4389_v7 = vpop.eup %4388 }
 0x75c   :  { %4392 = vrcp.f32 %v1804_v1  ;;  %v1813_v40 = vadd.f32 1.0, %v4389_v7  ;;  %v4391_v18 = vpop.eup %4390  ;;  %v2122_v1 = vld [vmem:[#allocation8 + $0xb8] sm:$0xff]  ;;  %v2119_v7 = vld [vmem:[#allocation8 + $0xa0] sm:$0xff] }
 0x75d   :  { %4394 = vtanh.f32 %v1816_v39  ;;  %v1824_v37 = vadd.f32 1.0, %v4391_v18  ;;  %v2120_v39 = vld [vmem:[#allocation8 + $0xa8] sm:$0xff] }
 0x75e   :  { %4396 = vrcp.f32 %v1813_v40  ;;  %v2121_v40 = vld [vmem:[#allocation8 + $0xb0] sm:$0xff]  ;;  %v2116_v18 = vld [vmem:[#allocation8 + $0x88] sm:$0xff] }
 0x75f   :  { %4398 = vrcp.f32 %v1824_v37  ;;  %v2112_v37 = vld [vmem:[#allocation8 + $0x68] sm:$0xff] }
 0x769   :  { %v4393_v61 = vpop.eup %4392 }
 0x76a   :  { %v4395_v2 = vpop.eup %4394 }
 0x76b   :  { %v4397_v23 = vpop.eup %4396  ;;  %v1828_v21 = vmul.f32 %v4395_v2, %v4393_v61  ;;  %v2118_v61 = vld [vmem:[#allocation8 + $0x98] sm:$0xff]  ;;  %v2115_v2 = vld [vmem:[#allocation8 + $0x80] sm:$0xff] }
 0x76c   :  { %v1827_v6 = vmul.f32 %v4397_v23, %v5787_v55  ;;  %v4399_v57 = vpop.eup %4398  ;;  %v2155_v55 = vld [vmem:[#allocation8 + $0x1c0] sm:$0xff]  ;;  %v2117_v23 = vld [vmem:[#allocation8 + $0x90] sm:$0xff] }
 0x76e   :  { %v5864_v14 = vadd.f32 %v1828_v21, %v1827_v6  ;;  %v2114_v6 = vld [vmem:[#allocation8 + $0x78] sm:$0xff]  ;;  %v2111_v21 = vld [vmem:[#allocation8 + $0x60] sm:$0xff] }
 0x770   :  { %4400 = vtanh.f32 %v5864_v14 }
 0x77d   :  { %v4401_v28 = vpop.eup %4400 }
 0x77e   :  { %v1831_v56 = vmul.f32 %v4401_v28, %v4399_v57  ;;  %v2108_v57 = vld [vmem:[#allocation8 + $0x48] sm:$0xff]  ;;  %v2110_v28 = vld [vmem:[#allocation8 + $0x58] sm:$0xff] }
 0x780   :  { %1897 = vmatmul.mubr.f32.vlgmr.msra.gmra.mxu0 %v1831_v56  ;;  %1968 = vmatmul.mubr.f32.vlgmr.msra.gmra.mxu1 %v1831_v56  ;;  %v2076_v58 = vrot.slane %v1831_v56, %v5214_v0  ;;  %v2107_v56 = vld [vmem:[#allocation8 + $0x40] sm:$0xff] }
 0x781   :  { %2250 = vmatpush1.msra.mxu0 %v2159_v60  ;;  %2327 = vmatpush1.msra.mxu1 %v2161_v17  ;;  %v2109_v60 = vld [vmem:[#allocation8 + $0x50] sm:$0xff]  ;;  %v2104_v17 = vld [vmem:[#allocation8 + $0x28] sm:$0xff] }
 0x782   :  { %2251 = vmatprep.subr.mxu0 %v2156_v25  ;;  %2328 = vmatprep.subr.mxu1 %v2158_v13  ;;  %v2077_v24 = vcombine.low %v2076_v58, %v2076_v58  ;;  %v2106_v25 = vld [vmem:[#allocation8 + $0x38] sm:$0xff]  ;;  %v2103_v13 = vld [vmem:[#allocation8 + $0x20] sm:$0xff] }
 0x783   :  { %2252 = vmatpush1.msra.mxu0 %v2155_v55  ;;  %2329 = vmatpush1.msra.mxu1 %v2157_v5  ;;  %v2100_v55 = vld [vmem:[#allocation8 + $0x8] sm:$0xff]  ;;  %v2102_v5 = vld [vmem:[#allocation8 + $0x18] sm:$0xff]  ;;  %v2099_v58 = vld [vmem:[#allocation8] sm:$0xff] }
 0x784   :  { %2253 = vmatprep.subr.mxu0 %v2152_v20  ;;  %2330 = vmatprep.subr.mxu1 %v2154_v62  ;;  %v5874_v29 = vsel %vm2092_vm2, %v2096_v9, %v2077_v24  ;;  %v2101_v20 = vld [vmem:[#allocation8 + $0x10] sm:$0xff]  ;;  %v7259_v62 = vld [vmem:[#allocation26_spill] sm:$0xff] }
 0x785   :  { %2254 = vmatpush1.msra.mxu0 %v2151_v52  ;;  %2331 = vmatpush1.msra.mxu1 %v2153_v22  ;;  %v5882_v52 = vld [vmem:[#allocation10 + $0x1e8] sm:$0xff]  ;;  %v5884_v22 = vld [vmem:[#allocation10 + $0x1f8] sm:$0xff]  ;;  %v5886_v24 = vld [vmem:[#allocation10 + $0x1e0] sm:$0xff] }
 0x786   :  { %2255 = vmatprep.subr.mxu0 %v2148_v54  ;;  %2332 = vmatprep.subr.mxu1 %v2150_v11  ;;  %7260 = vst [vmem:[#allocation37_spill] sm:$0xff] %v5882_v52  ;;  %7261 = vst [vmem:[#allocation42_spill] sm:$0xff] %v5884_v22  ;;  %v5890_v54 = vld [vmem:[#allocation10 + $0x1f0] sm:$0xff]  ;;  %v5892_v11 = vld [vmem:[#allocation10 + $0x1c8] sm:$0xff] }
 0x787   :  { %2256 = vmatpush1.msra.mxu0 %v2147_v26  ;;  %2333 = vmatpush1.msra.mxu1 %v2149_v27  ;;  %v5898_v9 = vld [vmem:[#allocation10 + $0x1c0] sm:$0xff]  ;;  %v5900_v26 = vld [vmem:[#allocation10 + $0x1d0] sm:$0xff]  ;;  %v5902_v27 = vld [vmem:[#allocation10 + $0x1a8] sm:$0xff] }
 0x788   :  { %2257 = vmatprep.subr.mxu0 %v2144_v30  ;;  %2334 = vmatprep.subr.mxu1 %v2146_v31  ;;  %v5906_v30 = vld [vmem:[#allocation10 + $0x1b8] sm:$0xff]  ;;  %v5908_v31 = vld [vmem:[#allocation10 + $0x1a0] sm:$0xff] }
 0x789   :  { %2258 = vmatpush1.msra.mxu0 %v2143_v32  ;;  %2335 = vmatpush1.msra.mxu1 %v2145_v19  ;;  %v5910_v32 = vld [vmem:[#allocation10 + $0x1b0] sm:$0xff]  ;;  %v5914_v19 = vld [vmem:[#allocation10 + $0x188] sm:$0xff] }
 0x78a   :  { %2259 = vmatprep.subr.mxu0 %v2140_v33  ;;  %2336 = vmatprep.subr.mxu1 %v2142_v35  ;;  %v5916_v33 = vld [vmem:[#allocation10 + $0x198] sm:$0xff]  ;;  %v5920_v35 = vld [vmem:[#allocation10 + $0x180] sm:$0xff] }
 0x78b   :  { %2260 = vmatpush1.msra.mxu0 %v2139_v36  ;;  %2337 = vmatpush1.msra.mxu1 %v2141_v38  ;;  %v5922_v36 = vld [vmem:[#allocation10 + $0x190] sm:$0xff]  ;;  %v5926_v38 = vld [vmem:[#allocation10 + $0x168] sm:$0xff] }
 0x78c   :  { %2261 = vmatprep.subr.mxu0 %v2136_v41  ;;  %2338 = vmatprep.subr.mxu1 %v2138_v42  ;;  %v5928_v41 = vld [vmem:[#allocation10 + $0x178] sm:$0xff]  ;;  %v5932_v42 = vld [vmem:[#allocation10 + $0x160] sm:$0xff] }
 0x78d   :  { %2262 = vmatpush1.msra.mxu0 %v2135_v43  ;;  %2339 = vmatpush1.msra.mxu1 %v2137_v44  ;;  %v5934_v43 = vld [vmem:[#allocation10 + $0x170] sm:$0xff]  ;;  %v5938_v44 = vld [vmem:[#allocation10 + $0x148] sm:$0xff] }
 0x78e   :  { %2263 = vmatprep.subr.mxu0 %v2132_v45  ;;  %2340 = vmatprep.subr.mxu1 %v2134_v46  ;;  %v5940_v45 = vld [vmem:[#allocation10 + $0x158] sm:$0xff]  ;;  %v5944_v46 = vld [vmem:[#allocation10 + $0x140] sm:$0xff] }
 0x78f   :  { %2264 = vmatpush1.msra.mxu0 %v2131_v47  ;;  %2341 = vmatpush1.msra.mxu1 %v2133_v48  ;;  %v5946_v47 = vld [vmem:[#allocation10 + $0x150] sm:$0xff]  ;;  %v5950_v48 = vld [vmem:[#allocation10 + $0x128] sm:$0xff] }
 0x790   :  { %2265 = vmatprep.subr.mxu0 %v2128_v53  ;;  %2342 = vmatprep.subr.mxu1 %v2130_v3  ;;  %v5952_v53 = vld [vmem:[#allocation10 + $0x138] sm:$0xff]  ;;  %v5956_v3 = vld [vmem:[#allocation10 + $0x120] sm:$0xff] }
 0x791   :  { %2266 = vmatpush1.msra.mxu0 %v2127_v59  ;;  %2343 = vmatpush1.msra.mxu1 %v2129_v8  ;;  %v5958_v59 = vld [vmem:[#allocation10 + $0x130] sm:$0xff]  ;;  %v5962_v8 = vld [vmem:[#allocation10 + $0x108] sm:$0xff] }
 0x792   :  { %2267 = vmatprep.subr.mxu0 %v2124_v10  ;;  %2344 = vmatprep.subr.mxu1 %v2126_v12  ;;  %v5964_v10 = vld [vmem:[#allocation10 + $0x118] sm:$0xff]  ;;  %v5968_v12 = vld [vmem:[#allocation10 + $0x100] sm:$0xff] }
 0x793   :  { %2268 = vmatpush1.msra.mxu0 %v2123_v15  ;;  %2345 = vmatpush1.msra.mxu1 %v2125_v16  ;;  %v5970_v15 = vld [vmem:[#allocation10 + $0x110] sm:$0xff]  ;;  %v5974_v16 = vld [vmem:[#allocation10 + $0xe8] sm:$0xff] }
 0x794   :  { %2269 = vmatprep.subr.mxu0 %v2120_v39  ;;  %2346 = vmatprep.subr.mxu1 %v2122_v1  ;;  %v5976_v39 = vld [vmem:[#allocation10 + $0xf8] sm:$0xff]  ;;  %v5980_v1 = vld [vmem:[#allocation10 + $0xe0] sm:$0xff] }
 0x795   :  { %2270 = vmatpush1.msra.mxu0 %v2119_v7  ;;  %2347 = vmatpush1.msra.mxu1 %v2121_v40  ;;  %v5982_v7 = vld [vmem:[#allocation10 + $0xf0] sm:$0xff]  ;;  %v5986_v40 = vld [vmem:[#allocation10 + $0xc8] sm:$0xff] }
 0x796   :  { %2271 = vmatprep.subr.mxu0 %v2116_v18  ;;  %2348 = vmatprep.subr.mxu1 %v2118_v61  ;;  %v5988_v18 = vld [vmem:[#allocation10 + $0xd8] sm:$0xff]  ;;  %v5992_v61 = vld [vmem:[#allocation10 + $0xc0] sm:$0xff] }
 0x797   :  { %2272 = vmatpush1.msra.mxu0 %v2115_v2  ;;  %2349 = vmatpush1.msra.mxu1 %v2117_v23  ;;  %v5994_v2 = vld [vmem:[#allocation10 + $0xd0] sm:$0xff]  ;;  %v5998_v23 = vld [vmem:[#allocation10 + $0xa8] sm:$0xff] }
 0x798   :  { %2273 = vmatprep.subr.mxu0 %v2112_v37  ;;  %2350 = vmatprep.subr.mxu1 %v2114_v6  ;;  %v6000_v37 = vld [vmem:[#allocation10 + $0xb8] sm:$0xff]  ;;  %v6004_v6 = vld [vmem:[#allocation10 + $0xa0] sm:$0xff] }
 0x799   :  { %2274 = vmatpush1.msra.mxu0 %v2111_v21  ;;  %2351 = vmatpush1.msra.mxu1 %v2113_v50  ;;  %7262 = vst [vmem:[#allocation39_spill] sm:$0xff] %v6004_v6  ;;  %v6006_v21 = vld [vmem:[#allocation10 + $0xb0] sm:$0xff]  ;;  %v6010_v50 = vld [vmem:[#allocation10 + $0x88] sm:$0xff] }
 0x79a   :  { %2275 = vmatprep.subr.mxu0 %v2108_v57  ;;  %2352 = vmatprep.subr.mxu1 %v2110_v28  ;;  %7263 = vst [vmem:[#allocation43_spill] sm:$0xff] %v6006_v21  ;;  %7264 = vst [vmem:[#allocation47_spill] sm:$0xff] %v6010_v50  ;;  %v6012_v57 = vld [vmem:[#allocation10 + $0x98] sm:$0xff]  ;;  %v6016_v28 = vld [vmem:[#allocation10 + $0x80] sm:$0xff] }
 0x79b   :  { %2276 = vmatpush1.msra.mxu0 %v2107_v56  ;;  %2353 = vmatpush1.msra.mxu1 %v2109_v60  ;;  %7265 = vst [vmem:[#allocation49_spill] sm:$0xff] %v6012_v57  ;;  %7266 = vst [vmem:[#allocation24_spill] sm:$0xff] %v6016_v28  ;;  %v6018_v56 = vld [vmem:[#allocation10 + $0x90] sm:$0xff]  ;;  %v6022_v60 = vld [vmem:[#allocation10 + $0x68] sm:$0xff] }
 0x79c   :  { %2277 = vmatprep.subr.mxu0 %v2104_v17  ;;  %2354 = vmatprep.subr.mxu1 %v2106_v25  ;;  %7267 = vst [vmem:[#allocation21_spill] sm:$0xff] %v6018_v56  ;;  %7268 = vst [vmem:[#allocation22_spill] sm:$0xff] %v6022_v60  ;;  %v6024_v17 = vld [vmem:[#allocation10 + $0x78] sm:$0xff]  ;;  %v6028_v25 = vld [vmem:[#allocation10 + $0x60] sm:$0xff] }
 0x79d   :  { %2278 = vmatpush1.msra.mxu0 %v2103_v13  ;;  %2355 = vmatpush1.msra.mxu1 %v2105_v4  ;;  %7269 = vst [vmem:[#allocation28_spill] sm:$0xff] %v6024_v17  ;;  %7270 = vst [vmem:[#allocation23_spill] sm:$0xff] %v6028_v25  ;;  %v6030_v13 = vld [vmem:[#allocation10 + $0x70] sm:$0xff]  ;;  %v6034_v4 = vld [vmem:[#allocation10 + $0x48] sm:$0xff] }
 0x79e   :  { %2279 = vmatprep.subr.mxu0 %v2100_v55  ;;  %2356 = vmatprep.subr.mxu1 %v2102_v5  ;;  %7271 = vst [vmem:[#allocation30_spill] sm:$0xff] %v6030_v13  ;;  %7272 = vst [vmem:[#allocation25_spill] sm:$0xff] %v6034_v4  ;;  %v6036_v55 = vld [vmem:[#allocation10 + $0x58] sm:$0xff]  ;;  %v6040_v5 = vld [vmem:[#allocation10 + $0x40] sm:$0xff] }
 0x79f   :  { %2280 = vmatpush1.msra.mxu0 %v2099_v58  ;;  %2313 = vmatprep.mubr.f32.mxu0 %v7254_v34  ;;  %7273 = vst [vmem:[#allocation32_spill] sm:$0xff] %v6036_v55  ;;  %7274 = vst [vmem:[#allocation27_spill] sm:$0xff] %v6040_v5  ;;  %v6042_v58 = vld [vmem:[#allocation10 + $0x50] sm:$0xff] }
 0x7a0   :  { %2357 = vmatpush1.msra.mxu1 %v2101_v20  ;;  %2390 = vmatprep.mubr.f32.mxu1 %v7254_v34  ;;  %7275 = vst [vmem:[#allocation19_spill] sm:$0xff] %v6042_v58  ;;  %v6050_v20 = vld [vmem:[#allocation10 + $0x28] sm:$0xff] }
 0x7a1   :  { %2314 = vmatmul.mubr.f32.vlgmr.msra.gmra.mxu0 %v7259_v62  ;;  %2391 = vmatmul.mubr.f32.vlgmr.msra.gmra.mxu1 %v7259_v62  ;;  %7276 = vst [vmem:[#allocation20_spill] sm:$0xff] %v6050_v20  ;;  %v6052_v62 = vld [vmem:[#allocation10 + $0x38] sm:$0xff] }
 0x7a2   :  { %2319 = vmatprep.mubr.f32.mxu0 %v7254_v34  ;;  %2396 = vmatprep.mubr.f32.mxu1 %v7254_v34  ;;  %7277 = vst [vmem:[#allocation45_spill] sm:$0xff] %v6052_v62 }
 0x7a3   :  { %2491 = vmatprep.subr.mxu0 %v5882_v52  ;;  %2562 = vmatprep.subr.mxu1 %v5884_v22 }
 0x7a4   :  { %2492 = vmatpush1.msra.mxu0 %v5886_v24  ;;  %2563 = vmatpush1.msra.mxu1 %v5890_v54 }
 0x7a5   :  { %2493 = vmatprep.subr.mxu0 %v5892_v11  ;;  %2564 = vmatprep.subr.mxu1 %v5894_v63 }
 0x7a6   :  { %2494 = vmatpush1.msra.mxu0 %v5898_v9  ;;  %2565 = vmatpush1.msra.mxu1 %v5900_v26 }
 0x7a7   :  { %2495 = vmatprep.subr.mxu0 %v5902_v27  ;;  %2566 = vmatprep.subr.mxu1 %v5906_v30 }
 0x7a8   :  { %2496 = vmatpush1.msra.mxu0 %v5908_v31  ;;  %2567 = vmatpush1.msra.mxu1 %v5910_v32 }
 0x7a9   :  { %2497 = vmatprep.subr.mxu0 %v5914_v19  ;;  %2568 = vmatprep.subr.mxu1 %v5916_v33 }
 0x7aa   :  { %2498 = vmatpush1.msra.mxu0 %v5920_v35  ;;  %2569 = vmatpush1.msra.mxu1 %v5922_v36 }
 0x7ab   :  { %2499 = vmatprep.subr.mxu0 %v5926_v38  ;;  %2570 = vmatprep.subr.mxu1 %v5928_v41 }
 0x7ac   :  { %2500 = vmatpush1.msra.mxu0 %v5932_v42  ;;  %2571 = vmatpush1.msra.mxu1 %v5934_v43 }
 0x7ad   :  { %2501 = vmatprep.subr.mxu0 %v5938_v44  ;;  %2572 = vmatprep.subr.mxu1 %v5940_v45 }
 0x7ae   :  { %2502 = vmatpush1.msra.mxu0 %v5944_v46  ;;  %2573 = vmatpush1.msra.mxu1 %v5946_v47 }
 0x7af   :  { %2503 = vmatprep.subr.mxu0 %v5950_v48  ;;  %2574 = vmatprep.subr.mxu1 %v5952_v53 }
 0x7b0   :  { %2504 = vmatpush1.msra.mxu0 %v5956_v3  ;;  %2575 = vmatpush1.msra.mxu1 %v5958_v59 }
 0x7b1   :  { %2505 = vmatprep.subr.mxu0 %v5962_v8  ;;  %2576 = vmatprep.subr.mxu1 %v5964_v10 }
 0x7b2   :  { %2506 = vmatpush1.msra.mxu0 %v5968_v12  ;;  %2577 = vmatpush1.msra.mxu1 %v5970_v15 }
 0x7b3   :  { %2507 = vmatprep.subr.mxu0 %v5974_v16  ;;  %2578 = vmatprep.subr.mxu1 %v5976_v39 }
 0x7b4   :  { %2508 = vmatpush1.msra.mxu0 %v5980_v1  ;;  %2579 = vmatpush1.msra.mxu1 %v5982_v7 }
 0x7b5   :  { %2509 = vmatprep.subr.mxu0 %v5986_v40  ;;  %2580 = vmatprep.subr.mxu1 %v5988_v18 }
 0x7b6   :  { %2510 = vmatpush1.msra.mxu0 %v5992_v61  ;;  %2581 = vmatpush1.msra.mxu1 %v5994_v2 }
 0x7b7   :  { %2511 = vmatprep.subr.mxu0 %v5998_v23  ;;  %2582 = vmatprep.subr.mxu1 %v6000_v37 }
 0x7b8   :  { %2512 = vmatpush1.msra.mxu0 %v6004_v6  ;;  %2583 = vmatpush1.msra.mxu1 %v6006_v21 }
 0x7b9   :  { %2513 = vmatprep.subr.mxu0 %v6010_v50  ;;  %2584 = vmatprep.subr.mxu1 %v6012_v57 }
 0x7ba   :  { %2514 = vmatpush1.msra.mxu0 %v6016_v28  ;;  %2585 = vmatpush1.msra.mxu1 %v6018_v56 }
 0x7bb   :  { %2515 = vmatprep.subr.mxu0 %v6022_v60  ;;  %2586 = vmatprep.subr.mxu1 %v6024_v17  ;;  %v6054_v17 = vld [vmem:[#allocation10 + $0x20] sm:$0xff] }
 0x7bc   :  { %2516 = vmatpush1.msra.mxu0 %v6028_v25  ;;  %2587 = vmatpush1.msra.mxu1 %v6030_v13  ;;  %7278 = vst [vmem:[#allocation46_spill] sm:$0xff] %v6054_v17  ;;  %v6058_v25 = vld [vmem:[#allocation10 + $0x30] sm:$0xff]  ;;  %v6060_v13 = vld [vmem:[#allocation10 + $0x8] sm:$0xff] }
 0x7bd   :  { %2517 = vmatprep.subr.mxu0 %v6034_v4  ;;  %2588 = vmatprep.subr.mxu1 %v6036_v55  ;;  %7279 = vst [vmem:[#allocation51_spill] sm:$0xff] %v6058_v25  ;;  %7280 = vst [vmem:[#allocation34_spill] sm:$0xff] %v6060_v13  ;;  %v6062_v4 = vld [vmem:[#allocation10 + $0x18] sm:$0xff] }
 0x7be   :  { %2518 = vmatpush1.msra.mxu0 %v6040_v5  ;;  %2589 = vmatpush1.msra.mxu1 %v6042_v58  ;;  %7281 = vst [vmem:[#allocation29_spill] sm:$0xff] %v6062_v4  ;;  %v6066_v58 = vld [vmem:[#allocation10] sm:$0xff]  ;;  %v6068_v5 = vld [vmem:[#allocation10 + $0x10] sm:$0xff] }
 0x7bf   :  { %2519 = vmatprep.subr.mxu0 %v6050_v20  ;;  %2590 = vmatprep.subr.mxu1 %v6052_v62  ;;  %7282 = vst [vmem:[#allocation36_spill] sm:$0xff] %v6066_v58  ;;  %7283 = vst [vmem:[#allocation31_spill] sm:$0xff] %v6068_v5 }
 0x7c0   :  { %2520 = vmatpush1.msra.mxu0 %v6054_v17  ;;  %2591 = vmatpush1.msra.mxu1 %v6058_v25 }
 0x7c1   :  { %2521 = vmatprep.subr.mxu0 %v6060_v13  ;;  %2592 = vmatprep.subr.mxu1 %v6062_v4 }
 0x7c2   :  { %2522 = vmatpush1.msra.mxu0 %v6066_v58  ;;  %2593 = vmatpush1.msra.mxu1 %v6068_v5  ;;  %v7284_v58 = vcombine.high %v7255_v49, %v7256_v51  ;;  %v7285_v49 = vld [vmem:[#allocation44_spill] sm:$0xff] }
 0x7c3   :  { %2687 = vmatprep.subr.mxu0 %v5882_v52  ;;  %2758 = vmatprep.subr.mxu1 %v5884_v22  ;;  %v7286_v51 = vsub.s32 0, %v7285_v49 }
 0x840   :  { %v1898_v62 = vpop.f32.mrf.mxu0  ;;  %v1969_v17 = vpop.f32.mrf.mxu1 }
 0x842   :  { %v1900_v20 = vpop.f32.mrf.mxu0  ;;  %v1971_v25 = vpop.f32.mrf.mxu1 }
 0x843   :  { %v1978_v55 = vcombine.low %v1898_v62, %v1900_v20  ;;  %v1979_v60 = vcombine.low %v1969_v17, %v1971_v25 }
 0x845   :  { %v1986_v56 = vrot.slane %v1978_v55, %v5214_v0  ;;  %v1993_v13 = vrot.slane %v1979_v60, %v5214_v0 }
 0x847   :  { %v1994_v28 = vcombine.low %v1986_v56, %v1993_v13  ;;  %v2227_v56 = vld [vmem:[%s6838_s6] sm:$0xf] }
 0x849   :  { %v1996_v4 = vadd.f32 %v1994_v28, %v7284_v58  ;;  %v6086_v28 = vrot.slane %v2227_v56, %v7286_v51 }
 0x84b   :  { %v4196_v5 = vmul.f32 -1.442695, %v1996_v4  ;;  %v2004_v57 = vrot.slane %v1996_v4, 2  ;;  %v2015_v22 = vrot.slane %v1996_v4, 6  ;;  %v2012_v6 = vrot.slane %v1996_v4, 4 }
 0x84d   :  { %4402 = vpow2.f32 %v4196_v5  ;;  %v4197_v52 = vmul.f32 -1.442695, %v2004_v57  ;;  %v4198_v50 = vmul.f32 -1.442695, %v2015_v22 }
 0x84f   :  { %4404 = vpow2.f32 %v4197_v52  ;;  %v7287_v52 = vsub.s32 2, %v7285_v49 }
 0x850   :  { %4406 = vpow2.f32 %v4198_v50  ;;  %v7291_v50 = vsub.s32 3, %v7285_v49 }
 0x851   :  { %v6090_v22 = vrot.slane %v2227_v56, %v7287_v52 }
 0x852   :  { %v6098_v60 = vrot.slane %v2227_v56, %v7291_v50 }
 0x853   :  { %7288 = vst [vmem:[#allocation38_spill] sm:$0xff] %v6090_v22 }
 0x854   :  { %7292 = vst [vmem:[#allocation40_spill] sm:$0xff] %v6098_v60 }
 0x85a   :  { %v4403_v21 = vpop.eup %4402 }
 0x85b   :  { %v2000_v20 = vadd.f32 1.0, %v4403_v21  ;;  %v7289_v21 = vsub.s32 1, %v7285_v49 }
 0x85c   :  { %v4405_v17 = vpop.eup %4404 }
 0x85d   :  { %4408 = vrcp.f32 %v2000_v20  ;;  %v2009_v25 = vadd.f32 1.0, %v4405_v17  ;;  %v6094_v57 = vrot.slane %v2227_v56, %v7289_v21 }
 0x85e   :  { %4410 = vtanh.f32 %v2012_v6 }
 0x85f   :  { %4412 = vrcp.f32 %v2009_v25  ;;  %7290 = vst [vmem:[#allocation33_spill] sm:$0xff] %v6094_v57 }
 0x861   :  { %v2315_v13 = vpop.f32.mrf.mxu0  ;;  %v2392_v4 = vpop.f32.mrf.mxu1 }
 0x862   :  { %v2316_v5 = vadd.f32 %v2315_v13, %v6086_v28  ;;  %v2393_v58 = vadd.f32 %v2392_v4, %v6090_v22  ;;  %v4407_v13 = vpop.eup %4406 }
 0x863   :  { %v2317_v6 = vpop.f32.mrf.mxu0  ;;  %v2394_v55 = vpop.f32.mrf.mxu1 }
 0x864   :  { %v2318_v62 = vadd.f32 %v2317_v6, %v6094_v57  ;;  %v2395_v20 = vadd.f32 %v2394_v55, %v6098_v60 }
 0x866   :  { %v2411_v17 = vcombine.low %v2316_v5, %v2318_v62  ;;  %v2412_v25 = vcombine.high %v2316_v5, %v2318_v62  ;;  %v2413_v51 = vcombine.low %v2393_v58, %v2395_v20  ;;  %v2414_v52 = vcombine.high %v2393_v58, %v2395_v20  ;;  %v7313_v5 = vld [vmem:[#allocation51_spill] sm:$0xff] }
 0x867   :  { %v2020_v20 = vadd.f32 1.0, %v4407_v13  ;;  %v7302_v13 = vld [vmem:[#allocation22_spill] sm:$0xff] }
 0x868   :  { %v6105_v49 = vrot.slane %v2411_v17, %v5214_v0  ;;  %v6108_v56 = vrot.slane %v2412_v25, %v5214_v0  ;;  %v6111_v21 = vrot.slane %v2413_v51, %v5214_v0  ;;  %v6114_v50 = vrot.slane %v2414_v52, %v5214_v0 }
 0x869   :  { %4414 = vrcp.f32 %v2020_v20  ;;  %v7308_v20 = vld [vmem:[#allocation27_spill] sm:$0xff] }
 0x86a   :  { %7293 = vst [vmem:[#allocation35_spill] sm:$0xff] %v6105_v49  ;;  %7294 = vst [vmem:[#allocation48_spill] sm:$0xff] %v6108_v56  ;;  %v4409_v4 = vpop.eup %4408  ;;  %v7315_v56 = vld [vmem:[#allocation29_spill] sm:$0xff] }
 0x86b   :  { %7295 = vst [vmem:[#allocation50_spill] sm:$0xff] %v6114_v50  ;;  %v4411_v58 = vpop.eup %4410  ;;  %v7314_v50 = vld [vmem:[#allocation34_spill] sm:$0xff] }
 0x86c   :  { %v4413_v62 = vpop.eup %4412  ;;  %v2024_v25 = vmul.f32 %v4411_v58, %v4409_v4  ;;  %v7303_v4 = vld [vmem:[#allocation28_spill] sm:$0xff]  ;;  %v7306_v58 = vld [vmem:[#allocation25_spill] sm:$0xff] }
 0x86d   :  { %v2023_v17 = vmul.f32 %v4413_v62, %v5864_v14  ;;  %v7296_v14 = vld [vmem:[#allocation39_spill] sm:$0xff]  ;;  %v7307_v62 = vld [vmem:[#allocation32_spill] sm:$0xff] }
 0x86f   :  { %v2025_v51 = vadd.f32 %v2024_v25, %v2023_v17  ;;  %v7309_v17 = vld [vmem:[#allocation19_spill] sm:$0xff]  ;;  %v7310_v25 = vld [vmem:[#allocation20_spill] sm:$0xff] }
 0x871   :  { %4416 = vtanh.f32 %v2025_v51  ;;  %v7311_v51 = vld [vmem:[#allocation45_spill] sm:$0xff] }
 0x876   :  { %v4415_v52 = vpop.eup %4414 }
 0x87e   :  { %v4417_v60 = vpop.eup %4416 }
 0x87f   :  { %v2027_v57 = vmul.f32 %v4417_v60, %v4415_v52  ;;  %v7300_v60 = vld [vmem:[#allocation24_spill] sm:$0xff]  ;;  %v7312_v52 = vld [vmem:[#allocation46_spill] sm:$0xff] }
 0x881   :  { %v2080_v22 = vcombine.low %v2027_v57, %v2027_v57  ;;  %v7299_v57 = vld [vmem:[#allocation49_spill] sm:$0xff] }
 0x883   :  { %v2087_v6 = vrot.slane %v2080_v22, %v5214_v0  ;;  %v7298_v22 = vld [vmem:[#allocation47_spill] sm:$0xff] }
 0x885   :  { %v2088_v49 = vcombine.low %v2087_v6, %v2087_v6  ;;  %v7304_v6 = vld [vmem:[#allocation23_spill] sm:$0xff] }
 0x887   :  { %v2098_v55 = vsel %vm2094_vm3, %v5874_v29, %v2088_v49  ;;  %v7297_v29 = vld [vmem:[#allocation43_spill] sm:$0xff]  ;;  %v7301_v49 = vld [vmem:[#allocation21_spill] sm:$0xff] }
 0x888   :  { %2320 = vmatmul.mubr.f32.gmra.mxu0 %v2098_v55  ;;  %2397 = vmatmul.mubr.f32.gmra.mxu1 %v2098_v55  ;;  %v7305_v55 = vld [vmem:[#allocation30_spill] sm:$0xff] }
 0x889   :  { %2555 = vmatprep.mubr.f32.mxu0 %v7254_v34  ;;  %2626 = vmatprep.mubr.f32.mxu1 %v7254_v34 }
 0x88c   :  { %2556 = vmatmul.mubr.f32.vlgmr.msra.gmra.mxu0 %v7254_v34  ;;  %2627 = vmatmul.mubr.f32.vlgmr.msra.gmra.mxu1 %v7254_v34 }
 0x88d   :  { %2688 = vmatpush1.msra.mxu0 %v5886_v24  ;;  %2759 = vmatpush1.msra.mxu1 %v5890_v54 }
 0x88e   :  { %2689 = vmatprep.subr.mxu0 %v5892_v11  ;;  %2760 = vmatprep.subr.mxu1 %v5894_v63 }
 0x88f   :  { %2690 = vmatpush1.msra.mxu0 %v5898_v9  ;;  %2761 = vmatpush1.msra.mxu1 %v5900_v26 }
 0x890   :  { %2691 = vmatprep.subr.mxu0 %v5902_v27  ;;  %2762 = vmatprep.subr.mxu1 %v5906_v30 }
 0x891   :  { %2692 = vmatpush1.msra.mxu0 %v5908_v31  ;;  %2763 = vmatpush1.msra.mxu1 %v5910_v32 }
 0x892   :  { %2693 = vmatprep.subr.mxu0 %v5914_v19  ;;  %2764 = vmatprep.subr.mxu1 %v5916_v33 }
 0x893   :  { %2694 = vmatpush1.msra.mxu0 %v5920_v35  ;;  %2765 = vmatpush1.msra.mxu1 %v5922_v36 }
 0x894   :  { %2695 = vmatprep.subr.mxu0 %v5926_v38  ;;  %2766 = vmatprep.subr.mxu1 %v5928_v41 }
 0x895   :  { %2696 = vmatpush1.msra.mxu0 %v5932_v42  ;;  %2767 = vmatpush1.msra.mxu1 %v5934_v43 }
 0x896   :  { %2697 = vmatprep.subr.mxu0 %v5938_v44  ;;  %2768 = vmatprep.subr.mxu1 %v5940_v45 }
 0x897   :  { %2698 = vmatpush1.msra.mxu0 %v5944_v46  ;;  %2769 = vmatpush1.msra.mxu1 %v5946_v47 }
 0x898   :  { %2699 = vmatprep.subr.mxu0 %v5950_v48  ;;  %2770 = vmatprep.subr.mxu1 %v5952_v53 }
 0x899   :  { %2700 = vmatpush1.msra.mxu0 %v5956_v3  ;;  %2771 = vmatpush1.msra.mxu1 %v5958_v59 }
 0x89a   :  { %2701 = vmatprep.subr.mxu0 %v5962_v8  ;;  %2772 = vmatprep.subr.mxu1 %v5964_v10 }
 0x89b   :  { %2702 = vmatpush1.msra.mxu0 %v5968_v12  ;;  %2773 = vmatpush1.msra.mxu1 %v5970_v15 }
 0x89c   :  { %2703 = vmatprep.subr.mxu0 %v5974_v16  ;;  %2774 = vmatprep.subr.mxu1 %v5976_v39 }
 0x89d   :  { %2704 = vmatpush1.msra.mxu0 %v5980_v1  ;;  %2775 = vmatpush1.msra.mxu1 %v5982_v7 }
 0x89e   :  { %2705 = vmatprep.subr.mxu0 %v5986_v40  ;;  %2776 = vmatprep.subr.mxu1 %v5988_v18 }
 0x89f   :  { %2706 = vmatpush1.msra.mxu0 %v5992_v61  ;;  %2777 = vmatpush1.msra.mxu1 %v5994_v2 }
 0x8a0   :  { %2707 = vmatprep.subr.mxu0 %v5998_v23  ;;  %2778 = vmatprep.subr.mxu1 %v6000_v37 }
 0x8a1   :  { %2708 = vmatpush1.msra.mxu0 %v7296_v14  ;;  %2779 = vmatpush1.msra.mxu1 %v7297_v29 }
 0x8a2   :  { %2709 = vmatprep.subr.mxu0 %v7298_v22  ;;  %2780 = vmatprep.subr.mxu1 %v7299_v57 }
 0x8a3   :  { %2710 = vmatpush1.msra.mxu0 %v7300_v60  ;;  %2781 = vmatpush1.msra.mxu1 %v7301_v49 }
 0x8a4   :  { %2711 = vmatprep.subr.mxu0 %v7302_v13  ;;  %2782 = vmatprep.subr.mxu1 %v7303_v4  ;;  %v7322_v4 = vld [vmem:[#allocation40_spill] sm:$0xff] }
 0x8a5   :  { %2712 = vmatpush1.msra.mxu0 %v7304_v6  ;;  %2783 = vmatpush1.msra.mxu1 %v7305_v55  ;;  %v7316_v55 = vld [vmem:[#allocation36_spill] sm:$0xff]  ;;  %v7321_v6 = vld [vmem:[#allocation33_spill] sm:$0xff] }
 0x8a6   :  { %2713 = vmatprep.subr.mxu0 %v7306_v58  ;;  %2784 = vmatprep.subr.mxu1 %v7307_v62  ;;  %v7317_v62 = vld [vmem:[#allocation31_spill] sm:$0xff]  ;;  %v7320_v58 = vld [vmem:[#allocation38_spill] sm:$0xff] }
 0x8a7   :  { %2714 = vmatpush1.msra.mxu0 %v7308_v20  ;;  %2785 = vmatpush1.msra.mxu1 %v7309_v17  ;;  %v7318_v17 = vld [vmem:[#allocation37_spill] sm:$0xff] }
 0x8a8   :  { %2715 = vmatprep.subr.mxu0 %v7310_v25  ;;  %2786 = vmatprep.subr.mxu1 %v7311_v51  ;;  %v7319_v25 = vld [vmem:[#allocation42_spill] sm:$0xff] }
 0x8a9   :  { %2716 = vmatpush1.msra.mxu0 %v7312_v52  ;;  %2787 = vmatpush1.msra.mxu1 %v7313_v5 }
 0x8aa   :  { %2717 = vmatprep.subr.mxu0 %v7314_v50  ;;  %2788 = vmatprep.subr.mxu1 %v7315_v56 }
 0x8ab   :  { %2718 = vmatpush1.msra.mxu0 %v7316_v55  ;;  %2751 = vmatprep.mubr.f32.mxu0 %v7254_v34 }
 0x8ac   :  { %2789 = vmatpush1.msra.mxu1 %v7317_v62  ;;  %2822 = vmatprep.mubr.f32.mxu1 %v7254_v34 }
 0x8ad   :  { %2883 = vmatprep.subr.mxu0 %v7318_v17  ;;  %2954 = vmatprep.subr.mxu1 %v7319_v25 }
 0x948   :  { %v2321_v51 = vpop.f32.mrf.mxu0  ;;  %v2398_v52 = vpop.f32.mrf.mxu1 }
 0x949   :  { %v2322_v50 = vadd.f32 %v2321_v51, %v6086_v28  ;;  %v2399_v56 = vadd.f32 %v2398_v52, %v7320_v58 }
 0x94a   :  { %v2323_v20 = vpop.f32.mrf.mxu0  ;;  %v2400_v5 = vpop.f32.mrf.mxu1 }
 0x94b   :  { %v2324_v55 = vadd.f32 %v2323_v20, %v7321_v6  ;;  %v2401_v13 = vadd.f32 %v2400_v5, %v7322_v4 }
 0x94c   :  { %v2557_v49 = vpop.f32.mrf.mxu0  ;;  %v2628_v62 = vpop.f32.mrf.mxu1 }
 0x94d   :  { %v2447_v60 = vcombine.low %v2322_v50, %v2324_v55  ;;  %v2448_v34 = vcombine.high %v2322_v50, %v2324_v55  ;;  %v2449_v57 = vcombine.low %v2399_v56, %v2401_v13  ;;  %v2450_v17 = vcombine.high %v2399_v56, %v2401_v13  ;;  %v7327_v55 = vld [vmem:[#allocation35_spill] sm:$0xff] }
 0x94e   :  { %v2559_v22 = vpop.f32.mrf.mxu0  ;;  %v2630_v25 = vpop.f32.mrf.mxu1 }
 0x94f   :  { %v6201_v29 = vrot.slane %v2447_v60, %v5214_v0  ;;  %v6204_v14 = vrot.slane %v2448_v34, %v5214_v0  ;;  %v6207_v28 = vrot.slane %v2449_v57, %v5214_v0  ;;  %v6210_v6 = vrot.slane %v2450_v17, %v5214_v0 }
 0x950   :  { %v2637_v5 = vcombine.low %v2557_v49, %v2559_v22  ;;  %v2638_v4 = vcombine.low %v2628_v62, %v2630_v25  ;;  %v2443_v22 = vcombine.low %v7327_v55, %v6111_v21 }
 0x951   :  { %7323 = vst [vmem:[#allocation41_spill] sm:$0xff] %v6201_v29  ;;  %7324 = vst [vmem:[#allocation26_spill] sm:$0xff] %v6204_v14  ;;  %v7345_v14 = vld [vmem:[#allocation51_spill] sm:$0xff]  ;;  %v7347_v29 = vld [vmem:[#allocation29_spill] sm:$0xff] }
 0x952   :  { %7325 = vst [vmem:[#allocation44_spill] sm:$0xff] %v6207_v28  ;;  %7326 = vst [vmem:[#allocation38_spill] sm:$0xff] %v6210_v6  ;;  %v2645_v57 = vrot.slane %v2637_v5, %v5214_v0  ;;  %v2652_v13 = vrot.slane %v2638_v4, %v5214_v0  ;;  %v7344_v6 = vld [vmem:[#allocation46_spill] sm:$0xff] }
 0x953   :  { %v7346_v28 = vld [vmem:[#allocation34_spill] sm:$0xff] }
 0x954   :  { %v2653_v49 = vcombine.low %v2645_v57, %v2652_v13 }
 0x956   :  { %v2655_v58 = vadd.f32 %v2653_v49, %v2443_v22 }
 0x958   :  { %v4199_v62 = vmul.f32 -1.442695, %v2655_v58  ;;  %v2663_v20 = vrot.slane %v2655_v58, 2  ;;  %v2674_v25 = vrot.slane %v2655_v58, 6  ;;  %v2671_v60 = vrot.slane %v2655_v58, 4 }
 0x95a   :  { %4418 = vpow2.f32 %v4199_v62  ;;  %v4200_v17 = vmul.f32 -1.442695, %v2663_v20  ;;  %v4201_v51 = vmul.f32 -1.442695, %v2674_v25 }
 0x95c   :  { %4420 = vpow2.f32 %v4200_v17 }
 0x95d   :  { %4422 = vpow2.f32 %v4201_v51  ;;  %v7332_v51 = vld [vmem:[#allocation24_spill] sm:$0xff] }
 0x967   :  { %v4419_v52 = vpop.eup %4418 }
 0x968   :  { %v2659_v56 = vadd.f32 1.0, %v4419_v52  ;;  %v7333_v52 = vld [vmem:[#allocation21_spill] sm:$0xff] }
 0x969   :  { %v4421_v34 = vpop.eup %4420 }
 0x96a   :  { %4424 = vrcp.f32 %v2659_v56  ;;  %v2668_v5 = vadd.f32 1.0, %v4421_v34  ;;  %v4423_v4 = vpop.eup %4422  ;;  %v7329_v56 = vld [vmem:[#allocation43_spill] sm:$0xff]  ;;  %v7331_v34 = vld [vmem:[#allocation49_spill] sm:$0xff] }
 0x96b   :  { %4426 = vtanh.f32 %v2671_v60  ;;  %v2679_v22 = vadd.f32 1.0, %v4423_v4  ;;  %v7330_v60 = vld [vmem:[#allocation47_spill] sm:$0xff]  ;;  %v7335_v4 = vld [vmem:[#allocation28_spill] sm:$0xff] }
 0x96c   :  { %4428 = vrcp.f32 %v2668_v5  ;;  %v7334_v5 = vld [vmem:[#allocation22_spill] sm:$0xff] }
 0x96d   :  { %4430 = vrcp.f32 %v2679_v22  ;;  %v7338_v22 = vld [vmem:[#allocation25_spill] sm:$0xff] }
 0x977   :  { %v4425_v50 = vpop.eup %4424 }
 0x978   :  { %v4427_v57 = vpop.eup %4426 }
 0x979   :  { %v4429_v13 = vpop.eup %4428  ;;  %v2683_v62 = vmul.f32 %v4427_v57, %v4425_v50  ;;  %v7328_v50 = vld [vmem:[#allocation39_spill] sm:$0xff] }
 0x97a   :  { %v2682_v49 = vmul.f32 0.0, %v4429_v13  ;;  %v4431_v58 = vpop.eup %4430  ;;  %v7336_v57 = vld [vmem:[#allocation23_spill] sm:$0xff]  ;;  %v7337_v13 = vld [vmem:[#allocation30_spill] sm:$0xff] }
 0x97c   :  { %v6224_v20 = vadd.f32 %v2683_v62, %v2682_v49  ;;  %v7339_v49 = vld [vmem:[#allocation32_spill] sm:$0xff]  ;;  %v7340_v62 = vld [vmem:[#allocation27_spill] sm:$0xff] }
 0x97e   :  { %4432 = vtanh.f32 %v6224_v20 }
 0x98b   :  { %v4433_v17 = vpop.eup %4432 }
 0x98c   :  { %v2686_v25 = vmul.f32 %v4433_v17, %v4431_v58  ;;  %v7341_v58 = vld [vmem:[#allocation19_spill] sm:$0xff]  ;;  %v7342_v17 = vld [vmem:[#allocation20_spill] sm:$0xff] }
 0x98e   :  { %2752 = vmatmul.mubr.f32.vlgmr.msra.gmra.mxu0 %v2686_v25  ;;  %2823 = vmatmul.mubr.f32.vlgmr.msra.gmra.mxu1 %v2686_v25  ;;  %v7343_v25 = vld [vmem:[#allocation45_spill] sm:$0xff] }
 0x98f   :  { %2884 = vmatpush1.msra.mxu0 %v5886_v24  ;;  %2955 = vmatpush1.msra.mxu1 %v5890_v54 }
 0x990   :  { %2885 = vmatprep.subr.mxu0 %v5892_v11  ;;  %2956 = vmatprep.subr.mxu1 %v5894_v63 }
 0x991   :  { %2886 = vmatpush1.msra.mxu0 %v5898_v9  ;;  %2957 = vmatpush1.msra.mxu1 %v5900_v26 }
 0x992   :  { %2887 = vmatprep.subr.mxu0 %v5902_v27  ;;  %2958 = vmatprep.subr.mxu1 %v5906_v30 }
 0x993   :  { %2888 = vmatpush1.msra.mxu0 %v5908_v31  ;;  %2959 = vmatpush1.msra.mxu1 %v5910_v32 }
 0x994   :  { %2889 = vmatprep.subr.mxu0 %v5914_v19  ;;  %2960 = vmatprep.subr.mxu1 %v5916_v33 }
 0x995   :  { %2890 = vmatpush1.msra.mxu0 %v5920_v35  ;;  %2961 = vmatpush1.msra.mxu1 %v5922_v36 }
 0x996   :  { %2891 = vmatprep.subr.mxu0 %v5926_v38  ;;  %2962 = vmatprep.subr.mxu1 %v5928_v41 }
 0x997   :  { %2892 = vmatpush1.msra.mxu0 %v5932_v42  ;;  %2963 = vmatpush1.msra.mxu1 %v5934_v43 }
 0x998   :  { %2893 = vmatprep.subr.mxu0 %v5938_v44  ;;  %2964 = vmatprep.subr.mxu1 %v5940_v45 }
 0x999   :  { %2894 = vmatpush1.msra.mxu0 %v5944_v46  ;;  %2965 = vmatpush1.msra.mxu1 %v5946_v47 }
 0x99a   :  { %2895 = vmatprep.subr.mxu0 %v5950_v48  ;;  %2966 = vmatprep.subr.mxu1 %v5952_v53 }
 0x99b   :  { %2896 = vmatpush1.msra.mxu0 %v5956_v3  ;;  %2967 = vmatpush1.msra.mxu1 %v5958_v59 }
 0x99c   :  { %2897 = vmatprep.subr.mxu0 %v5962_v8  ;;  %2968 = vmatprep.subr.mxu1 %v5964_v10 }
 0x99d   :  { %2898 = vmatpush1.msra.mxu0 %v5968_v12  ;;  %2969 = vmatpush1.msra.mxu1 %v5970_v15 }
 0x99e   :  { %2899 = vmatprep.subr.mxu0 %v5974_v16  ;;  %2970 = vmatprep.subr.mxu1 %v5976_v39 }
 0x99f   :  { %2900 = vmatpush1.msra.mxu0 %v5980_v1  ;;  %2971 = vmatpush1.msra.mxu1 %v5982_v7 }
 0x9a0   :  { %2901 = vmatprep.subr.mxu0 %v5986_v40  ;;  %2972 = vmatprep.subr.mxu1 %v5988_v18 }
 0x9a1   :  { %2902 = vmatpush1.msra.mxu0 %v5992_v61  ;;  %2973 = vmatpush1.msra.mxu1 %v5994_v2 }
 0x9a2   :  { %2903 = vmatprep.subr.mxu0 %v5998_v23  ;;  %2974 = vmatprep.subr.mxu1 %v6000_v37 }
 0x9a3   :  { %2904 = vmatpush1.msra.mxu0 %v7328_v50  ;;  %2975 = vmatpush1.msra.mxu1 %v7329_v56 }
 0x9a4   :  { %2905 = vmatprep.subr.mxu0 %v7330_v60  ;;  %2976 = vmatprep.subr.mxu1 %v7331_v34 }
 0x9a5   :  { %2906 = vmatpush1.msra.mxu0 %v7332_v51  ;;  %2977 = vmatpush1.msra.mxu1 %v7333_v52 }
 0x9a6   :  { %2907 = vmatprep.subr.mxu0 %v7334_v5  ;;  %2978 = vmatprep.subr.mxu1 %v7335_v4 }
 0x9a7   :  { %2908 = vmatpush1.msra.mxu0 %v7336_v57  ;;  %2979 = vmatpush1.msra.mxu1 %v7337_v13  ;;  %v7348_v13 = vld [vmem:[#allocation36_spill] sm:$0xff] }
 0x9a8   :  { %2909 = vmatprep.subr.mxu0 %v7338_v22  ;;  %2980 = vmatprep.subr.mxu1 %v7339_v49  ;;  %v7349_v22 = vmov 0.0   ;;  %v7350_v49 = vld [vmem:[#allocation31_spill] sm:$0xff] }
 0x9a9   :  { %2910 = vmatpush1.msra.mxu0 %v7340_v62  ;;  %2981 = vmatpush1.msra.mxu1 %v7341_v58  ;;  %v7351_v58 = vld [vmem:[#allocation37_spill] sm:$0xff] }
 0x9aa   :  { %2911 = vmatprep.subr.mxu0 %v7342_v17  ;;  %2982 = vmatprep.subr.mxu1 %v7343_v25  ;;  %v7352_v17 = vld [vmem:[#allocation42_spill] sm:$0xff] }
 0x9ab   :  { %2912 = vmatpush1.msra.mxu0 %v7344_v6  ;;  %2983 = vmatpush1.msra.mxu1 %v7345_v14 }
 0x9ac   :  { %2913 = vmatprep.subr.mxu0 %v7346_v28  ;;  %2984 = vmatprep.subr.mxu1 %v7347_v29 }
 0x9ad   :  { %2914 = vmatpush1.msra.mxu0 %v7348_v13  ;;  %2947 = vmatprep.mubr.f32.mxu0 %v7349_v22 }
 0x9ae   :  { %2985 = vmatpush1.msra.mxu1 %v7350_v49  ;;  %3018 = vmatprep.mubr.f32.mxu1 %v7349_v22  ;;  %v7353_v49 = vcombine.high %v7327_v55, %v6111_v21 }
 0x9af   :  { %3079 = vmatprep.subr.mxu0 %v7351_v58  ;;  %3150 = vmatprep.subr.mxu1 %v7352_v17 }
 0xa4e   :  { %v2753_v25 = vpop.f32.mrf.mxu0  ;;  %v2824_v6 = vpop.f32.mrf.mxu1 }
 0xa50   :  { %v2755_v62 = vpop.f32.mrf.mxu0  ;;  %v2826_v14 = vpop.f32.mrf.mxu1 }
 0xa51   :  { %v2833_v57 = vcombine.low %v2753_v25, %v2755_v62  ;;  %v2834_v28 = vcombine.low %v2824_v6, %v2826_v14 }
 0xa53   :  { %v2841_v29 = vrot.slane %v2833_v57, %v5214_v0  ;;  %v2848_v13 = vrot.slane %v2834_v28, %v5214_v0 }
 0xa55   :  { %v2849_v4 = vcombine.low %v2841_v29, %v2848_v13 }
 0xa57   :  { %v2851_v5 = vadd.f32 %v2849_v4, %v7353_v49 }
 0xa59   :  { %v4202_v22 = vmul.f32 -1.442695, %v2851_v5  ;;  %v2859_v52 = vrot.slane %v2851_v5, 2  ;;  %v2870_v17 = vrot.slane %v2851_v5, 6  ;;  %v2867_v60 = vrot.slane %v2851_v5, 4 }
 0xa5b   :  { %4434 = vpow2.f32 %v4202_v22  ;;  %v4203_v58 = vmul.f32 -1.442695, %v2859_v52  ;;  %v4204_v51 = vmul.f32 -1.442695, %v2870_v17 }
 0xa5d   :  { %4436 = vpow2.f32 %v4203_v58 }
 0xa5e   :  { %4438 = vpow2.f32 %v4204_v51 }
 0xa68   :  { %v4435_v34 = vpop.eup %4434 }
 0xa69   :  { %v2855_v62 = vadd.f32 1.0, %v4435_v34 }
 0xa6a   :  { %v4437_v14 = vpop.eup %4436 }
 0xa6b   :  { %4440 = vrcp.f32 %v2855_v62  ;;  %v2864_v6 = vadd.f32 1.0, %v4437_v14  ;;  %v4439_v29 = vpop.eup %4438 }
 0xa6c   :  { %4442 = vtanh.f32 %v2867_v60  ;;  %v2875_v4 = vadd.f32 1.0, %v4439_v29 }
 0xa6d   :  { %4444 = vrcp.f32 %v2864_v6 }
 0xa6e   :  { %4446 = vrcp.f32 %v2875_v4 }
 0xa78   :  { %v4441_v28 = vpop.eup %4440 }
 0xa79   :  { %v4443_v21 = vpop.eup %4442 }
 0xa7a   :  { %v4445_v55 = vpop.eup %4444  ;;  %v2879_v52 = vmul.f32 %v4443_v21, %v4441_v28 }
 0xa7b   :  { %v2878_v57 = vmul.f32 %v4445_v55, %v6224_v20  ;;  %v4447_v34 = vpop.eup %4446 }
 0xa7d   :  { %v6299_v13 = vadd.f32 %v2879_v52, %v2878_v57 }
 0xa7f   :  { %4448 = vtanh.f32 %v6299_v13 }
 0xa8c   :  { %v4449_v5 = vpop.eup %4448 }
 0xa8d   :  { %v2882_v51 = vmul.f32 %v4449_v5, %v4447_v34 }
 0xa8f   :  { %2948 = vmatmul.mubr.f32.vlgmr.msra.gmra.mxu0 %v2882_v51  ;;  %3019 = vmatmul.mubr.f32.vlgmr.msra.gmra.mxu1 %v2882_v51 }
 0xa90   :  { %3080 = vmatpush1.msra.mxu0 %v5886_v24  ;;  %3151 = vmatpush1.msra.mxu1 %v5890_v54  ;;  %v7354_v24 = vld [vmem:[#allocation47_spill] sm:$0xff]  ;;  %v7355_v54 = vld [vmem:[#allocation49_spill] sm:$0xff] }
 0xa91   :  { %3081 = vmatprep.subr.mxu0 %v5892_v11  ;;  %3152 = vmatprep.subr.mxu1 %v5894_v63  ;;  %v7356_v11 = vld [vmem:[#allocation24_spill] sm:$0xff]  ;;  %v7357_v63 = vld [vmem:[#allocation21_spill] sm:$0xff] }
 0xa92   :  { %3082 = vmatpush1.msra.mxu0 %v5898_v9  ;;  %3153 = vmatpush1.msra.mxu1 %v5900_v26  ;;  %v7358_v9 = vld [vmem:[#allocation22_spill] sm:$0xff]  ;;  %v7359_v26 = vld [vmem:[#allocation28_spill] sm:$0xff] }
 0xa93   :  { %3083 = vmatprep.subr.mxu0 %v5902_v27  ;;  %3154 = vmatprep.subr.mxu1 %v5906_v30  ;;  %v7360_v27 = vld [vmem:[#allocation23_spill] sm:$0xff]  ;;  %v7361_v30 = vld [vmem:[#allocation30_spill] sm:$0xff] }
 0xa94   :  { %3084 = vmatpush1.msra.mxu0 %v5908_v31  ;;  %3155 = vmatpush1.msra.mxu1 %v5910_v32  ;;  %v7362_v31 = vld [vmem:[#allocation25_spill] sm:$0xff]  ;;  %v7363_v32 = vld [vmem:[#allocation32_spill] sm:$0xff] }
 0xa95   :  { %3085 = vmatprep.subr.mxu0 %v5914_v19  ;;  %3156 = vmatprep.subr.mxu1 %v5916_v33  ;;  %v7364_v19 = vld [vmem:[#allocation27_spill] sm:$0xff] }
 0xa96   :  { %3086 = vmatpush1.msra.mxu0 %v5920_v35  ;;  %3157 = vmatpush1.msra.mxu1 %v5922_v36  ;;  %v7365_v33 = vld [vmem:[#allocation19_spill] sm:$0xff]  ;;  %v7366_v35 = vld [vmem:[#allocation20_spill] sm:$0xff]  ;;  %v7367_v36 = vld [vmem:[#allocation45_spill] sm:$0xff] }
 0xa97   :  { %3087 = vmatprep.subr.mxu0 %v5926_v38  ;;  %3158 = vmatprep.subr.mxu1 %v5928_v41  ;;  %v7368_v38 = vld [vmem:[#allocation46_spill] sm:$0xff]  ;;  %v7369_v41 = vld [vmem:[#allocation51_spill] sm:$0xff] }
 0xa98   :  { %3088 = vmatpush1.msra.mxu0 %v5932_v42  ;;  %3159 = vmatpush1.msra.mxu1 %v5934_v43  ;;  %v7370_v42 = vld [vmem:[#allocation34_spill] sm:$0xff]  ;;  %v7371_v43 = vld [vmem:[#allocation29_spill] sm:$0xff] }
 0xa99   :  { %3089 = vmatprep.subr.mxu0 %v5938_v44  ;;  %3160 = vmatprep.subr.mxu1 %v5940_v45  ;;  %v7372_v44 = vld [vmem:[#allocation36_spill] sm:$0xff]  ;;  %v7373_v45 = vmov 0.0  }
 0xa9a   :  { %3090 = vmatpush1.msra.mxu0 %v5944_v46  ;;  %3161 = vmatpush1.msra.mxu1 %v5946_v47  ;;  %v7374_v46 = vld [vmem:[#allocation31_spill] sm:$0xff]  ;;  %v7375_v47 = vld [vmem:[#allocation37_spill] sm:$0xff] }
 0xa9b   :  { %3091 = vmatprep.subr.mxu0 %v5950_v48  ;;  %3162 = vmatprep.subr.mxu1 %v5952_v53  ;;  %v7376_v48 = vld [vmem:[#allocation42_spill] sm:$0xff] }
 0xa9c   :  { %3092 = vmatpush1.msra.mxu0 %v5956_v3  ;;  %3163 = vmatpush1.msra.mxu1 %v5958_v59 }
 0xa9d   :  { %3093 = vmatprep.subr.mxu0 %v5962_v8  ;;  %3164 = vmatprep.subr.mxu1 %v5964_v10 }
 0xa9e   :  { %3094 = vmatpush1.msra.mxu0 %v5968_v12  ;;  %3165 = vmatpush1.msra.mxu1 %v5970_v15 }
 0xa9f   :  { %3095 = vmatprep.subr.mxu0 %v5974_v16  ;;  %3166 = vmatprep.subr.mxu1 %v5976_v39 }
 0xaa0   :  { %3096 = vmatpush1.msra.mxu0 %v5980_v1  ;;  %3167 = vmatpush1.msra.mxu1 %v5982_v7  ;;  %v7377_v1 = vld [vmem:[#allocation48_spill] sm:$0xff]  ;;  %v7378_v7 = vld [vmem:[#allocation50_spill] sm:$0xff] }
 0xaa1   :  { %3097 = vmatprep.subr.mxu0 %v5986_v40  ;;  %3168 = vmatprep.subr.mxu1 %v5988_v18  ;;  %v7379_v20 = vcombine.low %v7377_v1, %v7378_v7 }
 0xaa2   :  { %3098 = vmatpush1.msra.mxu0 %v5992_v61  ;;  %3169 = vmatpush1.msra.mxu1 %v5994_v2 }
 0xaa3   :  { %3099 = vmatprep.subr.mxu0 %v5998_v23  ;;  %3170 = vmatprep.subr.mxu1 %v6000_v37 }
 0xaa4   :  { %3100 = vmatpush1.msra.mxu0 %v7328_v50  ;;  %3171 = vmatpush1.msra.mxu1 %v7329_v56 }
 0xaa5   :  { %3101 = vmatprep.subr.mxu0 %v7354_v24  ;;  %3172 = vmatprep.subr.mxu1 %v7355_v54 }
 0xaa6   :  { %3102 = vmatpush1.msra.mxu0 %v7356_v11  ;;  %3173 = vmatpush1.msra.mxu1 %v7357_v63 }
 0xaa7   :  { %3103 = vmatprep.subr.mxu0 %v7358_v9  ;;  %3174 = vmatprep.subr.mxu1 %v7359_v26 }
 0xaa8   :  { %3104 = vmatpush1.msra.mxu0 %v7360_v27  ;;  %3175 = vmatpush1.msra.mxu1 %v7361_v30 }
 0xaa9   :  { %3105 = vmatprep.subr.mxu0 %v7362_v31  ;;  %3176 = vmatprep.subr.mxu1 %v7363_v32 }
 0xaaa   :  { %3106 = vmatpush1.msra.mxu0 %v7364_v19  ;;  %3177 = vmatpush1.msra.mxu1 %v7365_v33 }
 0xaab   :  { %3107 = vmatprep.subr.mxu0 %v7366_v35  ;;  %3178 = vmatprep.subr.mxu1 %v7367_v36 }
 0xaac   :  { %3108 = vmatpush1.msra.mxu0 %v7368_v38  ;;  %3179 = vmatpush1.msra.mxu1 %v7369_v41 }
 0xaad   :  { %3109 = vmatprep.subr.mxu0 %v7370_v42  ;;  %3180 = vmatprep.subr.mxu1 %v7371_v43 }
 0xaae   :  { %3110 = vmatpush1.msra.mxu0 %v7372_v44  ;;  %3143 = vmatprep.mubr.f32.mxu0 %v7373_v45 }
 0xaaf   :  { %3181 = vmatpush1.msra.mxu1 %v7374_v46  ;;  %3214 = vmatprep.mubr.f32.mxu1 %v7373_v45 }
 0xab0   :  { %3275 = vmatprep.subr.mxu0 %v7375_v47  ;;  %3346 = vmatprep.subr.mxu1 %v7376_v48 }
 0xb4f   :  { %v2949_v53 = vpop.f32.mrf.mxu0  ;;  %v3020_v3 = vpop.f32.mrf.mxu1 }
 0xb51   :  { %v2951_v59 = vpop.f32.mrf.mxu0  ;;  %v3022_v8 = vpop.f32.mrf.mxu1 }
 0xb52   :  { %v3029_v10 = vcombine.low %v2949_v53, %v2951_v59  ;;  %v3030_v12 = vcombine.low %v3020_v3, %v3022_v8  ;;  %v6377_v3 = vld [vmem:[#allocation10 + $0x1e0] sm:$0xff]  ;;  %v6380_v59 = vld [vmem:[#allocation10 + $0x1f0] sm:$0xff]  ;;  %v6386_v8 = vld [vmem:[#allocation10 + $0x1d8] sm:$0xff] }
 0xb54   :  { %v3037_v15 = vrot.slane %v3029_v10, %v5214_v0  ;;  %v3044_v16 = vrot.slane %v3030_v12, %v5214_v0  ;;  %v6389_v10 = vld [vmem:[#allocation10 + $0x1c0] sm:$0xff]  ;;  %v6392_v12 = vld [vmem:[#allocation10 + $0x1d0] sm:$0xff] }
 0xb56   :  { %v3045_v39 = vcombine.low %v3037_v15, %v3044_v16  ;;  %v6395_v15 = vld [vmem:[#allocation10 + $0x1a8] sm:$0xff]  ;;  %v6398_v16 = vld [vmem:[#allocation10 + $0x1b8] sm:$0xff] }
 0xb58   :  { %v3047_v60 = vadd.f32 %v3045_v39, %v7379_v20  ;;  %v6401_v39 = vld [vmem:[#allocation10 + $0x1a0] sm:$0xff]  ;;  %v6404_v20 = vld [vmem:[#allocation10 + $0x1b0] sm:$0xff] }
 0xb5a   :  { %v4205_v22 = vmul.f32 -1.442695, %v3047_v60  ;;  %v3055_v49 = vrot.slane %v3047_v60, 2  ;;  %v3066_v17 = vrot.slane %v3047_v60, 6  ;;  %v3063_v14 = vrot.slane %v3047_v60, 4  ;;  %v6407_v60 = vld [vmem:[#allocation10 + $0x188] sm:$0xff] }
 0xb5c   :  { %4450 = vpow2.f32 %v4205_v22  ;;  %v4206_v58 = vmul.f32 -1.442695, %v3055_v49  ;;  %v4207_v25 = vmul.f32 -1.442695, %v3066_v17  ;;  %v6410_v22 = vld [vmem:[#allocation10 + $0x198] sm:$0xff]  ;;  %v6413_v49 = vld [vmem:[#allocation10 + $0x180] sm:$0xff] }
 0xb5d   :  { %v6419_v17 = vld [vmem:[#allocation10 + $0x168] sm:$0xff] }
 0xb5e   :  { %4452 = vpow2.f32 %v4206_v58  ;;  %v6416_v58 = vld [vmem:[#allocation10 + $0x190] sm:$0xff] }
 0xb5f   :  { %4454 = vpow2.f32 %v4207_v25  ;;  %v6422_v25 = vld [vmem:[#allocation10 + $0x178] sm:$0xff] }
 0xb69   :  { %v4451_v62 = vpop.eup %4450 }
 0xb6a   :  { %v3051_v6 = vadd.f32 1.0, %v4451_v62  ;;  %v6425_v62 = vld [vmem:[#allocation10 + $0x160] sm:$0xff] }
 0xb6b   :  { %v4453_v29 = vpop.eup %4452 }
 0xb6c   :  { %4456 = vrcp.f32 %v3051_v6  ;;  %v3060_v28 = vadd.f32 1.0, %v4453_v29  ;;  %v4455_v21 = vpop.eup %4454  ;;  %v6431_v6 = vld [vmem:[#allocation10 + $0x148] sm:$0xff]  ;;  %v6434_v29 = vld [vmem:[#allocation10 + $0x158] sm:$0xff] }
 0xb6d   :  { %4458 = vtanh.f32 %v3063_v14  ;;  %v3071_v52 = vadd.f32 1.0, %v4455_v21  ;;  %v6428_v14 = vld [vmem:[#allocation10 + $0x170] sm:$0xff] }
 0xb6e   :  { %4460 = vrcp.f32 %v3060_v28  ;;  %v6437_v28 = vld [vmem:[#allocation10 + $0x140] sm:$0xff]  ;;  %v6440_v21 = vld [vmem:[#allocation10 + $0x150] sm:$0xff] }
 0xb6f   :  { %4462 = vrcp.f32 %v3071_v52  ;;  %v6452_v52 = vld [vmem:[#allocation10 + $0x130] sm:$0xff] }
 0xb70   :  { %7380 = vst [vmem:[#allocation33_spill] sm:$0xff] %v6452_v52 }
 0xb79   :  { %v4457_v55 = vpop.eup %4456 }
 0xb7a   :  { %v4459_v4 = vpop.eup %4458 }
 0xb7b   :  { %v4461_v57 = vpop.eup %4460  ;;  %v3075_v5 = vmul.f32 %v4459_v4, %v4457_v55  ;;  %v6443_v55 = vld [vmem:[#allocation10 + $0x128] sm:$0xff]  ;;  %v6446_v4 = vld [vmem:[#allocation10 + $0x138] sm:$0xff] }
 0xb7c   :  { %v3074_v34 = vmul.f32 %v4461_v57, %v6299_v13  ;;  %v4463_v47 = vpop.eup %4462  ;;  %v6383_v13 = vld [vmem:[#allocation10 + $0x1c8] sm:$0xff]  ;;  %v6449_v57 = vld [vmem:[#allocation10 + $0x120] sm:$0xff] }
 0xb7e   :  { %v6374_v51 = vadd.f32 %v3075_v5, %v3074_v34  ;;  %v6455_v34 = vld [vmem:[#allocation10 + $0x108] sm:$0xff]  ;;  %v6458_v5 = vld [vmem:[#allocation10 + $0x118] sm:$0xff] }
 0xb7f   :  { %7381 = vst [vmem:[#allocation40_spill] sm:$0xff] %v6455_v34  ;;  %7382 = vst [vmem:[#allocation35_spill] sm:$0xff] %v6458_v5 }
 0xb80   :  { %4464 = vtanh.f32 %v6374_v51 }
 0xb8d   :  { %v4465_v48 = vpop.eup %4464 }
 0xb8e   :  { %v3078_v53 = vmul.f32 %v4465_v48, %v4463_v47  ;;  %v6461_v47 = vld [vmem:[#allocation10 + $0x100] sm:$0xff]  ;;  %v6464_v48 = vld [vmem:[#allocation10 + $0x110] sm:$0xff] }
 0xb90   :  { %3144 = vmatmul.mubr.f32.vlgmr.msra.gmra.mxu0 %v3078_v53  ;;  %3215 = vmatmul.mubr.f32.vlgmr.msra.gmra.mxu1 %v3078_v53  ;;  %v6467_v53 = vld [vmem:[#allocation10 + $0xe8] sm:$0xff] }
 0xb91   :  { %3276 = vmatpush1.msra.mxu0 %v6377_v3  ;;  %3347 = vmatpush1.msra.mxu1 %v6380_v59 }
 0xb92   :  { %3277 = vmatprep.subr.mxu0 %v6383_v13  ;;  %3348 = vmatprep.subr.mxu1 %v6386_v8 }
 0xb93   :  { %3278 = vmatpush1.msra.mxu0 %v6389_v10  ;;  %3349 = vmatpush1.msra.mxu1 %v6392_v12 }
 0xb94   :  { %3279 = vmatprep.subr.mxu0 %v6395_v15  ;;  %3350 = vmatprep.subr.mxu1 %v6398_v16 }
 0xb95   :  { %3280 = vmatpush1.msra.mxu0 %v6401_v39  ;;  %3351 = vmatpush1.msra.mxu1 %v6404_v20 }
 0xb96   :  { %3281 = vmatprep.subr.mxu0 %v6407_v60  ;;  %3352 = vmatprep.subr.mxu1 %v6410_v22 }
 0xb97   :  { %3282 = vmatpush1.msra.mxu0 %v6413_v49  ;;  %3353 = vmatpush1.msra.mxu1 %v6416_v58 }
 0xb98   :  { %3283 = vmatprep.subr.mxu0 %v6419_v17  ;;  %3354 = vmatprep.subr.mxu1 %v6422_v25 }
 0xb99   :  { %3284 = vmatpush1.msra.mxu0 %v6425_v62  ;;  %3355 = vmatpush1.msra.mxu1 %v6428_v14 }
 0xb9a   :  { %3285 = vmatprep.subr.mxu0 %v6431_v6  ;;  %3356 = vmatprep.subr.mxu1 %v6434_v29 }
 0xb9b   :  { %3286 = vmatpush1.msra.mxu0 %v6437_v28  ;;  %3357 = vmatpush1.msra.mxu1 %v6440_v21 }
 0xb9c   :  { %3287 = vmatprep.subr.mxu0 %v6443_v55  ;;  %3358 = vmatprep.subr.mxu1 %v6446_v4 }
 0xb9d   :  { %3288 = vmatpush1.msra.mxu0 %v6449_v57  ;;  %3359 = vmatpush1.msra.mxu1 %v6452_v52  ;;  %v6470_v52 = vld [vmem:[#allocation10 + $0xf8] sm:$0xff] }
 0xb9e   :  { %3289 = vmatprep.subr.mxu0 %v6455_v34  ;;  %3360 = vmatprep.subr.mxu1 %v6458_v5  ;;  %v6473_v34 = vld [vmem:[#allocation10 + $0xe0] sm:$0xff]  ;;  %v6476_v5 = vld [vmem:[#allocation10 + $0xf0] sm:$0xff] }
 0xb9f   :  { %3290 = vmatpush1.msra.mxu0 %v6461_v47  ;;  %3361 = vmatpush1.msra.mxu1 %v6464_v48 }
 0xba0   :  { %3291 = vmatprep.subr.mxu0 %v6467_v53  ;;  %3362 = vmatprep.subr.mxu1 %v6470_v52 }
 0xba1   :  { %3292 = vmatpush1.msra.mxu0 %v6473_v34  ;;  %3363 = vmatpush1.msra.mxu1 %v6476_v5 }
 0xba2   :  { %3293 = vmatprep.subr.mxu0 %v5986_v40  ;;  %3364 = vmatprep.subr.mxu1 %v5988_v18  ;;  %v6509_v40 = vld [vmem:[#allocation10 + $0x1e8] sm:$0xff]  ;;  %v6512_v18 = vld [vmem:[#allocation10 + $0x1f8] sm:$0xff] }
 0xba3   :  { %3294 = vmatpush1.msra.mxu0 %v5992_v61  ;;  %3365 = vmatpush1.msra.mxu1 %v5994_v2  ;;  %7383 = vst [vmem:[#allocation39_spill] sm:$0xff] %v6509_v40  ;;  %7384 = vst [vmem:[#allocation43_spill] sm:$0xff] %v6512_v18 }
 0xba4   :  { %3295 = vmatprep.subr.mxu0 %v5998_v23  ;;  %3366 = vmatprep.subr.mxu1 %v6000_v37 }
 0xba5   :  { %3296 = vmatpush1.msra.mxu0 %v7328_v50  ;;  %3367 = vmatpush1.msra.mxu1 %v7329_v56 }
 0xba6   :  { %3297 = vmatprep.subr.mxu0 %v7354_v24  ;;  %3368 = vmatprep.subr.mxu1 %v7355_v54 }
 0xba7   :  { %3298 = vmatpush1.msra.mxu0 %v7356_v11  ;;  %3369 = vmatpush1.msra.mxu1 %v7357_v63  ;;  %v7385_v63 = vcombine.high %v7377_v1, %v7378_v7 }
 0xba8   :  { %3299 = vmatprep.subr.mxu0 %v7358_v9  ;;  %3370 = vmatprep.subr.mxu1 %v7359_v26 }
 0xba9   :  { %3300 = vmatpush1.msra.mxu0 %v7360_v27  ;;  %3371 = vmatpush1.msra.mxu1 %v7361_v30 }
 0xbaa   :  { %3301 = vmatprep.subr.mxu0 %v7362_v31  ;;  %3372 = vmatprep.subr.mxu1 %v7363_v32 }
 0xbab   :  { %3302 = vmatpush1.msra.mxu0 %v7364_v19  ;;  %3373 = vmatpush1.msra.mxu1 %v7365_v33 }
 0xbac   :  { %3303 = vmatprep.subr.mxu0 %v7366_v35  ;;  %3374 = vmatprep.subr.mxu1 %v7367_v36 }
 0xbad   :  { %3304 = vmatpush1.msra.mxu0 %v7368_v38  ;;  %3375 = vmatpush1.msra.mxu1 %v7369_v41 }
 0xbae   :  { %3305 = vmatprep.subr.mxu0 %v7370_v42  ;;  %3376 = vmatprep.subr.mxu1 %v7371_v43 }
 0xbaf   :  { %3306 = vmatpush1.msra.mxu0 %v7372_v44  ;;  %3339 = vmatprep.mubr.f32.mxu0 %v7373_v45 }
 0xbb0   :  { %3377 = vmatpush1.msra.mxu1 %v7374_v46  ;;  %3410 = vmatprep.mubr.f32.mxu1 %v7373_v45 }
 0xbb1   :  { %3471 = vmatprep.subr.mxu0 %v6509_v40  ;;  %3542 = vmatprep.subr.mxu1 %v6512_v18 }
 0xc50   :  { %v3145_v61 = vpop.f32.mrf.mxu0  ;;  %v3216_v2 = vpop.f32.mrf.mxu1 }
 0xc52   :  { %v3147_v23 = vpop.f32.mrf.mxu0  ;;  %v3218_v37 = vpop.f32.mrf.mxu1 }
 0xc53   :  { %v3225_v50 = vcombine.low %v3145_v61, %v3147_v23  ;;  %v3226_v56 = vcombine.low %v3216_v2, %v3218_v37 }
 0xc55   :  { %v3233_v24 = vrot.slane %v3225_v50, %v5214_v0  ;;  %v3240_v54 = vrot.slane %v3226_v56, %v5214_v0  ;;  %v7387_v50 = vld [vmem:[#allocation40_spill] sm:$0xff]  ;;  %v7388_v56 = vld [vmem:[#allocation35_spill] sm:$0xff] }
 0xc57   :  { %v3241_v11 = vcombine.low %v3233_v24, %v3240_v54  ;;  %v6558_v24 = vld [vmem:[#allocation10 + $0xc8] sm:$0xff]  ;;  %v6561_v54 = vld [vmem:[#allocation10 + $0xd8] sm:$0xff] }
 0xc59   :  { %v3243_v9 = vadd.f32 %v3241_v11, %v7385_v63  ;;  %v6564_v11 = vld [vmem:[#allocation10 + $0xc0] sm:$0xff]  ;;  %v6567_v63 = vld [vmem:[#allocation10 + $0xd0] sm:$0xff] }
 0xc5b   :  { %v4208_v26 = vmul.f32 -1.442695, %v3243_v9  ;;  %v3251_v27 = vrot.slane %v3243_v9, 2  ;;  %v3262_v31 = vrot.slane %v3243_v9, 6  ;;  %v3259_v33 = vrot.slane %v3243_v9, 4  ;;  %v6570_v9 = vld [vmem:[#allocation10 + $0xa8] sm:$0xff] }
 0xc5d   :  { %4466 = vpow2.f32 %v4208_v26  ;;  %v4209_v30 = vmul.f32 -1.442695, %v3251_v27  ;;  %v4210_v32 = vmul.f32 -1.442695, %v3262_v31  ;;  %v6573_v26 = vld [vmem:[#allocation10 + $0xb8] sm:$0xff]  ;;  %v6576_v27 = vld [vmem:[#allocation10 + $0xa0] sm:$0xff] }
 0xc5e   :  { %v6582_v31 = vld [vmem:[#allocation10 + $0x88] sm:$0xff] }
 0xc5f   :  { %4468 = vpow2.f32 %v4209_v30  ;;  %v6579_v30 = vld [vmem:[#allocation10 + $0xb0] sm:$0xff]  ;;  %7389 = vst [vmem:[#allocation47_spill] sm:$0xff] %v6582_v31 }
 0xc60   :  { %4470 = vpow2.f32 %v4210_v32  ;;  %v6585_v32 = vld [vmem:[#allocation10 + $0x98] sm:$0xff] }
 0xc61   :  { %7390 = vst [vmem:[#allocation49_spill] sm:$0xff] %v6585_v32 }
 0xc6a   :  { %v4467_v19 = vpop.eup %4466 }
 0xc6b   :  { %v3247_v35 = vadd.f32 1.0, %v4467_v19  ;;  %v6588_v19 = vld [vmem:[#allocation10 + $0x80] sm:$0xff] }
 0xc6c   :  { %v4469_v36 = vpop.eup %4468  ;;  %7391 = vst [vmem:[#allocation24_spill] sm:$0xff] %v6588_v19 }
 0xc6d   :  { %4472 = vrcp.f32 %v3247_v35  ;;  %v3256_v38 = vadd.f32 1.0, %v4469_v36  ;;  %v4471_v41 = vpop.eup %4470  ;;  %v6594_v35 = vld [vmem:[#allocation10 + $0x68] sm:$0xff]  ;;  %v6597_v36 = vld [vmem:[#allocation10 + $0x78] sm:$0xff] }
 0xc6e   :  { %4474 = vtanh.f32 %v3259_v33  ;;  %v3267_v46 = vadd.f32 1.0, %v4471_v41  ;;  %v6591_v33 = vld [vmem:[#allocation10 + $0x90] sm:$0xff]  ;;  %7393 = vst [vmem:[#allocation22_spill] sm:$0xff] %v6594_v35  ;;  %7394 = vst [vmem:[#allocation28_spill] sm:$0xff] %v6597_v36 }
 0xc6f   :  { %4476 = vrcp.f32 %v3256_v38  ;;  %7392 = vst [vmem:[#allocation21_spill] sm:$0xff] %v6591_v33  ;;  %v6600_v38 = vld [vmem:[#allocation10 + $0x60] sm:$0xff]  ;;  %v6603_v41 = vld [vmem:[#allocation10 + $0x70] sm:$0xff] }
 0xc70   :  { %4478 = vrcp.f32 %v3267_v46  ;;  %7395 = vst [vmem:[#allocation23_spill] sm:$0xff] %v6600_v38  ;;  %7396 = vst [vmem:[#allocation30_spill] sm:$0xff] %v6603_v41  ;;  %v6615_v46 = vld [vmem:[#allocation10 + $0x50] sm:$0xff] }
 0xc71   :  { %7400 = vst [vmem:[#allocation19_spill] sm:$0xff] %v6615_v46 }
 0xc7a   :  { %v4473_v42 = vpop.eup %4472 }
 0xc7b   :  { %v4475_v43 = vpop.eup %4474 }
 0xc7c   :  { %v4477_v44 = vpop.eup %4476  ;;  %v3271_v7 = vmul.f32 %v4475_v43, %v4473_v42  ;;  %v6606_v42 = vld [vmem:[#allocation10 + $0x48] sm:$0xff]  ;;  %v6609_v43 = vld [vmem:[#allocation10 + $0x58] sm:$0xff] }
 0xc7d   :  { %v3270_v1 = vmul.f32 %v4477_v44, %v6374_v51  ;;  %v4479_v2 = vpop.eup %4478  ;;  %v7386_v51 = vld [vmem:[#allocation33_spill] sm:$0xff]  ;;  %7397 = vst [vmem:[#allocation25_spill] sm:$0xff] %v6606_v42  ;;  %7398 = vst [vmem:[#allocation32_spill] sm:$0xff] %v6609_v43  ;;  %v6612_v44 = vld [vmem:[#allocation10 + $0x40] sm:$0xff] }
 0xc7e   :  { %7399 = vst [vmem:[#allocation27_spill] sm:$0xff] %v6612_v44 }
 0xc7f   :  { %v6521_v61 = vadd.f32 %v3271_v7, %v3270_v1  ;;  %v6618_v1 = vld [vmem:[#allocation10 + $0x28] sm:$0xff]  ;;  %v6621_v7 = vld [vmem:[#allocation10 + $0x38] sm:$0xff] }
 0xc80   :  { %7401 = vst [vmem:[#allocation20_spill] sm:$0xff] %v6618_v1  ;;  %7402 = vst [vmem:[#allocation45_spill] sm:$0xff] %v6621_v7 }
 0xc81   :  { %4480 = vtanh.f32 %v6521_v61 }
 0xc8e   :  { %v4481_v23 = vpop.eup %4480 }
 0xc8f   :  { %v3274_v37 = vmul.f32 %v4481_v23, %v4479_v2  ;;  %v6624_v2 = vld [vmem:[#allocation10 + $0x20] sm:$0xff]  ;;  %v6627_v23 = vld [vmem:[#allocation10 + $0x30] sm:$0xff] }
 0xc90   :  { %7403 = vst [vmem:[#allocation46_spill] sm:$0xff] %v6624_v2  ;;  %7404 = vst [vmem:[#allocation51_spill] sm:$0xff] %v6627_v23 }
 0xc91   :  { %3340 = vmatmul.mubr.f32.vlgmr.msra.gmra.mxu0 %v3274_v37  ;;  %3411 = vmatmul.mubr.f32.vlgmr.msra.gmra.mxu1 %v3274_v37  ;;  %v6630_v37 = vld [vmem:[#allocation10 + $0x8] sm:$0xff] }
 0xc92   :  { %3472 = vmatpush1.msra.mxu0 %v6377_v3  ;;  %3543 = vmatpush1.msra.mxu1 %v6380_v59  ;;  %7405 = vst [vmem:[#allocation34_spill] sm:$0xff] %v6630_v37 }
 0xc93   :  { %3473 = vmatprep.subr.mxu0 %v6383_v13  ;;  %3544 = vmatprep.subr.mxu1 %v6386_v8 }
 0xc94   :  { %3474 = vmatpush1.msra.mxu0 %v6389_v10  ;;  %3545 = vmatpush1.msra.mxu1 %v6392_v12 }
 0xc95   :  { %3475 = vmatprep.subr.mxu0 %v6395_v15  ;;  %3546 = vmatprep.subr.mxu1 %v6398_v16 }
 0xc96   :  { %3476 = vmatpush1.msra.mxu0 %v6401_v39  ;;  %3547 = vmatpush1.msra.mxu1 %v6404_v20 }
 0xc97   :  { %3477 = vmatprep.subr.mxu0 %v6407_v60  ;;  %3548 = vmatprep.subr.mxu1 %v6410_v22 }
 0xc98   :  { %3478 = vmatpush1.msra.mxu0 %v6413_v49  ;;  %3549 = vmatpush1.msra.mxu1 %v6416_v58 }
 0xc99   :  { %3479 = vmatprep.subr.mxu0 %v6419_v17  ;;  %3550 = vmatprep.subr.mxu1 %v6422_v25 }
 0xc9a   :  { %3480 = vmatpush1.msra.mxu0 %v6425_v62  ;;  %3551 = vmatpush1.msra.mxu1 %v6428_v14 }
 0xc9b   :  { %3481 = vmatprep.subr.mxu0 %v6431_v6  ;;  %3552 = vmatprep.subr.mxu1 %v6434_v29 }
 0xc9c   :  { %3482 = vmatpush1.msra.mxu0 %v6437_v28  ;;  %3553 = vmatpush1.msra.mxu1 %v6440_v21 }
 0xc9d   :  { %3483 = vmatprep.subr.mxu0 %v6443_v55  ;;  %3554 = vmatprep.subr.mxu1 %v6446_v4 }
 0xc9e   :  { %3484 = vmatpush1.msra.mxu0 %v6449_v57  ;;  %3555 = vmatpush1.msra.mxu1 %v7386_v51 }
 0xc9f   :  { %3485 = vmatprep.subr.mxu0 %v7387_v50  ;;  %3556 = vmatprep.subr.mxu1 %v7388_v56 }
 0xca0   :  { %3486 = vmatpush1.msra.mxu0 %v6461_v47  ;;  %3557 = vmatpush1.msra.mxu1 %v6464_v48 }
 0xca1   :  { %3487 = vmatprep.subr.mxu0 %v6467_v53  ;;  %3558 = vmatprep.subr.mxu1 %v6470_v52 }
 0xca2   :  { %3488 = vmatpush1.msra.mxu0 %v6473_v34  ;;  %3559 = vmatpush1.msra.mxu1 %v6476_v5 }
 0xca3   :  { %3489 = vmatprep.subr.mxu0 %v6558_v24  ;;  %3560 = vmatprep.subr.mxu1 %v6561_v54 }
 0xca4   :  { %3490 = vmatpush1.msra.mxu0 %v6564_v11  ;;  %3561 = vmatpush1.msra.mxu1 %v6567_v63 }
 0xca5   :  { %3491 = vmatprep.subr.mxu0 %v6570_v9  ;;  %3562 = vmatprep.subr.mxu1 %v6573_v26 }
 0xca6   :  { %3492 = vmatpush1.msra.mxu0 %v6576_v27  ;;  %3563 = vmatpush1.msra.mxu1 %v6579_v30 }
 0xca7   :  { %3493 = vmatprep.subr.mxu0 %v6582_v31  ;;  %3564 = vmatprep.subr.mxu1 %v6585_v32 }
 0xca8   :  { %3494 = vmatpush1.msra.mxu0 %v6588_v19  ;;  %3565 = vmatpush1.msra.mxu1 %v6591_v33 }
 0xca9   :  { %3495 = vmatprep.subr.mxu0 %v6594_v35  ;;  %3566 = vmatprep.subr.mxu1 %v6597_v36  ;;  %v7410_v36 = vld [vmem:[#allocation44_spill] sm:$0xff] }
 0xcaa   :  { %3496 = vmatpush1.msra.mxu0 %v6600_v38  ;;  %3567 = vmatpush1.msra.mxu1 %v6603_v41  ;;  %v7409_v38 = vld [vmem:[#allocation41_spill] sm:$0xff] }
 0xcab   :  { %3497 = vmatprep.subr.mxu0 %v6606_v42  ;;  %3568 = vmatprep.subr.mxu1 %v6609_v43 }
 0xcac   :  { %3498 = vmatpush1.msra.mxu0 %v6612_v44  ;;  %3569 = vmatpush1.msra.mxu1 %v6615_v46  ;;  %v6633_v46 = vld [vmem:[#allocation10 + $0x18] sm:$0xff] }
 0xcad   :  { %3499 = vmatprep.subr.mxu0 %v6618_v1  ;;  %3570 = vmatprep.subr.mxu1 %v6621_v7  ;;  %7406 = vst [vmem:[#allocation29_spill] sm:$0xff] %v6633_v46  ;;  %v6636_v1 = vld [vmem:[#allocation10] sm:$0xff]  ;;  %v6640_v7 = vld [vmem:[#allocation10 + $0x10] sm:$0xff] }
 0xcae   :  { %3500 = vmatpush1.msra.mxu0 %v6624_v2  ;;  %3571 = vmatpush1.msra.mxu1 %v6627_v23  ;;  %7407 = vst [vmem:[#allocation36_spill] sm:$0xff] %v6636_v1  ;;  %7408 = vst [vmem:[#allocation31_spill] sm:$0xff] %v6640_v7 }
 0xcaf   :  { %3501 = vmatprep.subr.mxu0 %v6630_v37  ;;  %3572 = vmatprep.subr.mxu1 %v6633_v46 }
 0xcb0   :  { %3502 = vmatpush1.msra.mxu0 %v6636_v1  ;;  %3535 = vmatprep.mubr.f32.mxu0 %v7373_v45 }
 0xcb1   :  { %3573 = vmatpush1.msra.mxu1 %v6640_v7  ;;  %3606 = vmatprep.mubr.f32.mxu1 %v7373_v45  ;;  %v7411_v7 = vcombine.low %v7409_v38, %v7410_v36 }
 0xcb2   :  { %3667 = vmatprep.subr.mxu0 %v6509_v40  ;;  %3738 = vmatprep.subr.mxu1 %v6512_v18 }
 0xd51   :  { %v3341_v37 = vpop.f32.mrf.mxu0  ;;  %v3412_v23 = vpop.f32.mrf.mxu1 }
 0xd53   :  { %v3343_v2 = vpop.f32.mrf.mxu0  ;;  %v3414_v46 = vpop.f32.mrf.mxu1 }
 0xd54   :  { %v3421_v44 = vcombine.low %v3341_v37, %v3343_v2  ;;  %v3422_v43 = vcombine.low %v3412_v23, %v3414_v46  ;;  %v7415_v23 = vld [vmem:[#allocation21_spill] sm:$0xff]  ;;  %v7416_v37 = vld [vmem:[#allocation22_spill] sm:$0xff] }
 0xd56   :  { %v3429_v1 = vrot.slane %v3421_v44, %v5214_v0  ;;  %v3436_v42 = vrot.slane %v3422_v43, %v5214_v0 }
 0xd58   :  { %v3437_v41 = vcombine.low %v3429_v1, %v3436_v42 }
 0xd5a   :  { %v3439_v35 = vadd.f32 %v3437_v41, %v7411_v7 }
 0xd5c   :  { %v4211_v45 = vmul.f32 -1.442695, %v3439_v35  ;;  %v3447_v33 = vrot.slane %v3439_v35, 2  ;;  %v3458_v18 = vrot.slane %v3439_v35, 6  ;;  %v3455_v31 = vrot.slane %v3439_v35, 4  ;;  %v7414_v35 = vld [vmem:[#allocation24_spill] sm:$0xff] }
 0xd5e   :  { %4482 = vpow2.f32 %v4211_v45  ;;  %v4212_v40 = vmul.f32 -1.442695, %v3447_v33  ;;  %v4213_v19 = vmul.f32 -1.442695, %v3458_v18 }
 0xd60   :  { %4484 = vpow2.f32 %v4212_v40 }
 0xd61   :  { %4486 = vpow2.f32 %v4213_v19 }
 0xd6b   :  { %v4483_v32 = vpop.eup %4482 }
 0xd6c   :  { %v3443_v2 = vadd.f32 1.0, %v4483_v32 }
 0xd6d   :  { %v4485_v46 = vpop.eup %4484 }
 0xd6e   :  { %4488 = vrcp.f32 %v3443_v2  ;;  %v3452_v44 = vadd.f32 1.0, %v4485_v46  ;;  %v4487_v42 = vpop.eup %4486  ;;  %v7417_v2 = vld [vmem:[#allocation28_spill] sm:$0xff]  ;;  %v7418_v46 = vld [vmem:[#allocation23_spill] sm:$0xff] }
 0xd6f   :  { %4490 = vtanh.f32 %v3455_v31  ;;  %v3463_v7 = vadd.f32 1.0, %v4487_v42  ;;  %v7413_v31 = vld [vmem:[#allocation49_spill] sm:$0xff] }
 0xd70   :  { %4492 = vrcp.f32 %v3452_v44  ;;  %v7419_v44 = vld [vmem:[#allocation30_spill] sm:$0xff]  ;;  %v7420_v42 = vld [vmem:[#allocation25_spill] sm:$0xff] }
 0xd71   :  { %4494 = vrcp.f32 %v3463_v7  ;;  %v7424_v7 = vld [vmem:[#allocation20_spill] sm:$0xff] }
 0xd7b   :  { %v4489_v43 = vpop.eup %4488 }
 0xd7c   :  { %v4491_v1 = vpop.eup %4490 }
 0xd7d   :  { %v4493_v41 = vpop.eup %4492  ;;  %v3467_v33 = vmul.f32 %v4491_v1, %v4489_v43  ;;  %v7421_v43 = vld [vmem:[#allocation32_spill] sm:$0xff]  ;;  %v7422_v1 = vld [vmem:[#allocation27_spill] sm:$0xff] }
 0xd7e   :  { %v3466_v45 = vmul.f32 %v4493_v41, %v6521_v61  ;;  %v4495_v18 = vpop.eup %4494  ;;  %v7412_v61 = vld [vmem:[#allocation47_spill] sm:$0xff] }
 0xd7f   :  { %v7423_v41 = vld [vmem:[#allocation19_spill] sm:$0xff] }
 0xd80   :  { %v6652_v40 = vadd.f32 %v3467_v33, %v3466_v45  ;;  %v7425_v45 = vld [vmem:[#allocation45_spill] sm:$0xff]  ;;  %v7426_v33 = vld [vmem:[#allocation46_spill] sm:$0xff] }
 0xd82   :  { %4496 = vtanh.f32 %v6652_v40 }
 0xd8f   :  { %v4497_v32 = vpop.eup %4496 }
 0xd90   :  { %v3470_v19 = vmul.f32 %v4497_v32, %v4495_v18  ;;  %v7427_v18 = vld [vmem:[#allocation51_spill] sm:$0xff]  ;;  %v7428_v32 = vld [vmem:[#allocation34_spill] sm:$0xff] }
 0xd92   :  { %3536 = vmatmul.mubr.f32.vlgmr.msra.gmra.mxu0 %v3470_v19  ;;  %3607 = vmatmul.mubr.f32.vlgmr.msra.gmra.mxu1 %v3470_v19  ;;  %v7429_v19 = vld [vmem:[#allocation29_spill] sm:$0xff] }
 0xd93   :  { %3668 = vmatpush1.msra.mxu0 %v6377_v3  ;;  %3739 = vmatpush1.msra.mxu1 %v6380_v59 }
 0xd94   :  { %3669 = vmatprep.subr.mxu0 %v6383_v13  ;;  %3740 = vmatprep.subr.mxu1 %v6386_v8 }
 0xd95   :  { %3670 = vmatpush1.msra.mxu0 %v6389_v10  ;;  %3741 = vmatpush1.msra.mxu1 %v6392_v12 }
 0xd96   :  { %3671 = vmatprep.subr.mxu0 %v6395_v15  ;;  %3742 = vmatprep.subr.mxu1 %v6398_v16 }
 0xd97   :  { %3672 = vmatpush1.msra.mxu0 %v6401_v39  ;;  %3743 = vmatpush1.msra.mxu1 %v6404_v20 }
 0xd98   :  { %3673 = vmatprep.subr.mxu0 %v6407_v60  ;;  %3744 = vmatprep.subr.mxu1 %v6410_v22 }
 0xd99   :  { %3674 = vmatpush1.msra.mxu0 %v6413_v49  ;;  %3745 = vmatpush1.msra.mxu1 %v6416_v58 }
 0xd9a   :  { %3675 = vmatprep.subr.mxu0 %v6419_v17  ;;  %3746 = vmatprep.subr.mxu1 %v6422_v25 }
 0xd9b   :  { %3676 = vmatpush1.msra.mxu0 %v6425_v62  ;;  %3747 = vmatpush1.msra.mxu1 %v6428_v14 }
 0xd9c   :  { %3677 = vmatprep.subr.mxu0 %v6431_v6  ;;  %3748 = vmatprep.subr.mxu1 %v6434_v29 }
 0xd9d   :  { %3678 = vmatpush1.msra.mxu0 %v6437_v28  ;;  %3749 = vmatpush1.msra.mxu1 %v6440_v21 }
 0xd9e   :  { %3679 = vmatprep.subr.mxu0 %v6443_v55  ;;  %3750 = vmatprep.subr.mxu1 %v6446_v4 }
 0xd9f   :  { %3680 = vmatpush1.msra.mxu0 %v6449_v57  ;;  %3751 = vmatpush1.msra.mxu1 %v7386_v51 }
 0xda0   :  { %3681 = vmatprep.subr.mxu0 %v7387_v50  ;;  %3752 = vmatprep.subr.mxu1 %v7388_v56 }
 0xda1   :  { %3682 = vmatpush1.msra.mxu0 %v6461_v47  ;;  %3753 = vmatpush1.msra.mxu1 %v6464_v48 }
 0xda2   :  { %3683 = vmatprep.subr.mxu0 %v6467_v53  ;;  %3754 = vmatprep.subr.mxu1 %v6470_v52 }
 0xda3   :  { %3684 = vmatpush1.msra.mxu0 %v6473_v34  ;;  %3755 = vmatpush1.msra.mxu1 %v6476_v5 }
 0xda4   :  { %3685 = vmatprep.subr.mxu0 %v6558_v24  ;;  %3756 = vmatprep.subr.mxu1 %v6561_v54 }
 0xda5   :  { %3686 = vmatpush1.msra.mxu0 %v6564_v11  ;;  %3757 = vmatpush1.msra.mxu1 %v6567_v63 }
 0xda6   :  { %3687 = vmatprep.subr.mxu0 %v6570_v9  ;;  %3758 = vmatprep.subr.mxu1 %v6573_v26 }
 0xda7   :  { %3688 = vmatpush1.msra.mxu0 %v6576_v27  ;;  %3759 = vmatpush1.msra.mxu1 %v6579_v30 }
 0xda8   :  { %3689 = vmatprep.subr.mxu0 %v7412_v61  ;;  %3760 = vmatprep.subr.mxu1 %v7413_v31 }
 0xda9   :  { %3690 = vmatpush1.msra.mxu0 %v7414_v35  ;;  %3761 = vmatpush1.msra.mxu1 %v7415_v23 }
 0xdaa   :  { %3691 = vmatprep.subr.mxu0 %v7416_v37  ;;  %3762 = vmatprep.subr.mxu1 %v7417_v2 }
 0xdab   :  { %3692 = vmatpush1.msra.mxu0 %v7418_v46  ;;  %3763 = vmatpush1.msra.mxu1 %v7419_v44  ;;  %v7430_v44 = vld [vmem:[#allocation36_spill] sm:$0xff] }
 0xdac   :  { %3693 = vmatprep.subr.mxu0 %v7420_v42  ;;  %3764 = vmatprep.subr.mxu1 %v7421_v43  ;;  %v7431_v42 = vmov 0.0   ;;  %v7432_v43 = vld [vmem:[#allocation31_spill] sm:$0xff] }
 0xdad   :  { %3694 = vmatpush1.msra.mxu0 %v7422_v1  ;;  %3765 = vmatpush1.msra.mxu1 %v7423_v41  ;;  %v7433_v41 = vld [vmem:[#allocation39_spill] sm:$0xff] }
 0xdae   :  { %3695 = vmatprep.subr.mxu0 %v7424_v7  ;;  %3766 = vmatprep.subr.mxu1 %v7425_v45  ;;  %v7434_v7 = vld [vmem:[#allocation43_spill] sm:$0xff] }
 0xdaf   :  { %3696 = vmatpush1.msra.mxu0 %v7426_v33  ;;  %3767 = vmatpush1.msra.mxu1 %v7427_v18 }
 0xdb0   :  { %3697 = vmatprep.subr.mxu0 %v7428_v32  ;;  %3768 = vmatprep.subr.mxu1 %v7429_v19 }
 0xdb1   :  { %3698 = vmatpush1.msra.mxu0 %v7430_v44  ;;  %3731 = vmatprep.mubr.f32.mxu0 %v7431_v42 }
 0xdb2   :  { %3769 = vmatpush1.msra.mxu1 %v7432_v43  ;;  %3802 = vmatprep.mubr.f32.mxu1 %v7431_v42  ;;  %v7435_v43 = vcombine.high %v7409_v38, %v7410_v36 }
 0xdb3   :  { %3863 = vmatprep.subr.mxu0 %v7433_v41  ;;  %3934 = vmatprep.subr.mxu1 %v7434_v7 }
 0xe52   :  { %v3537_v45 = vpop.f32.mrf.mxu0  ;;  %v3608_v33 = vpop.f32.mrf.mxu1 }
 0xe54   :  { %v3539_v1 = vpop.f32.mrf.mxu0  ;;  %v3610_v18 = vpop.f32.mrf.mxu1 }
 0xe55   :  { %v3617_v46 = vcombine.low %v3537_v45, %v3539_v1  ;;  %v3618_v32 = vcombine.low %v3608_v33, %v3610_v18 }
 0xe57   :  { %v3625_v19 = vrot.slane %v3617_v46, %v5214_v0  ;;  %v3632_v44 = vrot.slane %v3618_v32, %v5214_v0 }
 0xe59   :  { %v3633_v2 = vcombine.low %v3625_v19, %v3632_v44 }
 0xe5b   :  { %v3635_v37 = vadd.f32 %v3633_v2, %v7435_v43 }
 0xe5d   :  { %v4214_v42 = vmul.f32 -1.442695, %v3635_v37  ;;  %v3643_v23 = vrot.slane %v3635_v37, 2  ;;  %v3654_v7 = vrot.slane %v3635_v37, 6  ;;  %v3651_v61 = vrot.slane %v3635_v37, 4 }
 0xe5f   :  { %4498 = vpow2.f32 %v4214_v42  ;;  %v4215_v41 = vmul.f32 -1.442695, %v3643_v23  ;;  %v4216_v35 = vmul.f32 -1.442695, %v3654_v7 }
 0xe61   :  { %4500 = vpow2.f32 %v4215_v41 }
 0xe62   :  { %4502 = vpow2.f32 %v4216_v35 }
 0xe6c   :  { %v4499_v31 = vpop.eup %4498 }
 0xe6d   :  { %v3639_v1 = vadd.f32 1.0, %v4499_v31 }
 0xe6e   :  { %v4501_v45 = vpop.eup %4500 }
 0xe6f   :  { %4504 = vrcp.f32 %v3639_v1  ;;  %v3648_v46 = vadd.f32 1.0, %v4501_v45  ;;  %v4503_v44 = vpop.eup %4502 }
 0xe70   :  { %4506 = vtanh.f32 %v3651_v61  ;;  %v3659_v2 = vadd.f32 1.0, %v4503_v44 }
 0xe71   :  { %4508 = vrcp.f32 %v3648_v46 }
 0xe72   :  { %4510 = vrcp.f32 %v3659_v2  ;;  %v4073_v2 = vld [vmem:[#allocation11 + $0x70] sm:$0xff] }
 0xe7c   :  { %v4505_v33 = vpop.eup %4504 }
 0xe7d   :  { %v4507_v36 = vpop.eup %4506 }
 0xe7e   :  { %v4509_v38 = vpop.eup %4508  ;;  %v3663_v23 = vmul.f32 %v4507_v36, %v4505_v33 }
 0xe7f   :  { %v3662_v42 = vmul.f32 %v4509_v38, %v6652_v40  ;;  %v4511_v31 = vpop.eup %4510  ;;  %v4074_v38 = vld [vmem:[#allocation11 + $0x78] sm:$0xff] }
 0xe81   :  { %v6727_v43 = vadd.f32 %v3663_v23, %v3662_v42  ;;  %v4072_v42 = vld [vmem:[#allocation11 + $0x68] sm:$0xff]  ;;  %v4071_v23 = vld [vmem:[#allocation11 + $0x60] sm:$0xff] }
 0xe83   :  { %4512 = vtanh.f32 %v6727_v43 }
 0xe90   :  { %v4513_v37 = vpop.eup %4512 }
 0xe91   :  { %v3666_v35 = vmul.f32 %v4513_v37, %v4511_v31  ;;  %v4069_v31 = vld [vmem:[#allocation11 + $0x50] sm:$0xff]  ;;  %v4068_v37 = vld [vmem:[#allocation11 + $0x48] sm:$0xff] }
 0xe93   :  { %3732 = vmatmul.mubr.f32.vlgmr.msra.gmra.mxu0 %v3666_v35  ;;  %3803 = vmatmul.mubr.f32.vlgmr.msra.gmra.mxu1 %v3666_v35  ;;  %v4067_v35 = vld [vmem:[#allocation11 + $0x40] sm:$0xff] }
 0xe94   :  { %3864 = vmatpush1.msra.mxu0 %v6377_v3  ;;  %3935 = vmatpush1.msra.mxu1 %v6380_v59  ;;  %v7436_v3 = vld [vmem:[#allocation47_spill] sm:$0xff]  ;;  %v7437_v59 = vld [vmem:[#allocation49_spill] sm:$0xff] }
 0xe95   :  { %3865 = vmatprep.subr.mxu0 %v6383_v13  ;;  %3936 = vmatprep.subr.mxu1 %v6386_v8  ;;  %v7438_v13 = vld [vmem:[#allocation24_spill] sm:$0xff]  ;;  %v7439_v8 = vld [vmem:[#allocation21_spill] sm:$0xff] }
 0xe96   :  { %3866 = vmatpush1.msra.mxu0 %v6389_v10  ;;  %3937 = vmatpush1.msra.mxu1 %v6392_v12  ;;  %v7440_v10 = vld [vmem:[#allocation22_spill] sm:$0xff]  ;;  %v7441_v12 = vld [vmem:[#allocation28_spill] sm:$0xff] }
 0xe97   :  { %3867 = vmatprep.subr.mxu0 %v6395_v15  ;;  %3938 = vmatprep.subr.mxu1 %v6398_v16  ;;  %v7442_v15 = vld [vmem:[#allocation23_spill] sm:$0xff]  ;;  %v7443_v16 = vld [vmem:[#allocation30_spill] sm:$0xff] }
 0xe98   :  { %3868 = vmatpush1.msra.mxu0 %v6401_v39  ;;  %3939 = vmatpush1.msra.mxu1 %v6404_v20  ;;  %v7444_v39 = vld [vmem:[#allocation25_spill] sm:$0xff]  ;;  %v7445_v20 = vld [vmem:[#allocation32_spill] sm:$0xff] }
 0xe99   :  { %3869 = vmatprep.subr.mxu0 %v6407_v60  ;;  %3940 = vmatprep.subr.mxu1 %v6410_v22  ;;  %v7446_v60 = vld [vmem:[#allocation27_spill] sm:$0xff] }
 0xe9a   :  { %3870 = vmatpush1.msra.mxu0 %v6413_v49  ;;  %3941 = vmatpush1.msra.mxu1 %v6416_v58  ;;  %v7447_v22 = vld [vmem:[#allocation19_spill] sm:$0xff]  ;;  %v7448_v49 = vld [vmem:[#allocation20_spill] sm:$0xff]  ;;  %v7449_v58 = vld [vmem:[#allocation45_spill] sm:$0xff] }
 0xe9b   :  { %3871 = vmatprep.subr.mxu0 %v6419_v17  ;;  %3942 = vmatprep.subr.mxu1 %v6422_v25  ;;  %v7450_v17 = vld [vmem:[#allocation46_spill] sm:$0xff]  ;;  %v7451_v25 = vld [vmem:[#allocation51_spill] sm:$0xff] }
 0xe9c   :  { %3872 = vmatpush1.msra.mxu0 %v6425_v62  ;;  %3943 = vmatpush1.msra.mxu1 %v6428_v14  ;;  %v7452_v62 = vld [vmem:[#allocation34_spill] sm:$0xff]  ;;  %v7453_v14 = vld [vmem:[#allocation29_spill] sm:$0xff] }
 0xe9d   :  { %3873 = vmatprep.subr.mxu0 %v6431_v6  ;;  %3944 = vmatprep.subr.mxu1 %v6434_v29  ;;  %v7454_v6 = vld [vmem:[#allocation36_spill] sm:$0xff]  ;;  %v7455_v29 = vmov 0.0  }
 0xe9e   :  { %3874 = vmatpush1.msra.mxu0 %v6437_v28  ;;  %3945 = vmatpush1.msra.mxu1 %v6440_v21  ;;  %v7456_v28 = vld [vmem:[#allocation31_spill] sm:$0xff] }
 0xe9f   :  { %3875 = vmatprep.subr.mxu0 %v6443_v55  ;;  %3946 = vmatprep.subr.mxu1 %v6446_v4 }
 0xea0   :  { %3876 = vmatpush1.msra.mxu0 %v6449_v57  ;;  %3947 = vmatpush1.msra.mxu1 %v7386_v51  ;;  %v7458_v51 = vld [vmem:[#allocation38_spill] sm:$0xff] }
 0xea1   :  { %3877 = vmatprep.subr.mxu0 %v7387_v50  ;;  %3948 = vmatprep.subr.mxu1 %v7388_v56 }
 0xea2   :  { %3878 = vmatpush1.msra.mxu0 %v6461_v47  ;;  %3949 = vmatpush1.msra.mxu1 %v6464_v48 }
 0xea3   :  { %3879 = vmatprep.subr.mxu0 %v6467_v53  ;;  %3950 = vmatprep.subr.mxu1 %v6470_v52  ;;  %v7457_v53 = vld [vmem:[#allocation26_spill] sm:$0xff] }
 0xea4   :  { %3880 = vmatpush1.msra.mxu0 %v6473_v34  ;;  %3951 = vmatpush1.msra.mxu1 %v6476_v5  ;;  %v7459_v50 = vcombine.low %v7457_v53, %v7458_v51 }
 0xea5   :  { %3881 = vmatprep.subr.mxu0 %v6558_v24  ;;  %3952 = vmatprep.subr.mxu1 %v6561_v54 }
 0xea6   :  { %3882 = vmatpush1.msra.mxu0 %v6564_v11  ;;  %3953 = vmatpush1.msra.mxu1 %v6567_v63 }
 0xea7   :  { %3883 = vmatprep.subr.mxu0 %v6570_v9  ;;  %3954 = vmatprep.subr.mxu1 %v6573_v26 }
 0xea8   :  { %3884 = vmatpush1.msra.mxu0 %v6576_v27  ;;  %3955 = vmatpush1.msra.mxu1 %v6579_v30 }
 0xea9   :  { %3885 = vmatprep.subr.mxu0 %v7436_v3  ;;  %3956 = vmatprep.subr.mxu1 %v7437_v59  ;;  %v4066_v3 = vld [vmem:[#allocation11 + $0x38] sm:$0xff]  ;;  %v4065_v59 = vld [vmem:[#allocation11 + $0x30] sm:$0xff] }
 0xeaa   :  { %3886 = vmatpush1.msra.mxu0 %v7438_v13  ;;  %3957 = vmatpush1.msra.mxu1 %v7439_v8  ;;  %v4064_v13 = vld [vmem:[#allocation11 + $0x28] sm:$0xff]  ;;  %v4063_v8 = vld [vmem:[#allocation11 + $0x20] sm:$0xff] }
 0xeab   :  { %3887 = vmatprep.subr.mxu0 %v7440_v10  ;;  %3958 = vmatprep.subr.mxu1 %v7441_v12  ;;  %v4062_v10 = vld [vmem:[#allocation11 + $0x18] sm:$0xff]  ;;  %v4061_v12 = vld [vmem:[#allocation11 + $0x10] sm:$0xff] }
 0xeac   :  { %3888 = vmatpush1.msra.mxu0 %v7442_v15  ;;  %3959 = vmatpush1.msra.mxu1 %v7443_v16  ;;  %v4060_v15 = vld [vmem:[#allocation11 + $0x8] sm:$0xff]  ;;  %v4059_v16 = vld [vmem:[#allocation11] sm:$0xff] }
 0xead   :  { %3889 = vmatprep.subr.mxu0 %v7444_v39  ;;  %3960 = vmatprep.subr.mxu1 %v7445_v20 }
 0xeae   :  { %3890 = vmatpush1.msra.mxu0 %v7446_v60  ;;  %3961 = vmatpush1.msra.mxu1 %v7447_v22 }
 0xeaf   :  { %3891 = vmatprep.subr.mxu0 %v7448_v49  ;;  %3962 = vmatprep.subr.mxu1 %v7449_v58 }
 0xeb0   :  { %3892 = vmatpush1.msra.mxu0 %v7450_v17  ;;  %3963 = vmatpush1.msra.mxu1 %v7451_v25 }
 0xeb1   :  { %3893 = vmatprep.subr.mxu0 %v7452_v62  ;;  %3964 = vmatprep.subr.mxu1 %v7453_v14  ;;  %v7460_v14 = vcombine.high %v7457_v53, %v7458_v51 }
 0xeb2   :  { %3894 = vmatpush1.msra.mxu0 %v7454_v6  ;;  %3927 = vmatprep.mubr.f32.mxu0 %v7455_v29 }
 0xeb3   :  { %3965 = vmatpush1.msra.mxu1 %v7456_v28  ;;  %3998 = vmatprep.mubr.f32.mxu1 %v7455_v29 }
 0xeb4   :  { %4241 = vmatprep.subr.mxu0 %v7455_v29 }
 0xf53   :  { %v3733_v21 = vpop.f32.mrf.mxu0  ;;  %v3804_v55 = vpop.f32.mrf.mxu1 }
 0xf55   :  { %v3735_v4 = vpop.f32.mrf.mxu0  ;;  %v3806_v57 = vpop.f32.mrf.mxu1 }
 0xf56   :  { %v3813_v52 = vcombine.low %v3733_v21, %v3735_v4  ;;  %v3814_v34 = vcombine.low %v3804_v55, %v3806_v57 }
 0xf58   :  { %v3821_v5 = vrot.slane %v3813_v52, %v5214_v0  ;;  %v3828_v47 = vrot.slane %v3814_v34, %v5214_v0 }
 0xf5a   :  { %v3829_v48 = vcombine.low %v3821_v5, %v3828_v47 }
 0xf5c   :  { %v3831_v56 = vadd.f32 %v3829_v48, %v7459_v50 }
 0xf5e   :  { %v4217_v24 = vmul.f32 -1.442695, %v3831_v56  ;;  %v3839_v54 = vrot.slane %v3831_v56, 2  ;;  %v3850_v63 = vrot.slane %v3831_v56, 6  ;;  %v3847_v27 = vrot.slane %v3831_v56, 4 }
 0xf60   :  { %4514 = vpow2.f32 %v4217_v24  ;;  %v4218_v11 = vmul.f32 -1.442695, %v3839_v54  ;;  %v4219_v9 = vmul.f32 -1.442695, %v3850_v63 }
 0xf62   :  { %4516 = vpow2.f32 %v4218_v11 }
 0xf63   :  { %4518 = vpow2.f32 %v4219_v9 }
 0xf6d   :  { %v4515_v26 = vpop.eup %4514 }
 0xf6e   :  { %v3835_v30 = vadd.f32 1.0, %v4515_v26  ;;  %v4223_v26 = vld [vmem:[%s6840_s8] ss:$0 sm:$0xff] }
 0xf6f   :  { %v4517_v40 = vpop.eup %4516 }
 0xf70   :  { %4520 = vrcp.f32 %v3835_v30  ;;  %v3844_v61 = vadd.f32 1.0, %v4517_v40  ;;  %v4519_v18 = vpop.eup %4518 }
 0xf71   :  { %4522 = vtanh.f32 %v3847_v27  ;;  %v3855_v7 = vadd.f32 1.0, %v4519_v18 }
 0xf72   :  { %4524 = vrcp.f32 %v3844_v61 }
 0xf73   :  { %4526 = vrcp.f32 %v3855_v7 }
 0xf7d   :  { %v4521_v32 = vpop.eup %4520 }
 0xf7e   :  { %v4523_v19 = vpop.eup %4522 }
 0xf7f   :  { %v4525_v41 = vpop.eup %4524  ;;  %v3859_v45 = vmul.f32 %v4523_v19, %v4521_v32 }
 0xf80   :  { %v3858_v1 = vmul.f32 %v4525_v41, %v6727_v43  ;;  %v4527_v44 = vpop.eup %4526  ;;  %v4070_v43 = vld [vmem:[#allocation11 + $0x58] sm:$0xff] }
 0xf82   :  { %v6801_v46 = vadd.f32 %v3859_v45, %v3858_v1 }
 0xf84   :  { %4528 = vtanh.f32 %v6801_v46 }
 0xf91   :  { %v4529_v33 = vpop.eup %4528 }
 0xf92   :  { %v3862_v36 = vmul.f32 %v4529_v33, %v4527_v44 }
 0xf94   :  { %3928 = vmatmul.mubr.f32.vlgmr.msra.gmra.mxu0 %v3862_v36  ;;  %3999 = vmatmul.mubr.f32.vlgmr.msra.gmra.mxu1 %v3862_v36 }
 0xf95   :  { %4242 = vmatpush3.msra.mxu0 %v4074_v38  ;;  %4273 = vmatprep.mubr.msk.f32.mxu0 %vm4836_vm4, %v7455_v29 }
 0xf96   :  { %4243 = vmatprep.subr.mxu0 %v7455_v29 }
 0xf97   :  { %4244 = vmatpush3.msra.mxu0 %v4073_v2 }
 0xf98   :  { %4245 = vmatprep.subr.mxu0 %v7455_v29 }
 0xf99   :  { %4246 = vmatpush3.msra.mxu0 %v4072_v42 }
 0xf9a   :  { %4247 = vmatprep.subr.mxu0 %v7455_v29 }
 0xf9b   :  { %4248 = vmatpush3.msra.mxu0 %v4071_v23 }
 0xf9c   :  { %4249 = vmatprep.subr.mxu0 %v7455_v29 }
 0xf9d   :  { %4250 = vmatpush3.msra.mxu0 %v4070_v43 }
 0xf9e   :  { %4251 = vmatprep.subr.mxu0 %v7455_v29 }
 0xf9f   :  { %4252 = vmatpush3.msra.mxu0 %v4069_v31 }
 0xfa0   :  { %4253 = vmatprep.subr.mxu0 %v7455_v29 }
 0xfa1   :  { %4254 = vmatpush3.msra.mxu0 %v4068_v37 }
 0xfa2   :  { %4255 = vmatprep.subr.mxu0 %v7455_v29 }
 0xfa3   :  { %4256 = vmatpush3.msra.mxu0 %v4067_v35 }
 0xfa4   :  { %4257 = vmatprep.subr.mxu0 %v7455_v29 }
 0xfa5   :  { %4258 = vmatpush3.msra.mxu0 %v4066_v3 }
 0xfa6   :  { %4259 = vmatprep.subr.mxu0 %v7455_v29 }
 0xfa7   :  { %4260 = vmatpush3.msra.mxu0 %v4065_v59 }
 0xfa8   :  { %4261 = vmatprep.subr.mxu0 %v7455_v29 }
 0xfa9   :  { %4262 = vmatpush3.msra.mxu0 %v4064_v13 }
 0xfaa   :  { %4263 = vmatprep.subr.mxu0 %v7455_v29 }
 0xfab   :  { %4264 = vmatpush3.msra.mxu0 %v4063_v8 }
 0xfac   :  { %4265 = vmatprep.subr.mxu0 %v7455_v29 }
 0xfad   :  { %4266 = vmatpush3.msra.mxu0 %v4062_v10 }
 0xfae   :  { %4267 = vmatprep.subr.mxu0 %v7455_v29 }
 0xfaf   :  { %4268 = vmatpush3.msra.mxu0 %v4061_v12 }
 0xfb0   :  { %4269 = vmatprep.subr.mxu0 %v7455_v29 }
 0xfb1   :  { %4270 = vmatpush3.msra.mxu0 %v4060_v15 }
 0xfb2   :  { %4271 = vmatprep.subr.mxu0 %v7455_v29 }
 0xfb3   :  { %4272 = vmatpush3.msra.mxu0 %v4059_v16 }
0x1054   :  { %v3929_v39 = vpop.f32.mrf.mxu0  ;;  %v4000_v20 = vpop.f32.mrf.mxu1 }
0x1056   :  { %v3931_v60 = vpop.f32.mrf.mxu0  ;;  %v4002_v22 = vpop.f32.mrf.mxu1 }
0x1057   :  { %v4009_v49 = vcombine.low %v3929_v39, %v3931_v60  ;;  %v4010_v58 = vcombine.low %v4000_v20, %v4002_v22 }
0x1059   :  { %v4017_v17 = vrot.slane %v4009_v49, %v5214_v0  ;;  %v4024_v25 = vrot.slane %v4010_v58, %v5214_v0 }
0x105b   :  { %v4025_v62 = vcombine.low %v4017_v17, %v4024_v25 }
0x105d   :  { %v4027_v6 = vadd.f32 %v4025_v62, %v7460_v14 }
0x105f   :  { %v4220_v28 = vmul.f32 -1.442695, %v4027_v6  ;;  %v4035_v21 = vrot.slane %v4027_v6, 2  ;;  %v4046_v55 = vrot.slane %v4027_v6, 6  ;;  %v4043_v52 = vrot.slane %v4027_v6, 4 }
0x1061   :  { %4530 = vpow2.f32 %v4220_v28  ;;  %v4221_v29 = vmul.f32 -1.442695, %v4035_v21  ;;  %v4222_v4 = vmul.f32 -1.442695, %v4046_v55 }
0x1063   :  { %4532 = vpow2.f32 %v4221_v29 }
0x1064   :  { %4534 = vpow2.f32 %v4222_v4 }
0x106e   :  { %v4531_v57 = vpop.eup %4530 }
0x106f   :  { %v4031_v34 = vadd.f32 1.0, %v4531_v57 }
0x1070   :  { %v4533_v5 = vpop.eup %4532 }
0x1071   :  { %4536 = vrcp.f32 %v4031_v34  ;;  %v4040_v47 = vadd.f32 1.0, %v4533_v5  ;;  %v4535_v0 = vpop.eup %4534 }
0x1072   :  { %4538 = vtanh.f32 %v4043_v52  ;;  %v4051_v50 = vadd.f32 1.0, %v4535_v0 }
0x1073   :  { %4540 = vrcp.f32 %v4040_v47 }
0x1074   :  { %4542 = vrcp.f32 %v4051_v50 }
0x107e   :  { %v4537_v48 = vpop.eup %4536 }
0x107f   :  { %v4539_v53 = vpop.eup %4538 }
0x1080   :  { %v4541_v51 = vpop.eup %4540  ;;  %v4055_v24 = vmul.f32 %v4539_v53, %v4537_v48 }
0x1081   :  { %v4054_v56 = vmul.f32 %v4541_v51, %v6801_v46  ;;  %v4543_v11 = vpop.eup %4542 }
0x1083   :  { %v4056_v54 = vadd.f32 %v4055_v24, %v4054_v56 }
0x1085   :  { %4544 = vtanh.f32 %v4056_v54 }
0x1092   :  { %v4545_v63 = vpop.eup %4544 }
0x1093   :  { %v4058_v9 = vmul.f32 %v4545_v63, %v4543_v11 }
0x1095   :  { %4274 = vmatmul.mubr.f32.vlgmr.msra.gmra.mxu0 %v4058_v9 }
0x1155   :  { %v4148_v27 = vpop.f32.mrf.mxu0 }
0x1156   :  { %v4149_v30 = vadd.f32 %v4223_v26, %v4148_v27 }
0x1157   :  { %v4275_v40 = vpop.f32.mrf.mxu0 }
0x1158   :  { %4152 = vst [vmem:[#allocation13] sm:$0x3] %v4149_v30 }
0x1159   :  { %4805 = shalt.err (!%p4802_p6)
}
0x115a   :  { %4162 = dma.vmem_to_hbm [thread:$0]  %s4160_s21, 32, %s6841_s9, [#allocation4]  }
0x115b   :  { %4822 = dma.done.wait [#allocation4], 32  }
0x115c   :  { %4823 = vsyncadd [#allocation4], 4294967264 }
0x115d   :  { %4166 = vsyncpa [#allocation3], 1 }
0x115e   :  { %4167 = vsyncpa [#allocation6], 1 }
0x115f   :  { %4168 = vsyncpa [#allocation9], 1 }
0x1160   :  { %4169 = vsyncpa [#allocation12], 1 }
0x1161   :  { %4170 = vsyncpa [#allocation4], 1 }

</bundles_post_ra>
